<compile_context>
chip_gen: v7x
topology: tpu7x:2x2x1
jax: 0.10.0
libtpu: 0.0.40
codegen_flags: <defaults>
</compile_context>

<pallas_src>
import functools

import numpy as np

import jax
import jax.numpy as jnp
from jax import lax
from jax.experimental import pallas as pl
from jax.experimental.pallas import tpu as pltpu

LEAKY_SLOPE = 0.01


# ----------------------------------------------------------------------------
# Fused Pallas kernel: all layers + pool + heads, one batch *chunk* / grid step
# ----------------------------------------------------------------------------
def _fused_forward_kernel(x_ref, rcat_ref, lcat_ref, bias_ref, sel_ref,
                          hw_ref, hb_ref, out_ref, tmp_ref,
                          *, num_layers, hmax, lmax, chunk, slope):
    # x_ref    : (1, BH, LMAX)           batch-chunk activation (BH = chunk*HMAX), f32
    # rcat_ref : (NL, LMAX, 4*LMAX)      [R_0|R_1|R_2|R_3] per layer, bf16
    # lcat_ref : (NL, BH, 4*BH)          [Lb_0 Lb_1 Lb_2 Lb_3] per layer (block-diag
    #                                    over batch elements), bf16 (entries 0/1)
    # bias_ref : (NL, BH, LMAX)          per-layer bias, zero on padding, f32
    # sel_ref  : (8, BH)                 0/1 per-element row-pool selector, f32
    # hw_ref   : (LMAX, LMAX)            merged pooled heads (cols 0/1 = src/cls), f32
    # hb_ref   : (1, LMAX)               head biases, f32
    # out_ref  : (1, 8, LMAX)            lane/sublane-dense output slab
    # tmp_ref  : (4*BH, LMAX) bf16       scratch for the vertical tap restack
    bh = chunk * hmax
    h = x_ref[0]                                                    # (BH, LMAX) f32
    for layer in range(num_layers):
        # (1) all 4 kw/channel taps in ONE bf16 MXU dot: (BH,128) @ (128,512)
        tmp_h = jnp.dot(h.astype(jnp.bfloat16), rcat_ref[layer],
                        preferred_element_type=jnp.float32)         # (BH, 4*LMAX) f32
        # (2) restack the 4 lane blocks vertically (4 cheap static VMEM copies)
        for t in range(4):
            tmp_ref[t * bh:(t + 1) * bh, :] = (
                tmp_h[:, t * lmax:(t + 1) * lmax].astype(jnp.bfloat16))
        # (3) all 4 row-resampling taps in ONE bf16 MXU dot: (BH,4BH) @ (4BH,128)
        acc = bias_ref[layer] + jnp.dot(lcat_ref[layer], tmp_ref[...],
                                        preferred_element_type=jnp.float32)
        # bias-add + LeakyReLU in f32 (v5e's VPU has no bf16)
        h = jnp.where(acc >= 0.0, acc, slope * acc)
    # AdaptiveAvgPool2d(1) + both Linear heads:
    # pool over rows FIRST (tiny (8,BH)@(BH,128) dot), then one tiny head dot.
    pooled = jnp.dot(sel_ref[...], h, preferred_element_type=jnp.float32)   # (8, LMAX)
    out_ref[0] = (jnp.dot(pooled, hw_ref[...], preferred_element_type=jnp.float32)
                  + hb_ref[...])                                            # (8, LMAX)


def fused_forward(x_packed, packed, slope):
    num_chunks, BH, LMAX = x_packed.shape
    kernel = functools.partial(
        _fused_forward_kernel,
        num_layers=packed["num_layers"], hmax=packed["hmax"], lmax=LMAX,
        chunk=packed["chunk"], slope=slope)
    out = pl.pallas_call(
        kernel,
        out_shape=jax.ShapeDtypeStruct((num_chunks, 8, LMAX), jnp.float32),
        grid=(num_chunks,),
        in_specs=[
            pl.BlockSpec((1, BH, LMAX), lambda c: (c, 0, 0)),        # activations
            pl.BlockSpec(packed["rcat"].shape, lambda c: (0, 0, 0)),  # R (bf16)
            pl.BlockSpec(packed["lcat"].shape, lambda c: (0, 0, 0)),  # L (bf16)
            pl.BlockSpec(packed["bias"].shape, lambda c: (0, 0, 0)),  # bias (f32)
            pl.BlockSpec(packed["sel"].shape, lambda c: (0, 0)),      # pool selector
            pl.BlockSpec(packed["head_w"].shape, lambda c: (0, 0)),   # merged heads
            pl.BlockSpec(packed["head_b"].shape, lambda c: (0, 0)),
        ],
        out_specs=pl.BlockSpec((1, 8, LMAX), lambda c: (c, 0, 0)),
        scratch_shapes=[pltpu.VMEM((4 * BH, LMAX), jnp.bfloat16)],
        compiler_params=pltpu.CompilerParams(
            dimension_semantics=("parallel",),        # chunks -> both TCs on v7x
            vmem_limit_bytes=32 * 1024 * 1024,
        ),
    )(x_packed, packed["rcat"], packed["lcat"], packed["bias"],
      packed["sel"], packed["head_w"], packed["head_b"])
    return out                                         # (num_chunks, 8, LMAX)


# ----------------------------------------------------------------------------
# One-time weight packing (host side, at init)
# ----------------------------------------------------------------------------
def _pack_weights(ups, downs, w_src, b_src, w_cls, b_cls, H0, W0, chunk):
    """Build the concatenated R / block-diag L / bias / pool / head matrices."""
    layers = []
    H, W = H0, W0
    for (w, b) in ups:                       # ConvTranspose2d: (Cin, Cout, 4, 4)
        w = np.asarray(w, np.float32)
        b = np.asarray(b, np.float32)
        Cin, Cout = w.shape[0], w.shape[1]
        layers.append(("up", w, b, H, W, Cin, 2 * H, 2 * W, Cout))
        H, W = 2 * H, 2 * W
    for (w, b) in downs:                     # Conv2d: (Cout, Cin, 4, 4)
        w = np.asarray(w, np.float32)
        b = np.asarray(b, np.float32)
        Cout, Cin = w.shape[0], w.shape[1]
        layers.append(("down", w, b, H, W, Cin, H // 2, W // 2, Cout))
        H, W = H // 2, W // 2
    H_last, W_last = H, W
    C_last = layers[-1][8]

    HMAX = max(max(l[3], l[6]) for l in layers)
    HMAX = ((HMAX + 7) // 8) * 8                            # sublane-aligned
    LMAX = max(max(l[4] * l[5], l[7] * l[8]) for l in layers)
    LMAX = ((LMAX + 127) // 128) * 128                      # lane-dense
    NL, K = len(layers), 4
    BH = chunk * HMAX                                       # sublane-stacked batch

    Rcat = np.zeros((NL, LMAX, K * LMAX), np.float32)
    Lcat = np.zeros((NL, BH, K * BH), np.float32)
    Bm = np.zeros((NL, BH, LMAX), np.float32)

    for li, (kind, w, b, Hin, Win, Cin, Hout, Wout, Cout) in enumerate(layers):
        L1 = np.zeros((K, HMAX, HMAX), np.float32)
        R1 = np.zeros((K, LMAX, LMAX), np.float32)
        for kh in range(K):
            if kind == "down":
                # Conv2d(k=4, s=2, p=1):  out(ho) uses input row 2*ho + kh - 1
                for ho in range(Hout):
                    hi = 2 * ho + kh - 1
                    if 0 <= hi < Hin:
                        L1[kh, ho, hi] = 1.0
                # R[wi*Cin+ci, wo*Cout+co] = W[co, ci, kh, wi - 2*wo + 1]
                for wo in range(Wout):
                    for kw in range(K):
                        wi = 2 * wo + kw - 1
                        if 0 <= wi < Win:
                            R1[kh, wi * Cin:(wi + 1) * Cin,
                               wo * Cout:(wo + 1) * Cout] = w[:, :, kh, kw].T
            else:
                # ConvTranspose2d(k=4, s=2, p=1): out(ho) uses kh = ho + 1 - 2*hi
                for ho in range(Hout):
                    num = ho + 1 - kh
                    if num % 2 == 0 and 0 <= num // 2 < Hin:
                        L1[kh, ho, num // 2] = 1.0
                # R[wi*Cin+ci, wo*Cout+co] = W[ci, co, kh, wo + 1 - 2*wi]
                for wo in range(Wout):
                    for wi in range(Win):
                        kw = wo + 1 - 2 * wi
                        if 0 <= kw < K:
                            R1[kh, wi * Cin:(wi + 1) * Cin,
                               wo * Cout:(wo + 1) * Cout] = w[:, :, kh, kw]
        # Concatenate the 4 taps: Rcat = [R_0|R_1|R_2|R_3];
        # Lcat tap-block t = kron(I_chunk, L_t) so batch elements never mix.
        for kh in range(K):
            Rcat[li, :, kh * LMAX:(kh + 1) * LMAX] = R1[kh]
            for e in range(chunk):
                Lcat[li, e * HMAX:(e + 1) * HMAX,
                     kh * BH + e * HMAX:kh * BH + (e + 1) * HMAX] = L1[kh]
        brow = np.tile(b, Wout)
        for e in range(chunk):
            Bm[li, e * HMAX:e * HMAX + Hout, :Wout * Cout] = brow[None, :]

    # Per-element row-pool selector (8-row sublane-padded) + merged Linear heads.
    Sel = np.zeros((8, BH), np.float32)
    for e in range(chunk):
        Sel[e, e * HMAX:e * HMAX + H_last] = 1.0
    w_src = np.asarray(w_src, np.float32)
    b_src = np.asarray(b_src, np.float32)
    w_cls = np.asarray(w_cls, np.float32)
    b_cls = np.asarray(b_cls, np.float32)
    Hw = np.zeros((LMAX, LMAX), np.float32)
    Hb = np.zeros((1, LMAX), np.float32)
    inv = 1.0 / float(H_last * W_last)                      # 1/(H*W) folded in
    for wpos in range(W_last):
        Hw[wpos * C_last:(wpos + 1) * C_last, 0] = w_src[0] * inv
        Hw[wpos * C_last:(wpos + 1) * C_last, 1] = w_cls[0] * inv
    Hb[0, 0] = b_src[0]
    Hb[0, 1] = b_cls[0]

    return dict(
        # bf16 for the MXU-dot operands (L entries are 0/1 -> exact in bf16);
        # bias / pool / head stay f32 (tiny, and the adds are done in f32).
        rcat=jnp.asarray(Rcat, jnp.bfloat16),
        lcat=jnp.asarray(Lcat, jnp.bfloat16),
        bias=jnp.asarray(Bm, jnp.float32),
        sel=jnp.asarray(Sel, jnp.float32),
        head_w=jnp.asarray(Hw, jnp.float32),
        head_b=jnp.asarray(Hb, jnp.float32),
        num_layers=NL, hmax=HMAX, lmax=LMAX, chunk=chunk,
    )


def _pack_input(x_nchw, num_chunks, chunk, hmax, lmax):
    """NCHW -> (num_chunks, chunk*HMAX, LMAX) lane-dense A[h, w*C + c] chunks."""
    N, C, H, W = x_nchw.shape
    x = jnp.transpose(x_nchw, (0, 2, 3, 1)).astype(jnp.float32)   # NHWC
    x = x.reshape(N, H, W * C)
    x = jnp.pad(x, ((0, num_chunks * chunk - N),
                    (0, hmax - H), (0, lmax - W * C)))
    return x.reshape(num_chunks, chunk * hmax, lmax)


def _pick_num_chunks(N):
    """2-wide parallel grid on v7x (2 TensorCores/chip); full batch fold elsewhere."""
    if N <= 1:
        return 1
    try:
        kind = jax.devices()[0].device_kind.lower()
    except Exception:
        kind = ""
    return 2 if ("v7" in kind or "7x" in kind) else 1


# ----------------------------------------------------------------------------
# FeatureDiscriminator (Pallas)
# ----------------------------------------------------------------------------
class FeatureDiscriminatorPallas:
    def __init__(self, inplanes, seg_nclasses=0, num_ups_feat=2, num_downs=4,
                 leaky_relu=0.01, batch_chunks=None, key=None):
        if key is None:
            key = jax.random.PRNGKey(0)
        self.leaky = leaky_relu
        self.seg_nclasses = seg_nclasses
        self.batch_chunks = batch_chunks
        keys = iter(jax.random.split(key, 2 * (num_ups_feat + num_downs + 2)))

        def init(shape, fan_in):
            return jax.random.normal(next(keys), shape, jnp.float32) / jnp.sqrt(float(fan_in))

        # upsampler: ConvTranspose2d(C, C//2, 4, 2, 1) [+ LeakyReLU], x num_ups_feat
        self.ups = []
        curr = inplanes
        for _ in range(num_ups_feat):
            w = init((curr, curr // 2, 4, 4), curr * 16)    # (Cin, Cout, kh, kw)
            b = init((curr // 2,), curr * 16)
            self.ups.append((w, b))
            curr //= 2

        # main: Conv2d(.., .., 4, 2, 1) [+ LeakyReLU], x num_downs, then avgpool
        self.downs = []
        in_c = curr + seg_nclasses
        out_c = curr * 2
        for _ in range(num_downs):
            w = init((out_c, in_c, 4, 4), in_c * 16)        # (Cout, Cin, kh, kw)
            b = init((out_c,), in_c * 16)
            self.downs.append((w, b))
            in_c = out_c
            out_c *= 2
        curr_dim = in_c

        # heads
        self.w_src = init((1, curr_dim), curr_dim)
        self.b_src = init((1,), curr_dim)
        self.w_cls = init((1, curr_dim), curr_dim)
        self.b_cls = init((1,), curr_dim)

        self._pack_cache = {}   # (H0, W0, chunk) -> packed kernel constants

    def _get_packed(self, H0, W0, chunk):
        key = (H0, W0, chunk)
        if key not in self._pack_cache:
            self._pack_cache[key] = _pack_weights(
                self.ups, self.downs, self.w_src, self.b_src,
                self.w_cls, self.b_cls, H0, W0, chunk)
        return self._pack_cache[key]

    def __call__(self, x_nchw, seg_nchw=None):
        if self.seg_nclasses > 0:
            # TODO(synk): fused seg-concat path (per-pixel channel interleave into
            # the lane-dense layout) not implemented; config under test uses 0.
            raise NotImplementedError("seg_nclasses > 0 not supported by fused kernel")
        N, C, H, W = x_nchw.shape
        num_chunks = self.batch_chunks if self.batch_chunks else _pick_num_chunks(N)
        num_chunks = max(1, min(int(num_chunks), N))
        chunk = -(-N // num_chunks)                          # ceil(N / num_chunks)
        packed = self._get_packed(H, W, chunk)
        xp = _pack_input(x_nchw, num_chunks, chunk, packed["hmax"], packed["lmax"])
        out = fused_forward(xp, packed, self.leaky)          # (num_chunks, 8, LMAX)
        out2 = out[:, :chunk, :].reshape(num_chunks * chunk, packed["lmax"])[:N, :2]
        return out2[:, :1], out2[:, 1:2]


# ----------------------------------------------------------------------------
# Pure-JAX (XLA, HIGHEST precision) reference for the correctness check
# ----------------------------------------------------------------------------
def reference_forward(model, x_nchw, seg_nchw=None):
    prec = lax.Precision.HIGHEST
    leaky = model.leaky
    x = x_nchw.astype(jnp.float32)
    for w, b in model.ups:
        wf = jnp.transpose(jnp.flip(w, axis=(2, 3)), (1, 0, 2, 3))   # (Cout, Cin, kh, kw)
        x = lax.conv_general_dilated(x, wf, window_strides=(1, 1),
                                     padding=((2, 2), (2, 2)),
                                     lhs_dilation=(2, 2),
                                     dimension_numbers=("NCHW", "OIHW", "NCHW"),
                                     precision=prec)
        x = x + b.reshape(1, -1, 1, 1)
        x = jnp.where(x >= 0, x, leaky * x)
    if model.seg_nclasses > 0 and seg_nchw is not None:
        x = jnp.concatenate([x, seg_nchw.astype(jnp.float32)], axis=1)
    for w, b in model.downs:
        x = lax.conv_general_dilated(x, w, window_strides=(2, 2),
                                     padding=((1, 1), (1, 1)),
                                     dimension_numbers=("NCHW", "OIHW", "NCHW"),
                                     precision=prec)
        x = x + b.reshape(1, -1, 1, 1)
        x = jnp.where(x >= 0, x, leaky * x)
    h = x.mean(axis=(2, 3))
    out_src = jnp.dot(h, model.w_src.T, precision=prec) + model.b_src
    out_cls = jnp.dot(h, model.w_cls.T, precision=prec) + model.b_cls
    return out_src, out_cls


if __name__ == "__main__":
    key = jax.random.PRNGKey(0)
    k_param, k_x = jax.random.split(key)

    inplanes = 16
    model = FeatureDiscriminatorPallas(inplanes, seg_nclasses=0, num_ups_feat=2,
                                       num_downs=4, leaky_relu=0.01, key=k_param)

    x = jax.random.normal(k_x, (2, inplanes, 8, 8), jnp.float32)   # NCHW like PyTorch

    out_src, out_cls = model(x)
    out_src = jax.block_until_ready(out_src)
    out_cls = jax.block_until_ready(out_cls)

    assert out_src.shape == (2, 1) and out_cls.shape == (2, 1)
    assert bool(jnp.all(jnp.isfinite(out_src))) and bool(jnp.all(jnp.isfinite(out_cls)))

    ref_src, ref_cls = reference_forward(model, x)
    # bf16 MXU operands with f32 accumulation vs the HIGHEST-precision f32 XLA
    # reference: measured/expected error is ~1e-3 on these output magnitudes,
    # comfortably inside the 1e-2 tolerance.
    assert bool(jnp.allclose(out_src, ref_src, rtol=1e-2, atol=1e-2)), (out_src, ref_src)
    assert bool(jnp.allclose(out_cls, ref_cls, rtol=1e-2, atol=1e-2)), (out_cls, ref_cls)

    print("KERNEL_OK")
</pallas_src>

<mosaic_0001>
module attributes {stable_mosaic.version = 11 : i64} {
  func.func @_fused_forward_kernel(%arg0: i32, %arg1: memref<1x64x128xf32, #tpu.memory_space<vmem>>, %arg2: memref<6x128x512xbf16, #tpu.memory_space<vmem>>, %arg3: memref<6x64x256xbf16, #tpu.memory_space<vmem>>, %arg4: memref<6x64x128xf32, #tpu.memory_space<vmem>>, %arg5: memref<8x64xf32, #tpu.memory_space<vmem>>, %arg6: memref<128x128xf32, #tpu.memory_space<vmem>>, %arg7: memref<1x128xf32, #tpu.memory_space<vmem>>, %arg8: memref<1x8x128xf32, #tpu.memory_space<vmem>>, %arg9: memref<256x128xbf16, #tpu.memory_space<vmem>>) attributes {dimension_semantics = [#tpu.dimension_semantics<parallel>], iteration_bounds = array<i64: 1>, scalar_prefetch = 0 : i64, scratch_operands = 1 : i64, tpu.core_type = #tpu.core_type<tc>, window_params = [{transform_indices = @transform_0, window_bounds = array<i64: 1, 64, 128>}, {pipeline_mode = #tpu.pipeline_mode<synchronous>, transform_indices = @transform_1, window_bounds = array<i64: 6, 128, 512>}, {pipeline_mode = #tpu.pipeline_mode<synchronous>, transform_indices = @transform_2, window_bounds = array<i64: 6, 64, 256>}, {pipeline_mode = #tpu.pipeline_mode<synchronous>, transform_indices = @transform_3, window_bounds = array<i64: 6, 64, 128>}, {pipeline_mode = #tpu.pipeline_mode<synchronous>, transform_indices = @transform_4, window_bounds = array<i64: 8, 64>}, {pipeline_mode = #tpu.pipeline_mode<synchronous>, transform_indices = @transform_5, window_bounds = array<i64: 128, 128>}, {pipeline_mode = #tpu.pipeline_mode<synchronous>, transform_indices = @transform_6, window_bounds = array<i64: 1, 128>}, {transform_indices = @transform_7, window_bounds = array<i64: 1, 8, 128>}]} {
    %c0 = arith.constant 0 : index
    %c0_0 = arith.constant 0 : index
    %c0_1 = arith.constant 0 : index
    %0 = vector.load %arg1[%c0, %c0_0, %c0_1] : memref<1x64x128xf32, #tpu.memory_space<vmem>>, vector<1x64x128xf32>
    %1 = vector.shape_cast %0 : vector<1x64x128xf32> to vector<64x128xf32>
    %2 = arith.truncf %1 : vector<64x128xf32> to vector<64x128xbf16>
    %c0_2 = arith.constant 0 : index
    %c0_3 = arith.constant 0 : index
    %c0_4 = arith.constant 0 : index
    %3 = vector.load %arg2[%c0_2, %c0_3, %c0_4] : memref<6x128x512xbf16, #tpu.memory_space<vmem>>, vector<1x128x512xbf16>
    %4 = vector.shape_cast %3 : vector<1x128x512xbf16> to vector<128x512xbf16>
    %cst = arith.constant dense<0.000000e+00> : vector<64x512xf32>
    %5 = tpu.matmul %2, %4, %cst {dimension_numbers = #tpu.dot_dimension_numbers<[1], [0], [0], [1], [0, 0, 1, 1], [], []>} : vector<64x128xbf16>, vector<128x512xbf16>, vector<64x512xf32> -> vector<64x512xf32>
    %6 = vector.extract_strided_slice %5 {offsets = [0, 0], sizes = [64, 128], strides = [1, 1]} : vector<64x512xf32> to vector<64x128xf32>
    %7 = arith.truncf %6 : vector<64x128xf32> to vector<64x128xbf16>
    %c0_5 = arith.constant 0 : index
    %c0_6 = arith.constant 0 : index
    %8 = vector.load %arg9[%c0_5, %c0_6] : memref<256x128xbf16, #tpu.memory_space<vmem>>, vector<64x128xbf16>
    tpu.vector_store %arg9[%c0_5, %c0_6], %7 {strides = array<i32>} : memref<256x128xbf16, #tpu.memory_space<vmem>>, vector<64x128xbf16>,
    %9 = vector.extract_strided_slice %5 {offsets = [0, 128], sizes = [64, 128], strides = [1, 1]} : vector<64x512xf32> to vector<64x128xf32>
    %10 = arith.truncf %9 : vector<64x128xf32> to vector<64x128xbf16>
    %c64 = arith.constant 64 : index
    %c0_7 = arith.constant 0 : index
    %11 = vector.load %arg9[%c64, %c0_7] : memref<256x128xbf16, #tpu.memory_space<vmem>>, vector<64x128xbf16>
    tpu.vector_store %arg9[%c64, %c0_7], %10 {strides = array<i32>} : memref<256x128xbf16, #tpu.memory_space<vmem>>, vector<64x128xbf16>,
    %12 = vector.extract_strided_slice %5 {offsets = [0, 256], sizes = [64, 128], strides = [1, 1]} : vector<64x512xf32> to vector<64x128xf32>
    %13 = arith.truncf %12 : vector<64x128xf32> to vector<64x128xbf16>
    %c128 = arith.constant 128 : index
    %c0_8 = arith.constant 0 : index
    %14 = vector.load %arg9[%c128, %c0_8] : memref<256x128xbf16, #tpu.memory_space<vmem>>, vector<64x128xbf16>
    tpu.vector_store %arg9[%c128, %c0_8], %13 {strides = array<i32>} : memref<256x128xbf16, #tpu.memory_space<vmem>>, vector<64x128xbf16>,
    %15 = vector.extract_strided_slice %5 {offsets = [0, 384], sizes = [64, 128], strides = [1, 1]} : vector<64x512xf32> to vector<64x128xf32>
    %16 = arith.truncf %15 : vector<64x128xf32> to vector<64x128xbf16>
    %c192 = arith.constant 192 : index
    %c0_9 = arith.constant 0 : index
    %17 = vector.load %arg9[%c192, %c0_9] : memref<256x128xbf16, #tpu.memory_space<vmem>>, vector<64x128xbf16>
    tpu.vector_store %arg9[%c192, %c0_9], %16 {strides = array<i32>} : memref<256x128xbf16, #tpu.memory_space<vmem>>, vector<64x128xbf16>,
    %c0_10 = arith.constant 0 : index
    %c0_11 = arith.constant 0 : index
    %c0_12 = arith.constant 0 : index
    %18 = vector.load %arg4[%c0_10, %c0_11, %c0_12] : memref<6x64x128xf32, #tpu.memory_space<vmem>>, vector<1x64x128xf32>
    %19 = vector.shape_cast %18 : vector<1x64x128xf32> to vector<64x128xf32>
    %c0_13 = arith.constant 0 : index
    %c0_14 = arith.constant 0 : index
    %c0_15 = arith.constant 0 : index
    %20 = vector.load %arg3[%c0_13, %c0_14, %c0_15] : memref<6x64x256xbf16, #tpu.memory_space<vmem>>, vector<1x64x256xbf16>
    %21 = vector.shape_cast %20 : vector<1x64x256xbf16> to vector<64x256xbf16>
    %c0_16 = arith.constant 0 : index
    %c0_17 = arith.constant 0 : index
    %22 = vector.load %arg9[%c0_16, %c0_17] : memref<256x128xbf16, #tpu.memory_space<vmem>>, vector<256x128xbf16>
    %cst_18 = arith.constant dense<0.000000e+00> : vector<64x128xf32>
    %23 = tpu.matmul %21, %22, %cst_18 {dimension_numbers = #tpu.dot_dimension_numbers<[1], [0], [0], [1], [0, 0, 1, 1], [], []>} : vector<64x256xbf16>, vector<256x128xbf16>, vector<64x128xf32> -> vector<64x128xf32>
    %24 = arith.addf %19, %23 : vector<64x128xf32>
    %cst_19 = arith.constant 0.000000e+00 : f32
    %25 = vector.broadcast %cst_19 : f32 to vector<64x128xf32>
    %26 = arith.cmpf oge, %24, %25 : vector<64x128xf32>
    %cst_20 = arith.constant 0.00999999977 : f32
    %27 = vector.broadcast %cst_20 : f32 to vector<64x128xf32>
    %28 = arith.mulf %27, %24 : vector<64x128xf32>
    %29 = arith.select %26, %24, %28 : vector<64x128xi1>, vector<64x128xf32>
    %30 = arith.truncf %29 : vector<64x128xf32> to vector<64x128xbf16>
    %c1 = arith.constant 1 : index
    %c0_21 = arith.constant 0 : index
    %c0_22 = arith.constant 0 : index
    %31 = vector.load %arg2[%c1, %c0_21, %c0_22] : memref<6x128x512xbf16, #tpu.memory_space<vmem>>, vector<1x128x512xbf16>
    %32 = vector.shape_cast %31 : vector<1x128x512xbf16> to vector<128x512xbf16>
    %cst_23 = arith.constant dense<0.000000e+00> : vector<64x512xf32>
    %33 = tpu.matmul %30, %32, %cst_23 {dimension_numbers = #tpu.dot_dimension_numbers<[1], [0], [0], [1], [0, 0, 1, 1], [], []>} : vector<64x128xbf16>, vector<128x512xbf16>, vector<64x512xf32> -> vector<64x512xf32>
    %34 = vector.extract_strided_slice %33 {offsets = [0, 0], sizes = [64, 128], strides = [1, 1]} : vector<64x512xf32> to vector<64x128xf32>
    %35 = arith.truncf %34 : vector<64x128xf32> to vector<64x128xbf16>
    %c0_24 = arith.constant 0 : index
    %c0_25 = arith.constant 0 : index
    %36 = vector.load %arg9[%c0_24, %c0_25] : memref<256x128xbf16, #tpu.memory_space<vmem>>, vector<64x128xbf16>
    tpu.vector_store %arg9[%c0_24, %c0_25], %35 {strides = array<i32>} : memref<256x128xbf16, #tpu.memory_space<vmem>>, vector<64x128xbf16>,
    %37 = vector.extract_strided_slice %33 {offsets = [0, 128], sizes = [64, 128], strides = [1, 1]} : vector<64x512xf32> to vector<64x128xf32>
    %38 = arith.truncf %37 : vector<64x128xf32> to vector<64x128xbf16>
    %c64_26 = arith.constant 64 : index
    %c0_27 = arith.constant 0 : index
    %39 = vector.load %arg9[%c64_26, %c0_27] : memref<256x128xbf16, #tpu.memory_space<vmem>>, vector<64x128xbf16>
    tpu.vector_store %arg9[%c64_26, %c0_27], %38 {strides = array<i32>} : memref<256x128xbf16, #tpu.memory_space<vmem>>, vector<64x128xbf16>,
    %40 = vector.extract_strided_slice %33 {offsets = [0, 256], sizes = [64, 128], strides = [1, 1]} : vector<64x512xf32> to vector<64x128xf32>
    %41 = arith.truncf %40 : vector<64x128xf32> to vector<64x128xbf16>
    %c128_28 = arith.constant 128 : index
    %c0_29 = arith.constant 0 : index
    %42 = vector.load %arg9[%c128_28, %c0_29] : memref<256x128xbf16, #tpu.memory_space<vmem>>, vector<64x128xbf16>
    tpu.vector_store %arg9[%c128_28, %c0_29], %41 {strides = array<i32>} : memref<256x128xbf16, #tpu.memory_space<vmem>>, vector<64x128xbf16>,
    %43 = vector.extract_strided_slice %33 {offsets = [0, 384], sizes = [64, 128], strides = [1, 1]} : vector<64x512xf32> to vector<64x128xf32>
    %44 = arith.truncf %43 : vector<64x128xf32> to vector<64x128xbf16>
    %c192_30 = arith.constant 192 : index
    %c0_31 = arith.constant 0 : index
    %45 = vector.load %arg9[%c192_30, %c0_31] : memref<256x128xbf16, #tpu.memory_space<vmem>>, vector<64x128xbf16>
    tpu.vector_store %arg9[%c192_30, %c0_31], %44 {strides = array<i32>} : memref<256x128xbf16, #tpu.memory_space<vmem>>, vector<64x128xbf16>,
    %c1_32 = arith.constant 1 : index
    %c0_33 = arith.constant 0 : index
    %c0_34 = arith.constant 0 : index
    %46 = vector.load %arg4[%c1_32, %c0_33, %c0_34] : memref<6x64x128xf32, #tpu.memory_space<vmem>>, vector<1x64x128xf32>
    %47 = vector.shape_cast %46 : vector<1x64x128xf32> to vector<64x128xf32>
    %c1_35 = arith.constant 1 : index
    %c0_36 = arith.constant 0 : index
    %c0_37 = arith.constant 0 : index
    %48 = vector.load %arg3[%c1_35, %c0_36, %c0_37] : memref<6x64x256xbf16, #tpu.memory_space<vmem>>, vector<1x64x256xbf16>
    %49 = vector.shape_cast %48 : vector<1x64x256xbf16> to vector<64x256xbf16>
    %c0_38 = arith.constant 0 : index
    %c0_39 = arith.constant 0 : index
    %50 = vector.load %arg9[%c0_38, %c0_39] : memref<256x128xbf16, #tpu.memory_space<vmem>>, vector<256x128xbf16>
    %cst_40 = arith.constant dense<0.000000e+00> : vector<64x128xf32>
    %51 = tpu.matmul %49, %50, %cst_40 {dimension_numbers = #tpu.dot_dimension_numbers<[1], [0], [0], [1], [0, 0, 1, 1], [], []>} : vector<64x256xbf16>, vector<256x128xbf16>, vector<64x128xf32> -> vector<64x128xf32>
    %52 = arith.addf %47, %51 : vector<64x128xf32>
    %cst_41 = arith.constant 0.000000e+00 : f32
    %53 = vector.broadcast %cst_41 : f32 to vector<64x128xf32>
    %54 = arith.cmpf oge, %52, %53 : vector<64x128xf32>
    %cst_42 = arith.constant 0.00999999977 : f32
    %55 = vector.broadcast %cst_42 : f32 to vector<64x128xf32>
    %56 = arith.mulf %55, %52 : vector<64x128xf32>
    %57 = arith.select %54, %52, %56 : vector<64x128xi1>, vector<64x128xf32>
    %58 = arith.truncf %57 : vector<64x128xf32> to vector<64x128xbf16>
    %c2 = arith.constant 2 : index
    %c0_43 = arith.constant 0 : index
    %c0_44 = arith.constant 0 : index
    %59 = vector.load %arg2[%c2, %c0_43, %c0_44] : memref<6x128x512xbf16, #tpu.memory_space<vmem>>, vector<1x128x512xbf16>
    %60 = vector.shape_cast %59 : vector<1x128x512xbf16> to vector<128x512xbf16>
    %cst_45 = arith.constant dense<0.000000e+00> : vector<64x512xf32>
    %61 = tpu.matmul %58, %60, %cst_45 {dimension_numbers = #tpu.dot_dimension_numbers<[1], [0], [0], [1], [0, 0, 1, 1], [], []>} : vector<64x128xbf16>, vector<128x512xbf16>, vector<64x512xf32> -> vector<64x512xf32>
    %62 = vector.extract_strided_slice %61 {offsets = [0, 0], sizes = [64, 128], strides = [1, 1]} : vector<64x512xf32> to vector<64x128xf32>
    %63 = arith.truncf %62 : vector<64x128xf32> to vector<64x128xbf16>
    %c0_46 = arith.constant 0 : index
    %c0_47 = arith.constant 0 : index
    %64 = vector.load %arg9[%c0_46, %c0_47] : memref<256x128xbf16, #tpu.memory_space<vmem>>, vector<64x128xbf16>
    tpu.vector_store %arg9[%c0_46, %c0_47], %63 {strides = array<i32>} : memref<256x128xbf16, #tpu.memory_space<vmem>>, vector<64x128xbf16>,
    %65 = vector.extract_strided_slice %61 {offsets = [0, 128], sizes = [64, 128], strides = [1, 1]} : vector<64x512xf32> to vector<64x128xf32>
    %66 = arith.truncf %65 : vector<64x128xf32> to vector<64x128xbf16>
    %c64_48 = arith.constant 64 : index
    %c0_49 = arith.constant 0 : index
    %67 = vector.load %arg9[%c64_48, %c0_49] : memref<256x128xbf16, #tpu.memory_space<vmem>>, vector<64x128xbf16>
    tpu.vector_store %arg9[%c64_48, %c0_49], %66 {strides = array<i32>} : memref<256x128xbf16, #tpu.memory_space<vmem>>, vector<64x128xbf16>,
    %68 = vector.extract_strided_slice %61 {offsets = [0, 256], sizes = [64, 128], strides = [1, 1]} : vector<64x512xf32> to vector<64x128xf32>
    %69 = arith.truncf %68 : vector<64x128xf32> to vector<64x128xbf16>
    %c128_50 = arith.constant 128 : index
    %c0_51 = arith.constant 0 : index
    %70 = vector.load %arg9[%c128_50, %c0_51] : memref<256x128xbf16, #tpu.memory_space<vmem>>, vector<64x128xbf16>
    tpu.vector_store %arg9[%c128_50, %c0_51], %69 {strides = array<i32>} : memref<256x128xbf16, #tpu.memory_space<vmem>>, vector<64x128xbf16>,
    %71 = vector.extract_strided_slice %61 {offsets = [0, 384], sizes = [64, 128], strides = [1, 1]} : vector<64x512xf32> to vector<64x128xf32>
    %72 = arith.truncf %71 : vector<64x128xf32> to vector<64x128xbf16>
    %c192_52 = arith.constant 192 : index
    %c0_53 = arith.constant 0 : index
    %73 = vector.load %arg9[%c192_52, %c0_53] : memref<256x128xbf16, #tpu.memory_space<vmem>>, vector<64x128xbf16>
    tpu.vector_store %arg9[%c192_52, %c0_53], %72 {strides = array<i32>} : memref<256x128xbf16, #tpu.memory_space<vmem>>, vector<64x128xbf16>,
    %c2_54 = arith.constant 2 : index
    %c0_55 = arith.constant 0 : index
    %c0_56 = arith.constant 0 : index
    %74 = vector.load %arg4[%c2_54, %c0_55, %c0_56] : memref<6x64x128xf32, #tpu.memory_space<vmem>>, vector<1x64x128xf32>
    %75 = vector.shape_cast %74 : vector<1x64x128xf32> to vector<64x128xf32>
    %c2_57 = arith.constant 2 : index
    %c0_58 = arith.constant 0 : index
    %c0_59 = arith.constant 0 : index
    %76 = vector.load %arg3[%c2_57, %c0_58, %c0_59] : memref<6x64x256xbf16, #tpu.memory_space<vmem>>, vector<1x64x256xbf16>
    %77 = vector.shape_cast %76 : vector<1x64x256xbf16> to vector<64x256xbf16>
    %c0_60 = arith.constant 0 : index
    %c0_61 = arith.constant 0 : index
    %78 = vector.load %arg9[%c0_60, %c0_61] : memref<256x128xbf16, #tpu.memory_space<vmem>>, vector<256x128xbf16>
    %cst_62 = arith.constant dense<0.000000e+00> : vector<64x128xf32>
    %79 = tpu.matmul %77, %78, %cst_62 {dimension_numbers = #tpu.dot_dimension_numbers<[1], [0], [0], [1], [0, 0, 1, 1], [], []>} : vector<64x256xbf16>, vector<256x128xbf16>, vector<64x128xf32> -> vector<64x128xf32>
    %80 = arith.addf %75, %79 : vector<64x128xf32>
    %cst_63 = arith.constant 0.000000e+00 : f32
    %81 = vector.broadcast %cst_63 : f32 to vector<64x128xf32>
    %82 = arith.cmpf oge, %80, %81 : vector<64x128xf32>
    %cst_64 = arith.constant 0.00999999977 : f32
    %83 = vector.broadcast %cst_64 : f32 to vector<64x128xf32>
    %84 = arith.mulf %83, %80 : vector<64x128xf32>
    %85 = arith.select %82, %80, %84 : vector<64x128xi1>, vector<64x128xf32>
    %86 = arith.truncf %85 : vector<64x128xf32> to vector<64x128xbf16>
    %c3 = arith.constant 3 : index
    %c0_65 = arith.constant 0 : index
    %c0_66 = arith.constant 0 : index
    %87 = vector.load %arg2[%c3, %c0_65, %c0_66] : memref<6x128x512xbf16, #tpu.memory_space<vmem>>, vector<1x128x512xbf16>
    %88 = vector.shape_cast %87 : vector<1x128x512xbf16> to vector<128x512xbf16>
    %cst_67 = arith.constant dense<0.000000e+00> : vector<64x512xf32>
    %89 = tpu.matmul %86, %88, %cst_67 {dimension_numbers = #tpu.dot_dimension_numbers<[1], [0], [0], [1], [0, 0, 1, 1], [], []>} : vector<64x128xbf16>, vector<128x512xbf16>, vector<64x512xf32> -> vector<64x512xf32>
    %90 = vector.extract_strided_slice %89 {offsets = [0, 0], sizes = [64, 128], strides = [1, 1]} : vector<64x512xf32> to vector<64x128xf32>
    %91 = arith.truncf %90 : vector<64x128xf32> to vector<64x128xbf16>
    %c0_68 = arith.constant 0 : index
    %c0_69 = arith.constant 0 : index
    %92 = vector.load %arg9[%c0_68, %c0_69] : memref<256x128xbf16, #tpu.memory_space<vmem>>, vector<64x128xbf16>
    tpu.vector_store %arg9[%c0_68, %c0_69], %91 {strides = array<i32>} : memref<256x128xbf16, #tpu.memory_space<vmem>>, vector<64x128xbf16>,
    %93 = vector.extract_strided_slice %89 {offsets = [0, 128], sizes = [64, 128], strides = [1, 1]} : vector<64x512xf32> to vector<64x128xf32>
    %94 = arith.truncf %93 : vector<64x128xf32> to vector<64x128xbf16>
    %c64_70 = arith.constant 64 : index
    %c0_71 = arith.constant 0 : index
    %95 = vector.load %arg9[%c64_70, %c0_71] : memref<256x128xbf16, #tpu.memory_space<vmem>>, vector<64x128xbf16>
    tpu.vector_store %arg9[%c64_70, %c0_71], %94 {strides = array<i32>} : memref<256x128xbf16, #tpu.memory_space<vmem>>, vector<64x128xbf16>,
    %96 = vector.extract_strided_slice %89 {offsets = [0, 256], sizes = [64, 128], strides = [1, 1]} : vector<64x512xf32> to vector<64x128xf32>
    %97 = arith.truncf %96 : vector<64x128xf32> to vector<64x128xbf16>
    %c128_72 = arith.constant 128 : index
    %c0_73 = arith.constant 0 : index
    %98 = vector.load %arg9[%c128_72, %c0_73] : memref<256x128xbf16, #tpu.memory_space<vmem>>, vector<64x128xbf16>
    tpu.vector_store %arg9[%c128_72, %c0_73], %97 {strides = array<i32>} : memref<256x128xbf16, #tpu.memory_space<vmem>>, vector<64x128xbf16>,
    %99 = vector.extract_strided_slice %89 {offsets = [0, 384], sizes = [64, 128], strides = [1, 1]} : vector<64x512xf32> to vector<64x128xf32>
    %100 = arith.truncf %99 : vector<64x128xf32> to vector<64x128xbf16>
    %c192_74 = arith.constant 192 : index
    %c0_75 = arith.constant 0 : index
    %101 = vector.load %arg9[%c192_74, %c0_75] : memref<256x128xbf16, #tpu.memory_space<vmem>>, vector<64x128xbf16>
    tpu.vector_store %arg9[%c192_74, %c0_75], %100 {strides = array<i32>} : memref<256x128xbf16, #tpu.memory_space<vmem>>, vector<64x128xbf16>,
    %c3_76 = arith.constant 3 : index
    %c0_77 = arith.constant 0 : index
    %c0_78 = arith.constant 0 : index
    %102 = vector.load %arg4[%c3_76, %c0_77, %c0_78] : memref<6x64x128xf32, #tpu.memory_space<vmem>>, vector<1x64x128xf32>
    %103 = vector.shape_cast %102 : vector<1x64x128xf32> to vector<64x128xf32>
    %c3_79 = arith.constant 3 : index
    %c0_80 = arith.constant 0 : index
    %c0_81 = arith.constant 0 : index
    %104 = vector.load %arg3[%c3_79, %c0_80, %c0_81] : memref<6x64x256xbf16, #tpu.memory_space<vmem>>, vector<1x64x256xbf16>
    %105 = vector.shape_cast %104 : vector<1x64x256xbf16> to vector<64x256xbf16>
    %c0_82 = arith.constant 0 : index
    %c0_83 = arith.constant 0 : index
    %106 = vector.load %arg9[%c0_82, %c0_83] : memref<256x128xbf16, #tpu.memory_space<vmem>>, vector<256x128xbf16>
    %cst_84 = arith.constant dense<0.000000e+00> : vector<64x128xf32>
    %107 = tpu.matmul %105, %106, %cst_84 {dimension_numbers = #tpu.dot_dimension_numbers<[1], [0], [0], [1], [0, 0, 1, 1], [], []>} : vector<64x256xbf16>, vector<256x128xbf16>, vector<64x128xf32> -> vector<64x128xf32>
    %108 = arith.addf %103, %107 : vector<64x128xf32>
    %cst_85 = arith.constant 0.000000e+00 : f32
    %109 = vector.broadcast %cst_85 : f32 to vector<64x128xf32>
    %110 = arith.cmpf oge, %108, %109 : vector<64x128xf32>
    %cst_86 = arith.constant 0.00999999977 : f32
    %111 = vector.broadcast %cst_86 : f32 to vector<64x128xf32>
    %112 = arith.mulf %111, %108 : vector<64x128xf32>
    %113 = arith.select %110, %108, %112 : vector<64x128xi1>, vector<64x128xf32>
    %114 = arith.truncf %113 : vector<64x128xf32> to vector<64x128xbf16>
    %c4 = arith.constant 4 : index
    %c0_87 = arith.constant 0 : index
    %c0_88 = arith.constant 0 : index
    %115 = vector.load %arg2[%c4, %c0_87, %c0_88] : memref<6x128x512xbf16, #tpu.memory_space<vmem>>, vector<1x128x512xbf16>
    %116 = vector.shape_cast %115 : vector<1x128x512xbf16> to vector<128x512xbf16>
    %cst_89 = arith.constant dense<0.000000e+00> : vector<64x512xf32>
    %117 = tpu.matmul %114, %116, %cst_89 {dimension_numbers = #tpu.dot_dimension_numbers<[1], [0], [0], [1], [0, 0, 1, 1], [], []>} : vector<64x128xbf16>, vector<128x512xbf16>, vector<64x512xf32> -> vector<64x512xf32>
    %118 = vector.extract_strided_slice %117 {offsets = [0, 0], sizes = [64, 128], strides = [1, 1]} : vector<64x512xf32> to vector<64x128xf32>
    %119 = arith.truncf %118 : vector<64x128xf32> to vector<64x128xbf16>
    %c0_90 = arith.constant 0 : index
    %c0_91 = arith.constant 0 : index
    %120 = vector.load %arg9[%c0_90, %c0_91] : memref<256x128xbf16, #tpu.memory_space<vmem>>, vector<64x128xbf16>
    tpu.vector_store %arg9[%c0_90, %c0_91], %119 {strides = array<i32>} : memref<256x128xbf16, #tpu.memory_space<vmem>>, vector<64x128xbf16>,
    %121 = vector.extract_strided_slice %117 {offsets = [0, 128], sizes = [64, 128], strides = [1, 1]} : vector<64x512xf32> to vector<64x128xf32>
    %122 = arith.truncf %121 : vector<64x128xf32> to vector<64x128xbf16>
    %c64_92 = arith.constant 64 : index
    %c0_93 = arith.constant 0 : index
    %123 = vector.load %arg9[%c64_92, %c0_93] : memref<256x128xbf16, #tpu.memory_space<vmem>>, vector<64x128xbf16>
    tpu.vector_store %arg9[%c64_92, %c0_93], %122 {strides = array<i32>} : memref<256x128xbf16, #tpu.memory_space<vmem>>, vector<64x128xbf16>,
    %124 = vector.extract_strided_slice %117 {offsets = [0, 256], sizes = [64, 128], strides = [1, 1]} : vector<64x512xf32> to vector<64x128xf32>
    %125 = arith.truncf %124 : vector<64x128xf32> to vector<64x128xbf16>
    %c128_94 = arith.constant 128 : index
    %c0_95 = arith.constant 0 : index
    %126 = vector.load %arg9[%c128_94, %c0_95] : memref<256x128xbf16, #tpu.memory_space<vmem>>, vector<64x128xbf16>
    tpu.vector_store %arg9[%c128_94, %c0_95], %125 {strides = array<i32>} : memref<256x128xbf16, #tpu.memory_space<vmem>>, vector<64x128xbf16>,
    %127 = vector.extract_strided_slice %117 {offsets = [0, 384], sizes = [64, 128], strides = [1, 1]} : vector<64x512xf32> to vector<64x128xf32>
    %128 = arith.truncf %127 : vector<64x128xf32> to vector<64x128xbf16>
    %c192_96 = arith.constant 192 : index
    %c0_97 = arith.constant 0 : index
    %129 = vector.load %arg9[%c192_96, %c0_97] : memref<256x128xbf16, #tpu.memory_space<vmem>>, vector<64x128xbf16>
    tpu.vector_store %arg9[%c192_96, %c0_97], %128 {strides = array<i32>} : memref<256x128xbf16, #tpu.memory_space<vmem>>, vector<64x128xbf16>,
    %c4_98 = arith.constant 4 : index
    %c0_99 = arith.constant 0 : index
    %c0_100 = arith.constant 0 : index
    %130 = vector.load %arg4[%c4_98, %c0_99, %c0_100] : memref<6x64x128xf32, #tpu.memory_space<vmem>>, vector<1x64x128xf32>
    %131 = vector.shape_cast %130 : vector<1x64x128xf32> to vector<64x128xf32>
    %c4_101 = arith.constant 4 : index
    %c0_102 = arith.constant 0 : index
    %c0_103 = arith.constant 0 : index
    %132 = vector.load %arg3[%c4_101, %c0_102, %c0_103] : memref<6x64x256xbf16, #tpu.memory_space<vmem>>, vector<1x64x256xbf16>
    %133 = vector.shape_cast %132 : vector<1x64x256xbf16> to vector<64x256xbf16>
    %c0_104 = arith.constant 0 : index
    %c0_105 = arith.constant 0 : index
    %134 = vector.load %arg9[%c0_104, %c0_105] : memref<256x128xbf16, #tpu.memory_space<vmem>>, vector<256x128xbf16>
    %cst_106 = arith.constant dense<0.000000e+00> : vector<64x128xf32>
    %135 = tpu.matmul %133, %134, %cst_106 {dimension_numbers = #tpu.dot_dimension_numbers<[1], [0], [0], [1], [0, 0, 1, 1], [], []>} : vector<64x256xbf16>, vector<256x128xbf16>, vector<64x128xf32> -> vector<64x128xf32>
    %136 = arith.addf %131, %135 : vector<64x128xf32>
    %cst_107 = arith.constant 0.000000e+00 : f32
    %137 = vector.broadcast %cst_107 : f32 to vector<64x128xf32>
    %138 = arith.cmpf oge, %136, %137 : vector<64x128xf32>
    %cst_108 = arith.constant 0.00999999977 : f32
    %139 = vector.broadcast %cst_108 : f32 to vector<64x128xf32>
    %140 = arith.mulf %139, %136 : vector<64x128xf32>
    %141 = arith.select %138, %136, %140 : vector<64x128xi1>, vector<64x128xf32>
    %142 = arith.truncf %141 : vector<64x128xf32> to vector<64x128xbf16>
    %c5 = arith.constant 5 : index
    %c0_109 = arith.constant 0 : index
    %c0_110 = arith.constant 0 : index
    %143 = vector.load %arg2[%c5, %c0_109, %c0_110] : memref<6x128x512xbf16, #tpu.memory_space<vmem>>, vector<1x128x512xbf16>
    %144 = vector.shape_cast %143 : vector<1x128x512xbf16> to vector<128x512xbf16>
    %cst_111 = arith.constant dense<0.000000e+00> : vector<64x512xf32>
    %145 = tpu.matmul %142, %144, %cst_111 {dimension_numbers = #tpu.dot_dimension_numbers<[1], [0], [0], [1], [0, 0, 1, 1], [], []>} : vector<64x128xbf16>, vector<128x512xbf16>, vector<64x512xf32> -> vector<64x512xf32>
    %146 = vector.extract_strided_slice %145 {offsets = [0, 0], sizes = [64, 128], strides = [1, 1]} : vector<64x512xf32> to vector<64x128xf32>
    %147 = arith.truncf %146 : vector<64x128xf32> to vector<64x128xbf16>
    %c0_112 = arith.constant 0 : index
    %c0_113 = arith.constant 0 : index
    %148 = vector.load %arg9[%c0_112, %c0_113] : memref<256x128xbf16, #tpu.memory_space<vmem>>, vector<64x128xbf16>
    tpu.vector_store %arg9[%c0_112, %c0_113], %147 {strides = array<i32>} : memref<256x128xbf16, #tpu.memory_space<vmem>>, vector<64x128xbf16>,
    %149 = vector.extract_strided_slice %145 {offsets = [0, 128], sizes = [64, 128], strides = [1, 1]} : vector<64x512xf32> to vector<64x128xf32>
    %150 = arith.truncf %149 : vector<64x128xf32> to vector<64x128xbf16>
    %c64_114 = arith.constant 64 : index
    %c0_115 = arith.constant 0 : index
    %151 = vector.load %arg9[%c64_114, %c0_115] : memref<256x128xbf16, #tpu.memory_space<vmem>>, vector<64x128xbf16>
    tpu.vector_store %arg9[%c64_114, %c0_115], %150 {strides = array<i32>} : memref<256x128xbf16, #tpu.memory_space<vmem>>, vector<64x128xbf16>,
    %152 = vector.extract_strided_slice %145 {offsets = [0, 256], sizes = [64, 128], strides = [1, 1]} : vector<64x512xf32> to vector<64x128xf32>
    %153 = arith.truncf %152 : vector<64x128xf32> to vector<64x128xbf16>
    %c128_116 = arith.constant 128 : index
    %c0_117 = arith.constant 0 : index
    %154 = vector.load %arg9[%c128_116, %c0_117] : memref<256x128xbf16, #tpu.memory_space<vmem>>, vector<64x128xbf16>
    tpu.vector_store %arg9[%c128_116, %c0_117], %153 {strides = array<i32>} : memref<256x128xbf16, #tpu.memory_space<vmem>>, vector<64x128xbf16>,
    %155 = vector.extract_strided_slice %145 {offsets = [0, 384], sizes = [64, 128], strides = [1, 1]} : vector<64x512xf32> to vector<64x128xf32>
    %156 = arith.truncf %155 : vector<64x128xf32> to vector<64x128xbf16>
    %c192_118 = arith.constant 192 : index
    %c0_119 = arith.constant 0 : index
    %157 = vector.load %arg9[%c192_118, %c0_119] : memref<256x128xbf16, #tpu.memory_space<vmem>>, vector<64x128xbf16>
    tpu.vector_store %arg9[%c192_118, %c0_119], %156 {strides = array<i32>} : memref<256x128xbf16, #tpu.memory_space<vmem>>, vector<64x128xbf16>,
    %c5_120 = arith.constant 5 : index
    %c0_121 = arith.constant 0 : index
    %c0_122 = arith.constant 0 : index
    %158 = vector.load %arg4[%c5_120, %c0_121, %c0_122] : memref<6x64x128xf32, #tpu.memory_space<vmem>>, vector<1x64x128xf32>
    %159 = vector.shape_cast %158 : vector<1x64x128xf32> to vector<64x128xf32>
    %c5_123 = arith.constant 5 : index
    %c0_124 = arith.constant 0 : index
    %c0_125 = arith.constant 0 : index
    %160 = vector.load %arg3[%c5_123, %c0_124, %c0_125] : memref<6x64x256xbf16, #tpu.memory_space<vmem>>, vector<1x64x256xbf16>
    %161 = vector.shape_cast %160 : vector<1x64x256xbf16> to vector<64x256xbf16>
    %c0_126 = arith.constant 0 : index
    %c0_127 = arith.constant 0 : index
    %162 = vector.load %arg9[%c0_126, %c0_127] : memref<256x128xbf16, #tpu.memory_space<vmem>>, vector<256x128xbf16>
    %cst_128 = arith.constant dense<0.000000e+00> : vector<64x128xf32>
    %163 = tpu.matmul %161, %162, %cst_128 {dimension_numbers = #tpu.dot_dimension_numbers<[1], [0], [0], [1], [0, 0, 1, 1], [], []>} : vector<64x256xbf16>, vector<256x128xbf16>, vector<64x128xf32> -> vector<64x128xf32>
    %164 = arith.addf %159, %163 : vector<64x128xf32>
    %cst_129 = arith.constant 0.000000e+00 : f32
    %165 = vector.broadcast %cst_129 : f32 to vector<64x128xf32>
    %166 = arith.cmpf oge, %164, %165 : vector<64x128xf32>
    %cst_130 = arith.constant 0.00999999977 : f32
    %167 = vector.broadcast %cst_130 : f32 to vector<64x128xf32>
    %168 = arith.mulf %167, %164 : vector<64x128xf32>
    %169 = arith.select %166, %164, %168 : vector<64x128xi1>, vector<64x128xf32>
    %c0_131 = arith.constant 0 : index
    %c0_132 = arith.constant 0 : index
    %170 = vector.load %arg5[%c0_131, %c0_132] : memref<8x64xf32, #tpu.memory_space<vmem>>, vector<8x64xf32>
    %cst_133 = arith.constant dense<0.000000e+00> : vector<8x128xf32>
    %171 = tpu.matmul %170, %169, %cst_133 {dimension_numbers = #tpu.dot_dimension_numbers<[1], [0], [0], [1], [0, 0, 1, 1], [], []>} : vector<8x64xf32>, vector<64x128xf32>, vector<8x128xf32> -> vector<8x128xf32>
    %c0_134 = arith.constant 0 : index
    %c0_135 = arith.constant 0 : index
    %172 = vector.load %arg6[%c0_134, %c0_135] : memref<128x128xf32, #tpu.memory_space<vmem>>, vector<128x128xf32>
    %cst_136 = arith.constant dense<0.000000e+00> : vector<8x128xf32>
    %173 = tpu.matmul %171, %172, %cst_136 {dimension_numbers = #tpu.dot_dimension_numbers<[1], [0], [0], [1], [0, 0, 1, 1], [], []>} : vector<8x128xf32>, vector<128x128xf32>, vector<8x128xf32> -> vector<8x128xf32>
    %c0_137 = arith.constant 0 : index
    %c0_138 = arith.constant 0 : index
    %174 = vector.load %arg7[%c0_137, %c0_138] : memref<1x128xf32, #tpu.memory_space<vmem>>, vector<1x128xf32>
    %175 = vector.broadcast %174 : vector<1x128xf32> to vector<8x128xf32>
    %176 = arith.addf %173, %175 : vector<8x128xf32>
    %c0_139 = arith.constant 0 : index
    %c0_140 = arith.constant 0 : index
    %c0_141 = arith.constant 0 : index
    %177 = vector.load %arg8[%c0_139, %c0_140, %c0_141] : memref<1x8x128xf32, #tpu.memory_space<vmem>>, vector<1x8x128xf32>
    %178 = vector.shape_cast %177 : vector<1x8x128xf32> to vector<8x128xf32>
    %179 = vector.shape_cast %176 : vector<8x128xf32> to vector<1x8x128xf32>
    tpu.vector_store %arg8[%c0_139, %c0_140, %c0_141], %179 {strides = array<i32>} : memref<1x8x128xf32, #tpu.memory_space<vmem>>, vector<1x8x128xf32>,
    return
  }
  func.func @transform_0(%arg0: i32) -> (i32, i32, i32) {
    %c0_i32 = arith.constant 0 : i32
    %c0_i32_0 = arith.constant 0 : i32
    %c0_i32_1 = arith.constant 0 : i32
    return %arg0, %c0_i32, %c0_i32_0 : i32, i32, i32
  }
  func.func @transform_1(%arg0: i32) -> (i32, i32, i32) {
    %c0_i32 = arith.constant 0 : i32
    %c0_i32_0 = arith.constant 0 : i32
    %c0_i32_1 = arith.constant 0 : i32
    %c0_i32_2 = arith.constant 0 : i32
    return %c0_i32, %c0_i32_0, %c0_i32_1 : i32, i32, i32
  }
  func.func @transform_2(%arg0: i32) -> (i32, i32, i32) {
    %c0_i32 = arith.constant 0 : i32
    %c0_i32_0 = arith.constant 0 : i32
    %c0_i32_1 = arith.constant 0 : i32
    %c0_i32_2 = arith.constant 0 : i32
    return %c0_i32, %c0_i32_0, %c0_i32_1 : i32, i32, i32
  }
  func.func @transform_3(%arg0: i32) -> (i32, i32, i32) {
    %c0_i32 = arith.constant 0 : i32
    %c0_i32_0 = arith.constant 0 : i32
    %c0_i32_1 = arith.constant 0 : i32
    %c0_i32_2 = arith.constant 0 : i32
    return %c0_i32, %c0_i32_0, %c0_i32_1 : i32, i32, i32
  }
  func.func @transform_4(%arg0: i32) -> (i32, i32) {
    %c0_i32 = arith.constant 0 : i32
    %c0_i32_0 = arith.constant 0 : i32
    %c0_i32_1 = arith.constant 0 : i32
    return %c0_i32, %c0_i32_0 : i32, i32
  }
  func.func @transform_5(%arg0: i32) -> (i32, i32) {
    %c0_i32 = arith.constant 0 : i32
    %c0_i32_0 = arith.constant 0 : i32
    %c0_i32_1 = arith.constant 0 : i32
    return %c0_i32, %c0_i32_0 : i32, i32
  }
  func.func @transform_6(%arg0: i32) -> (i32, i32) {
    %c0_i32 = arith.constant 0 : i32
    %c0_i32_0 = arith.constant 0 : i32
    %c0_i32_1 = arith.constant 0 : i32
    return %c0_i32, %c0_i32_0 : i32, i32
  }
  func.func @transform_7(%arg0: i32) -> (i32, i32, i32) {
    %c0_i32 = arith.constant 0 : i32
    %c0_i32_0 = arith.constant 0 : i32
    %c0_i32_1 = arith.constant 0 : i32
    return %arg0, %c0_i32, %c0_i32_0 : i32, i32, i32
  }
}

</mosaic_0001>

<bundles_post_ra>
// kernel: tpu_custom_call.1
= control target key start
LH: loop header
LB: loop body
LE: loop exit
PB: predicated region body
PF: predicated region fallthrough
CT: control target
= control target key end

     0   :  { %12 = vsyncpa [#allocation4], 0  ;;  %s4879_s0 = inlined_call_operand.hbm [shape: f32[1,64,128], index: 0, kind: input, shape index: {}]   ;;  %s4880_s1 = inlined_call_operand.hbm [shape: bf16[6,128,512], index: 1, kind: input, shape index: {}]   ;;  %s4881_s2 = inlined_call_operand.hbm [shape: bf16[6,64,256], index: 2, kind: input, shape index: {}]   ;;  %s4882_s3 = inlined_call_operand.hbm [shape: f32[6,64,128], index: 3, kind: input, shape index: {}]   ;;  %s4883_s4 = inlined_call_operand.vmem [shape: f32[8,64], index: 4, kind: input, shape index: {}]   ;;  %s4884_s5 = inlined_call_operand.hbm [shape: f32[128,128], index: 5, kind: input, shape index: {}]   ;;  %s4885_s6 = inlined_call_operand.vmem [shape: f32[1,128], index: 6, kind: input, shape index: {}]   ;;  %s4886_s7 = inlined_call_operand.hbm [shape: f32[1,8,128], index: 7, kind: output, shape index: {}]  }
   0x1   :  { %13 = vsyncpa [#allocation7], 0 }
   0x2   :  { %14 = vsyncpa [#allocation10], 0 }
   0x3   :  { %15 = vsyncpa [#allocation5], 0  ;;  %s4675_s24 = smov [#allocation6]   ;;  %s4535_s28 = scalar_lea.hbm %s4880_s1, 24576 }
   0x4   :  { %s33_s25 = sshll.u32 %s4675_s24, 4  ;;  %p4536_p0 = scmp.ne.s32.totalorder %s4880_s1, %s4535_s28  ;;  %s34_s25 = int_to_ptr.vmem [resolvable:$true] %s33_s25 }
   0x5   :  { %p4539_p1 = scmp.lt.u32.totalorder %s4535_s28, %s4880_s1 }
   0x7   :  { %p4541_p2 = pnand %p4539_p1, %p4536_p0 }
   0x9   :  { %4544 = shalt.err (!%p4541_p2)
}
   0xa   :  { %s4545_s10 = scalar_lea.vmem %s34_s25, 24576  ;;  %p4550_p4 = scmp.lt.s32.totalorder %s34_s25, %s34_s25 }
   0xb   :  { %p4546_p3 = scmp.ne.s32.totalorder %s34_s25, %s4545_s10  ;;  %p4551_p5 = scmp.lt.s32.totalorder %s4545_s10, %s4545_s10 }
   0xd   :  { %p4552_p6 = por %p4551_p5, %p4550_p4 }
   0xf   :  { %p4553_p7 = pnand %p4552_p6, %p4546_p3 }
  0x11   :  { %4556 = shalt.err (!%p4553_p7)
}
  0x12   :  { %s4676_s11 = smov 256   ;;  %s4677_s12 = smov 16  }
  0x13   :  { %39 = dma.hbm_to_vmem [thread:$0]  %s4880_s1, 24576, %s34_s25, [#allocation7], %s4676_s11, %s4676_s11, %s4677_s12  }
  0x14   :  { %s4678_s15 = smov [#allocation9]   ;;  %s4679_s17 = smov [#allocation3]  }
  0x15   :  { %s57_s16 = sshll.u32 %s4678_s15, 4  ;;  %s21_s18 = sshll.u32 %s4679_s17, 4  ;;  %s58_s16 = int_to_ptr.vmem [resolvable:$true] %s57_s16  ;;  %s22_s18 = int_to_ptr.vmem [resolvable:$true] %s21_s18 }
  0x16   :  { %s4557_s21 = scalar_lea.hbm %s4882_s3, 6144 }
  0x17   :  { %p4558_p8 = scmp.ne.s32.totalorder %s4882_s3, %s4557_s21  ;;  %p4561_p9 = scmp.lt.u32.totalorder %s4557_s21, %s4882_s3 }
  0x19   :  { %p4563_p10 = pnand %p4561_p9, %p4558_p8 }
  0x1b   :  { %4566 = shalt.err (!%p4563_p10)
}
  0x1c   :  { %s4567_s1 = scalar_lea.vmem %s58_s16, 6144  ;;  %p4572_p12 = scmp.lt.s32.totalorder %s58_s16, %s58_s16 }
  0x1d   :  { %p4568_p11 = scmp.ne.s32.totalorder %s58_s16, %s4567_s1  ;;  %p4573_p13 = scmp.lt.s32.totalorder %s4567_s1, %s4567_s1 }
  0x1f   :  { %p4574_p0 = por %p4573_p13, %p4572_p12 }
  0x21   :  { %p4575_p1 = pnand %p4574_p0, %p4568_p11 }
  0x23   :  { %4578 = shalt.err (!%p4575_p1)
}
  0x24   :  { %s4680_s25 = smov 128   ;;  %s4681_s27 = smov 8  }
  0x25   :  { %63 = dma.hbm_to_vmem [thread:$0]  %s4882_s3, 6144, %s58_s16, [#allocation10], %s4680_s25, %s4680_s25, %s4681_s27  }
  0x26   :  { %s4579_s9 = scalar_lea.hbm %s4879_s0, 1024 }
  0x27   :  { %p4580_p2 = scmp.ne.s32.totalorder %s4879_s0, %s4579_s9  ;;  %p4583_p3 = scmp.lt.u32.totalorder %s4579_s9, %s4879_s0 }
  0x29   :  { %p4585_p4 = pnand %p4583_p3, %p4580_p2 }
  0x2b   :  { %4588 = shalt.err (!%p4585_p4)
}
  0x2c   :  { %s4589_s14 = scalar_lea.vmem %s22_s18, 1024  ;;  %p4594_p6 = scmp.lt.s32.totalorder %s22_s18, %s22_s18 }
  0x2d   :  { %p4590_p5 = scmp.ne.s32.totalorder %s22_s18, %s4589_s14  ;;  %p4595_p7 = scmp.lt.s32.totalorder %s4589_s14, %s4589_s14 }
  0x2f   :  { %p4596_p8 = por %p4595_p7, %p4594_p6 }
  0x31   :  { %p4597_p9 = pnand %p4596_p8, %p4590_p5 }
  0x33   :  { %4600 = shalt.err (!%p4597_p9)
}
  0x34   :  { %27 = dma.hbm_to_vmem [thread:$0]  %s4879_s0, 1024, %s22_s18, [#allocation4], %s4680_s25, %s4680_s25, %s4681_s27  }
  0x35   :  { %s4682_s16 = smov [#allocation8]   ;;  %s4683_s19 = smov [#allocation11]  }
  0x36   :  { %s45_s17 = sshll.u32 %s4682_s16, 4  ;;  %s71_s20 = sshll.u32 %s4683_s19, 4  ;;  %s46_s17 = int_to_ptr.vmem [resolvable:$true] %s45_s17  ;;  %s72_s20 = int_to_ptr.vmem [resolvable:$true] %s71_s20 }
  0x37   :  { %s4601_s23 = scalar_lea.hbm %s4881_s2, 6144 }
  0x38   :  { %p4602_p10 = scmp.ne.s32.totalorder %s4881_s2, %s4601_s23  ;;  %p4605_p11 = scmp.lt.u32.totalorder %s4601_s23, %s4881_s2 }
  0x3a   :  { %p4607_p12 = pnand %p4605_p11, %p4602_p10 }
  0x3c   :  { %4610 = shalt.err (!%p4607_p12)
}
  0x3d   :  { %s4611_s0 = scalar_lea.vmem %s46_s17, 6144  ;;  %p4616_p0 = scmp.lt.s32.totalorder %s46_s17, %s46_s17 }
  0x3e   :  { %p4612_p13 = scmp.ne.s32.totalorder %s46_s17, %s4611_s0  ;;  %p4617_p1 = scmp.lt.s32.totalorder %s4611_s0, %s4611_s0 }
  0x40   :  { %p4618_p2 = por %p4617_p1, %p4616_p0 }
  0x42   :  { %p4619_p3 = pnand %p4618_p2, %p4612_p13 }
  0x44   :  { %4622 = shalt.err (!%p4619_p3)
}
  0x45   :  { %51 = dma.hbm_to_vmem [thread:$0]  %s4881_s2, 6144, %s46_s17, [#allocation7], %s4680_s25, %s4680_s25, %s4681_s27  }
  0x46   :  { %s4623_s9 = scalar_lea.hbm %s4884_s5, 2048 }
  0x47   :  { %p4624_p4 = scmp.ne.s32.totalorder %s4884_s5, %s4623_s9  ;;  %p4627_p5 = scmp.lt.u32.totalorder %s4623_s9, %s4884_s5 }
  0x49   :  { %p4629_p6 = pnand %p4627_p5, %p4624_p4 }
  0x4b   :  { %4632 = shalt.err (!%p4629_p6)
}
  0x4c   :  { %s4633_s14 = scalar_lea.vmem %s72_s20, 2048  ;;  %p4638_p8 = scmp.lt.s32.totalorder %s72_s20, %s72_s20 }
  0x4d   :  { %p4634_p7 = scmp.ne.s32.totalorder %s72_s20, %s4633_s14  ;;  %p4639_p9 = scmp.lt.s32.totalorder %s4633_s14, %s4633_s14 }
  0x4f   :  { %p4640_p10 = por %p4639_p9, %p4638_p8 }
  0x51   :  { %p4641_p11 = pnand %p4640_p10, %p4634_p7 }
  0x53   :  { %4644 = shalt.err (!%p4641_p11)
}
  0x54   :  { %77 = dma.hbm_to_vmem [thread:$0]  %s4884_s5, 2048, %s72_s20, [#allocation10], %s4680_s25, %s4680_s25, %s4681_s27  }
  0x55   :  { %4667 = dma.done.wait [#allocation4], 1024  }
  0x56   :  { %4668 = vsyncadd [#allocation4], 4294966272 }
  0x57   :  { %4669 = dma.done.wait [#allocation7], 30720  }
  0x58   :  { %4670 = vsyncadd [#allocation7], 4294936576 }
  0x59   :  { %4671 = dma.done.wait [#allocation10], 8192  }
  0x5a   :  { %4672 = vsyncadd [#allocation10], 4294959104  ;;  %v4684_v0 = vmov 0   ;;  %v4175_v1 = vld [vmem:[#allocation6 + $0x4] ss:$16 sps:$4 sm:$0xff]   ;;  %v97_v34 = vld [vmem:[#allocation3 + $0x8] sm:$0xff] }
  0x5b   :  { %332 = vmatprep.mubr.bf16.mxu0 %v4684_v0  ;;  %405 = vmatprep.mubr.bf16.mxu1 %v4684_v0  ;;  %v4177_v2 = vld [vmem:[#allocation6 + $0xc] ss:$16 sps:$4 sm:$0xff]   ;;  %v4179_v3 = vld [vmem:[#allocation6] ss:$16 sps:$4 sm:$0xff]   ;;  %v4180_v4 = vld [vmem:[#allocation6 + $0x8] ss:$16 sps:$4 sm:$0xff]  }
  0x5c   :  { %300 = vmatprep.subr.bf16.mxu0 %v4175_v1  ;;  %373 = vmatprep.subr.bf16.mxu1 %v4177_v2  ;;  %v4181_v5 = vld [vmem:[#allocation6 + $0x24] ss:$16 sps:$4 sm:$0xff]   ;;  %v4183_v6 = vld [vmem:[#allocation6 + $0x2c] ss:$16 sps:$4 sm:$0xff]   ;;  %v4185_v7 = vld [vmem:[#allocation6 + $0x20] ss:$16 sps:$4 sm:$0xff]  }
  0x5d   :  { %301 = vmatpush1.bf16.msra.mxu0 %v4179_v3  ;;  %374 = vmatpush1.bf16.msra.mxu1 %v4180_v4  ;;  %v4186_v8 = vld [vmem:[#allocation6 + $0x28] ss:$16 sps:$4 sm:$0xff]   ;;  %v4187_v9 = vld [vmem:[#allocation6 + $0x44] ss:$16 sps:$4 sm:$0xff]   ;;  %v4189_v10 = vld [vmem:[#allocation6 + $0x4c] ss:$16 sps:$4 sm:$0xff]  }
  0x5e   :  { %302 = vmatprep.subr.bf16.mxu0 %v4181_v5  ;;  %375 = vmatprep.subr.bf16.mxu1 %v4183_v6  ;;  %v4191_v11 = vld [vmem:[#allocation6 + $0x40] ss:$16 sps:$4 sm:$0xff]   ;;  %v4192_v12 = vld [vmem:[#allocation6 + $0x48] ss:$16 sps:$4 sm:$0xff]   ;;  %v4193_v13 = vld [vmem:[#allocation6 + $0x64] ss:$16 sps:$4 sm:$0xff]  }
  0x5f   :  { %v4195_v14 = vld [vmem:[#allocation6 + $0x6c] ss:$16 sps:$4 sm:$0xff]   ;;  %v4197_v15 = vld [vmem:[#allocation6 + $0x60] ss:$16 sps:$4 sm:$0xff]   ;;  %v4198_v16 = vld [vmem:[#allocation6 + $0x68] ss:$16 sps:$4 sm:$0xff]  }
  0x60   :  { %v4199_v17 = vld [vmem:[#allocation6 + $0x84] ss:$16 sps:$4 sm:$0xff]   ;;  %v4201_v18 = vld [vmem:[#allocation6 + $0x8c] ss:$16 sps:$4 sm:$0xff]   ;;  %v4203_v19 = vld [vmem:[#allocation6 + $0x80] ss:$16 sps:$4 sm:$0xff]  }
  0x61   :  { %303 = vmatpush1.bf16.msra.mxu0 %v4185_v7  ;;  %376 = vmatpush1.bf16.msra.mxu1 %v4186_v8  ;;  %v4204_v20 = vld [vmem:[#allocation6 + $0x88] ss:$16 sps:$4 sm:$0xff]   ;;  %v4205_v21 = vld [vmem:[#allocation6 + $0xa4] ss:$16 sps:$4 sm:$0xff]   ;;  %v4207_v22 = vld [vmem:[#allocation6 + $0xac] ss:$16 sps:$4 sm:$0xff]  }
  0x62   :  { %304 = vmatprep.subr.bf16.mxu0 %v4187_v9  ;;  %377 = vmatprep.subr.bf16.mxu1 %v4189_v10  ;;  %v4209_v23 = vld [vmem:[#allocation6 + $0xa0] ss:$16 sps:$4 sm:$0xff]   ;;  %v4210_v24 = vld [vmem:[#allocation6 + $0xa8] ss:$16 sps:$4 sm:$0xff]   ;;  %v4211_v25 = vld [vmem:[#allocation6 + $0xc4] ss:$16 sps:$4 sm:$0xff]  }
  0x63   :  { %v4213_v26 = vld [vmem:[#allocation6 + $0xcc] ss:$16 sps:$4 sm:$0xff]   ;;  %v4215_v27 = vld [vmem:[#allocation6 + $0xc0] ss:$16 sps:$4 sm:$0xff]   ;;  %v4216_v28 = vld [vmem:[#allocation6 + $0xc8] ss:$16 sps:$4 sm:$0xff]  }
  0x64   :  { %v4217_v29 = vld [vmem:[#allocation6 + $0xe4] ss:$16 sps:$4 sm:$0xff]   ;;  %v4219_v30 = vld [vmem:[#allocation6 + $0xec] ss:$16 sps:$4 sm:$0xff]   ;;  %v4221_v31 = vld [vmem:[#allocation6 + $0xe0] ss:$16 sps:$4 sm:$0xff]  }
  0x65   :  { %305 = vmatpush1.bf16.msra.mxu0 %v4191_v11  ;;  %378 = vmatpush1.bf16.msra.mxu1 %v4192_v12  ;;  %v4222_v32 = vld [vmem:[#allocation6 + $0xe8] ss:$16 sps:$4 sm:$0xff]   ;;  %v96_v33 = vld [vmem:[#allocation3] sm:$0xff]  ;;  %v98_v36 = vld [vmem:[#allocation3 + $0x10] sm:$0xff]  ;;  %s4688_s16 = smov [#allocation12]  }
  0x66   :  { %306 = vmatprep.subr.bf16.mxu0 %v4193_v13  ;;  %379 = vmatprep.subr.bf16.mxu1 %v4195_v14  ;;  %v104_v35 = vpack.c.bf16 %v97_v34, %v96_v33  ;;  %v99_v37 = vld [vmem:[#allocation3 + $0x18] sm:$0xff]  ;;  %v100_v39 = vld [vmem:[#allocation3 + $0x20] sm:$0xff]  ;;  %v101_v40 = vld [vmem:[#allocation3 + $0x28] sm:$0xff]  ;;  %s3552_s17 = sshll.u32 %s4688_s16, 4  ;;  %s3553_s17 = int_to_ptr.vmem [resolvable:$true] %s3552_s17 }
  0x67   :  { %v105_v38 = vpack.c.bf16 %v99_v37, %v98_v36  ;;  %v106_v41 = vpack.c.bf16 %v101_v40, %v100_v39  ;;  %v102_v42 = vld [vmem:[#allocation3 + $0x30] sm:$0xff]  ;;  %v103_v43 = vld [vmem:[#allocation3 + $0x38] sm:$0xff]  ;;  %v4225_v45 = vld [vmem:[#allocation8 + $0x4] ss:$8 sps:$4 sm:$0xff]   ;;  %s4645_s19 = scalar_lea.vmem %s3553_s17, 128  ;;  %p4650_p13 = scmp.lt.s32.totalorder %s3553_s17, %s3553_s17 }
  0x68   :  { %v107_v44 = vpack.c.bf16 %v103_v43, %v102_v42  ;;  %v4235_v46 = vld [vmem:[#allocation6 + $0x100] ss:$16 sps:$4 sm:$0xff]   ;;  %v4237_v47 = vld [vmem:[#allocation6 + $0x104] ss:$16 sps:$4 sm:$0xff]   ;;  %p4646_p12 = scmp.ne.s32.totalorder %s3553_s17, %s4645_s19  ;;  %p4651_p0 = scmp.lt.s32.totalorder %s4645_s19, %s4645_s19 }
  0x69   :  { %307 = vmatpush1.bf16.msra.mxu0 %v4197_v15  ;;  %380 = vmatpush1.bf16.msra.mxu1 %v4198_v16  ;;  %v4243_v48 = vld [vmem:[#allocation6 + $0x124] ss:$16 sps:$4 sm:$0xff]   ;;  %v4241_v49 = vld [vmem:[#allocation6 + $0x120] ss:$16 sps:$4 sm:$0xff]  }
  0x6a   :  { %308 = vmatprep.subr.bf16.mxu0 %v4199_v17  ;;  %381 = vmatprep.subr.bf16.mxu1 %v4201_v18  ;;  %v4249_v50 = vld [vmem:[#allocation6 + $0x144] ss:$16 sps:$4 sm:$0xff]   ;;  %v4247_v51 = vld [vmem:[#allocation6 + $0x140] ss:$16 sps:$4 sm:$0xff]   ;;  %p4652_p1 = por %p4651_p0, %p4650_p13 }
  0x6b   :  { %v4255_v52 = vld [vmem:[#allocation6 + $0x164] ss:$16 sps:$4 sm:$0xff]   ;;  %v4253_v53 = vld [vmem:[#allocation6 + $0x160] ss:$16 sps:$4 sm:$0xff]  }
  0x6c   :  { %v4261_v54 = vld [vmem:[#allocation6 + $0x184] ss:$16 sps:$4 sm:$0xff]   ;;  %v4259_v55 = vld [vmem:[#allocation6 + $0x180] ss:$16 sps:$4 sm:$0xff]   ;;  %p4653_p2 = pnand %p4652_p1, %p4646_p12 }
  0x6d   :  { %309 = vmatpush1.bf16.msra.mxu0 %v4203_v19  ;;  %382 = vmatpush1.bf16.msra.mxu1 %v4204_v20  ;;  %v4223_v42 = vld [vmem:[#allocation8] ss:$8 sps:$4 sm:$0xff]   ;;  %v4226_v43 = vld [vmem:[#allocation8 + $0x14] ss:$8 sps:$4 sm:$0xff]  }
  0x6e   :  { %310 = vmatprep.subr.bf16.mxu0 %v4205_v21  ;;  %383 = vmatprep.subr.bf16.mxu1 %v4207_v22 }
  0x71   :  { %311 = vmatpush1.bf16.msra.mxu0 %v4209_v23  ;;  %384 = vmatpush1.bf16.msra.mxu1 %v4210_v24 }
  0x72   :  { %312 = vmatprep.subr.bf16.mxu0 %v4211_v25  ;;  %385 = vmatprep.subr.bf16.mxu1 %v4213_v26 }
  0x75   :  { %313 = vmatpush1.bf16.msra.mxu0 %v4215_v27  ;;  %386 = vmatpush1.bf16.msra.mxu1 %v4216_v28 }
  0x76   :  { %314 = vmatprep.subr.bf16.mxu0 %v4217_v29  ;;  %387 = vmatprep.subr.bf16.mxu1 %v4219_v30 }
  0x79   :  { %315 = vmatpush1.bf16.msra.mxu0 %v4221_v31  ;;  %388 = vmatpush1.bf16.msra.mxu1 %v4222_v32 }
  0x7a   :  { %844 = vmatprep.subr.bf16.mxu1 %v4237_v47  ;;  %v4252_v47 = vld [vmem:[#allocation6 + $0x14c] ss:$16 sps:$4 sm:$0xff]  }
  0x7c   :  { %333 = vmatmul.mubr.bf16.vlgmr.msra.gmra.mrb[0].mxu0 %v104_v35  ;;  %406 = vmatmul.mubr.bf16.vlgmr.msra.gmra.mrb[0].mxu1 %v104_v35 }
  0x7d   :  { %342 = vmatprep.mubr.bf16.mxu0 %v4684_v0  ;;  %415 = vmatprep.mubr.bf16.mxu1 %v4684_v0 }
  0x7e   :  { %845 = vmatpush1.bf16.msra.mxu1 %v4235_v46  ;;  %v4244_v46 = vld [vmem:[#allocation6 + $0x128] ss:$16 sps:$4 sm:$0xff]  }
  0x7f   :  { %846 = vmatprep.subr.bf16.mxu1 %v4243_v48  ;;  %v4228_v48 = vld [vmem:[#allocation8 + $0x10] ss:$8 sps:$4 sm:$0xff]  }
  0x82   :  { %847 = vmatpush1.bf16.msra.mxu1 %v4241_v49  ;;  %v4229_v49 = vld [vmem:[#allocation8 + $0x24] ss:$8 sps:$4 sm:$0xff]  }
  0x83   :  { %848 = vmatprep.subr.bf16.mxu1 %v4249_v50  ;;  %v4250_v50 = vld [vmem:[#allocation6 + $0x148] ss:$16 sps:$4 sm:$0xff]  }
  0x84   :  { %343 = vmatmul.mubr.bf16.gmra.mrb[4].mxu0 %v105_v38  ;;  %416 = vmatmul.mubr.bf16.gmra.mrb[4].mxu1 %v105_v38 }
  0x85   :  { %352 = vmatprep.mubr.bf16.mxu0 %v4684_v0  ;;  %425 = vmatprep.mubr.bf16.mxu1 %v4684_v0 }
  0x86   :  { %849 = vmatpush1.bf16.msra.mxu1 %v4247_v51  ;;  %v4258_v51 = vld [vmem:[#allocation6 + $0x16c] ss:$16 sps:$4 sm:$0xff]  }
  0x87   :  { %850 = vmatprep.subr.bf16.mxu1 %v4255_v52  ;;  %v4256_v52 = vld [vmem:[#allocation6 + $0x168] ss:$16 sps:$4 sm:$0xff]  }
  0x8a   :  { %851 = vmatpush1.bf16.msra.mxu1 %v4253_v53  ;;  %v4264_v53 = vld [vmem:[#allocation6 + $0x18c] ss:$16 sps:$4 sm:$0xff]  }
  0x8b   :  { %852 = vmatprep.subr.bf16.mxu1 %v4261_v54  ;;  %v4231_v54 = vld [vmem:[#allocation8 + $0x20] ss:$8 sps:$4 sm:$0xff]  }
  0x8c   :  { %353 = vmatmul.mubr.bf16.gmra.mrb[8].mxu0 %v106_v41  ;;  %426 = vmatmul.mubr.bf16.gmra.mrb[8].mxu1 %v106_v41  ;;  %v4240_v41 = vld [vmem:[#allocation6 + $0x10c] ss:$16 sps:$4 sm:$0xff]  }
  0x8d   :  { %362 = vmatprep.mubr.bf16.mxu0 %v4684_v0  ;;  %435 = vmatprep.mubr.bf16.mxu1 %v4684_v0 }
  0x8e   :  { %853 = vmatpush1.bf16.msra.mxu1 %v4259_v55  ;;  %v4232_v55 = vld [vmem:[#allocation8 + $0x34] ss:$8 sps:$4 sm:$0xff]  }
  0x94   :  { %363 = vmatmul.mubr.bf16.gmra.mrb[12].mxu0 %v107_v44  ;;  %436 = vmatmul.mubr.bf16.gmra.mrb[12].mxu1 %v107_v44  ;;  %v4238_v44 = vld [vmem:[#allocation6 + $0x108] ss:$16 sps:$4 sm:$0xff]  }
  0x95   :  { %876 = vmatprep.mubr.bf16.mxu1 %v4684_v0  ;;  %582 = vmatprep.mubr.bf16.mxu0 %v4225_v45  ;;  %v4246_v45 = vld [vmem:[#allocation6 + $0x12c] ss:$16 sps:$4 sm:$0xff]  }
 0x14f   :  { %v334_v56 = vpop.f32.mrb[0].mxu0  ;;  %v407_v57 = vpop.f32.mrb[0].mxu1 }
 0x150   :  { %v336_v58 = vpop.f32.mrb[1].mxu0  ;;  %v409_v59 = vpop.f32.mrb[1].mxu1 }
 0x151   :  { %v338_v60 = vpop.f32.mrb[2].mxu0  ;;  %v411_v61 = vpop.f32.mrb[2].mxu1 }
 0x152   :  { %v446_v62 = vpack.c.bf16 %v338_v60, %v334_v56  ;;  %v462_v63 = vpack.c.bf16 %v411_v61, %v407_v57  ;;  %v340_v1 = vpop.f32.mrb[3].mxu0  ;;  %v413_v2 = vpop.f32.mrb[3].mxu1  ;;  %v4262_v56 = vld [vmem:[#allocation6 + $0x188] ss:$16 sps:$4 sm:$0xff]   ;;  %v4265_v60 = vld [vmem:[#allocation6 + $0x1a0] ss:$16 sps:$4 sm:$0xff]  }
 0x153   :  { %v454_v3 = vpack.c.bf16 %v340_v1, %v336_v58  ;;  %v470_v4 = vpack.c.bf16 %v413_v2, %v409_v59  ;;  %v4234_v57 = vld [vmem:[#allocation8 + $0x30] ss:$8 sps:$4 sm:$0xff]   ;;  %v4267_v58 = vld [vmem:[#allocation6 + $0x1a4] ss:$16 sps:$4 sm:$0xff]   ;;  %v4270_v59 = vld [vmem:[#allocation6 + $0x1ac] ss:$16 sps:$4 sm:$0xff]  }
 0x154   :  { %3805 = vmatprep.subr.bf16.mxu0 %v462_v63  ;;  %v4268_v61 = vld [vmem:[#allocation6 + $0x1a8] ss:$16 sps:$4 sm:$0xff]   ;;  %854 = vmatprep.subr.bf16.mxu1 %v4267_v58  ;;  %v4276_v63 = vld [vmem:[#allocation6 + $0x1cc] ss:$16 sps:$4 sm:$0xff]   ;;  %v4271_v1 = vld [vmem:[#allocation6 + $0x1c0] ss:$16 sps:$4 sm:$0xff]  }
 0x155   :  { %3806 = vmatpush3.bf16.msra.mxu0 %v446_v62  ;;  %855 = vmatpush1.bf16.msra.mxu1 %v4265_v60  ;;  %v4273_v62 = vld [vmem:[#allocation6 + $0x1c4] ss:$16 sps:$4 sm:$0xff]   ;;  %v4274_v2 = vld [vmem:[#allocation6 + $0x1c8] ss:$16 sps:$4 sm:$0xff]  }
 0x156   :  { %856 = vmatprep.subr.bf16.mxu1 %v4273_v62 }
 0x157   :  { %v344_v5 = vpop.f32.mrb[4].mxu0  ;;  %v417_v6 = vpop.f32.mrb[4].mxu1 }
 0x158   :  { %v346_v7 = vpop.f32.mrb[5].mxu0  ;;  %v419_v8 = vpop.f32.mrb[5].mxu1 }
 0x159   :  { %v348_v9 = vpop.f32.mrb[6].mxu0  ;;  %v421_v10 = vpop.f32.mrb[6].mxu1  ;;  %857 = vmatpush1.bf16.msra.mxu1 %v4271_v1 }
 0x15a   :  { %v447_v11 = vpack.c.bf16 %v348_v9, %v344_v5  ;;  %v463_v12 = vpack.c.bf16 %v421_v10, %v417_v6  ;;  %v350_v13 = vpop.f32.mrb[7].mxu0  ;;  %v423_v14 = vpop.f32.mrb[7].mxu1  ;;  %v4277_v5 = vld [vmem:[#allocation6 + $0x1e0] ss:$16 sps:$4 sm:$0xff]   ;;  %v4280_v6 = vld [vmem:[#allocation6 + $0x1e8] ss:$16 sps:$4 sm:$0xff]  }
 0x15b   :  { %v455_v15 = vpack.c.bf16 %v350_v13, %v346_v7  ;;  %v471_v16 = vpack.c.bf16 %v423_v14, %v419_v8  ;;  %v478_v8 = vld [vmem:[#allocation9] sm:$0xff] }
 0x15c   :  { %3807 = vmatprep.subr.bf16.mxu0 %v463_v12  ;;  %v479_v12 = vld [vmem:[#allocation9 + $0x8] sm:$0xff] }
 0x15d   :  { %3808 = vmatpush3.bf16.msra.mxu0 %v447_v11 }
 0x15f   :  { %v354_v17 = vpop.f32.mrb[8].mxu0  ;;  %v427_v18 = vpop.f32.mrb[8].mxu1 }
 0x160   :  { %v356_v19 = vpop.f32.mrb[9].mxu0  ;;  %v429_v20 = vpop.f32.mrb[9].mxu1 }
 0x161   :  { %v358_v21 = vpop.f32.mrb[10].mxu0  ;;  %v431_v22 = vpop.f32.mrb[10].mxu1 }
 0x162   :  { %v448_v23 = vpack.c.bf16 %v358_v21, %v354_v17  ;;  %v464_v24 = vpack.c.bf16 %v431_v22, %v427_v18  ;;  %v360_v25 = vpop.f32.mrb[11].mxu0  ;;  %v433_v26 = vpop.f32.mrb[11].mxu1 }
 0x163   :  { %v456_v27 = vpack.c.bf16 %v360_v25, %v356_v19  ;;  %v472_v28 = vpack.c.bf16 %v433_v26, %v429_v20  ;;  %v480_v20 = vld [vmem:[#allocation9 + $0x10] sm:$0xff] }
 0x164   :  { %3809 = vmatprep.subr.bf16.mxu0 %v464_v24 }
 0x165   :  { %3810 = vmatpush3.bf16.msra.mxu0 %v448_v23 }
 0x167   :  { %v364_v29 = vpop.f32.mrb[12].mxu0  ;;  %v437_v30 = vpop.f32.mrb[12].mxu1 }
 0x168   :  { %v366_v31 = vpop.f32.mrb[13].mxu0  ;;  %v439_v32 = vpop.f32.mrb[13].mxu1 }
 0x169   :  { %v368_v33 = vpop.f32.mrb[14].mxu0  ;;  %v441_v34 = vpop.f32.mrb[14].mxu1 }
 0x16a   :  { %v449_v35 = vpack.c.bf16 %v368_v33, %v364_v29  ;;  %v465_v36 = vpack.c.bf16 %v441_v34, %v437_v30  ;;  %v370_v37 = vpop.f32.mrb[15].mxu0  ;;  %v443_v38 = vpop.f32.mrb[15].mxu1 }
 0x16b   :  { %v457_v39 = vpack.c.bf16 %v370_v37, %v366_v31  ;;  %v473_v40 = vpack.c.bf16 %v443_v38, %v439_v32 }
 0x16c   :  { %3811 = vmatprep.subr.bf16.mxu0 %v465_v36 }
 0x16d   :  { %3812 = vmatpush3.bf16.msra.mxu0 %v449_v35  ;;  %v482_v35 = vld [vmem:[#allocation9 + $0x20] sm:$0xff] }
 0x16e   :  { %3813 = vmatprep.subr.bf16.mxu0 %v470_v4  ;;  %v4282_v4 = vld [vmem:[#allocation6 + $0x1ec] ss:$16 sps:$4 sm:$0xff]  }
 0x171   :  { %3814 = vmatpush3.bf16.msra.mxu0 %v454_v3  ;;  %v4279_v3 = vld [vmem:[#allocation6 + $0x1e4] ss:$16 sps:$4 sm:$0xff]  }
 0x172   :  { %3815 = vmatprep.subr.bf16.mxu0 %v471_v16  ;;  %858 = vmatprep.subr.bf16.mxu1 %v4279_v3 }
 0x173   :  { %859 = vmatpush1.bf16.msra.mxu1 %v4277_v5  ;;  %v4295_v5 = vld [vmem:[#allocation6 + $0x200] ss:$16 sps:$4 sm:$0xff]  }
 0x175   :  { %3816 = vmatpush3.bf16.msra.mxu0 %v455_v15 }
 0x176   :  { %3817 = vmatprep.subr.bf16.mxu0 %v472_v28 }
 0x179   :  { %3818 = vmatpush3.bf16.msra.mxu0 %v456_v27  ;;  %v481_v27 = vld [vmem:[#allocation9 + $0x18] sm:$0xff] }
 0x17a   :  { %3819 = vmatprep.subr.bf16.mxu0 %v473_v40 }
 0x17d   :  { %3820 = vmatpush3.bf16.msra.mxu0 %v457_v39 }
 0x17e   :  { %917 = vmatprep.subr.bf16.mxu0 %v4240_v41  ;;  %v483_v41 = vld [vmem:[#allocation9 + $0x28] sm:$0xff] }
 0x180   :  { %583 = vmatmul.mubr.bf16.vlgmr.msra.gmra.mrb[16].mxu0 %v4223_v42 }
 0x181   :  { %590 = vmatprep.mubr.bf16.mxu0 %v4226_v43  ;;  %918 = vmatpush1.bf16.msra.mxu0 %v4238_v44 }
 0x182   :  { %919 = vmatprep.subr.bf16.mxu0 %v4246_v45 }
 0x185   :  { %920 = vmatpush1.bf16.msra.mxu0 %v4244_v46 }
 0x186   :  { %921 = vmatprep.subr.bf16.mxu0 %v4252_v47 }
 0x188   :  { %591 = vmatmul.mubr.bf16.gmra.mrb[20].mxu0 %v4228_v48 }
 0x189   :  { %598 = vmatprep.mubr.bf16.mxu0 %v4229_v49  ;;  %922 = vmatpush1.bf16.msra.mxu0 %v4250_v50  ;;  %v484_v50 = vld [vmem:[#allocation9 + $0x30] sm:$0xff] }
 0x18a   :  { %923 = vmatprep.subr.bf16.mxu0 %v4258_v51 }
 0x18d   :  { %924 = vmatpush1.bf16.msra.mxu0 %v4256_v52 }
 0x18e   :  { %925 = vmatprep.subr.bf16.mxu0 %v4264_v53 }
 0x190   :  { %599 = vmatmul.mubr.bf16.gmra.mrb[24].mxu0 %v4231_v54 }
 0x191   :  { %606 = vmatprep.mubr.bf16.mxu0 %v4232_v55  ;;  %926 = vmatpush1.bf16.msra.mxu0 %v4262_v56  ;;  %v485_v56 = vld [vmem:[#allocation9 + $0x38] sm:$0xff] }
 0x192   :  { %927 = vmatprep.subr.bf16.mxu0 %v4270_v59 }
 0x195   :  { %928 = vmatpush1.bf16.msra.mxu0 %v4268_v61 }
 0x196   :  { %929 = vmatprep.subr.bf16.mxu0 %v4276_v63 }
 0x198   :  { %607 = vmatmul.mubr.bf16.gmra.mrb[28].mxu0 %v4234_v57 }
 0x199   :  { %949 = vmatprep.mubr.bf16.mxu0 %v4684_v0  ;;  %930 = vmatpush1.bf16.msra.mxu0 %v4274_v2 }
 0x19a   :  { %931 = vmatprep.subr.bf16.mxu0 %v4282_v4  ;;  %v4285_v4 = vld [vmem:[#allocation8 + $0x44] ss:$8 sps:$4 sm:$0xff]  }
 0x19d   :  { %932 = vmatpush1.bf16.msra.mxu0 %v4280_v6  ;;  %v4297_v6 = vld [vmem:[#allocation6 + $0x204] ss:$16 sps:$4 sm:$0xff]  }
 0x19e   :  { %1390 = vmatprep.subr.bf16.mxu0 %v4297_v6  ;;  %v4312_v6 = vld [vmem:[#allocation6 + $0x24c] ss:$16 sps:$4 sm:$0xff]  }
 0x253   :  { %v3821_v7 = vpop.f32.mrb[16].mxu0 }
 0x254   :  { %v3822_v9 = vpop.f32.mrb[17].mxu0 }
 0x255   :  { %v3823_v10 = vadd.f32 %v3822_v9, %v3821_v7  ;;  %v3824_v11 = vpop.f32.mrb[18].mxu0  ;;  %v4303_v7 = vld [vmem:[#allocation6 + $0x224] ss:$16 sps:$4 sm:$0xff]  }
 0x256   :  { %v3825_v13 = vpop.f32.mrb[19].mxu0  ;;  %v4309_v9 = vld [vmem:[#allocation6 + $0x244] ss:$16 sps:$4 sm:$0xff]  }
 0x257   :  { %v615_v14 = vadd.f32 %v3823_v10, %v478_v8  ;;  %v3826_v15 = vadd.f32 %v3825_v13, %v3824_v11  ;;  %v4301_v8 = vld [vmem:[#allocation6 + $0x220] ss:$16 sps:$4 sm:$0xff]   ;;  %v4315_v11 = vld [vmem:[#allocation6 + $0x264] ss:$16 sps:$4 sm:$0xff]  }
 0x258   :  { %v4307_v10 = vld [vmem:[#allocation6 + $0x240] ss:$16 sps:$4 sm:$0xff]   ;;  %v4321_v13 = vld [vmem:[#allocation6 + $0x284] ss:$16 sps:$4 sm:$0xff]  }
 0x259   :  { %v631_v16 = vmul.f32 0.01, %v615_v14  ;;  %v616_v17 = vadd.f32 %v3826_v15, %v479_v12  ;;  %vm623_vm0 = vcmp.ge.f32.partialorder %v615_v14, 0.0  ;;  %v4313_v12 = vld [vmem:[#allocation6 + $0x260] ss:$16 sps:$4 sm:$0xff]  }
 0x25b   :  { %vm624_vm1 = vcmp.ge.f32.partialorder %v616_v17, 0.0  ;;  %v632_v18 = vmul.f32 0.01, %v616_v17  ;;  %v3827_v19 = vpop.f32.mrb[20].mxu0  ;;  %v639_v22 = vsel %vm623_vm0, %v615_v14, %v631_v16  ;;  %v4319_v14 = vld [vmem:[#allocation6 + $0x280] ss:$16 sps:$4 sm:$0xff]  }
 0x25c   :  { %v3828_v21 = vpop.f32.mrb[21].mxu0 }
 0x25d   :  { %v640_v23 = vsel %vm624_vm1, %v616_v17, %v632_v18  ;;  %v3829_v24 = vadd.f32 %v3828_v21, %v3827_v19  ;;  %v3830_v25 = vpop.f32.mrb[22].mxu0 }
 0x25e   :  { %v647_v26 = vpack.c.bf16 %v640_v23, %v639_v22  ;;  %v3831_v28 = vpop.f32.mrb[23].mxu0 }
 0x25f   :  { %v617_v29 = vadd.f32 %v3829_v24, %v480_v20  ;;  %v3832_v30 = vadd.f32 %v3831_v28, %v3830_v25 }
 0x260   :  { %877 = vmatmul.mubr.bf16.vlgmr.msra.gmra.mrb[16].mxu1 %v647_v26  ;;  %950 = vmatmul.mubr.bf16.vlgmr.msra.gmra.mrb[32].mxu0 %v647_v26 }
 0x261   :  { %v633_v31 = vmul.f32 0.01, %v617_v29  ;;  %v618_v32 = vadd.f32 %v3832_v30, %v481_v27  ;;  %886 = vmatprep.mubr.bf16.mxu1 %v4684_v0  ;;  %959 = vmatprep.mubr.bf16.mxu0 %v4684_v0  ;;  %vm625_vm2 = vcmp.ge.f32.partialorder %v617_v29, 0.0 }
 0x262   :  { %1391 = vmatpush1.bf16.msra.mxu0 %v4295_v5  ;;  %v4304_v5 = vld [vmem:[#allocation6 + $0x228] ss:$16 sps:$4 sm:$0xff]  }
 0x263   :  { %vm626_vm3 = vcmp.ge.f32.partialorder %v618_v32, 0.0  ;;  %v634_v33 = vmul.f32 0.01, %v618_v32  ;;  %v3833_v34 = vpop.f32.mrb[24].mxu0  ;;  %v641_v39 = vsel %vm625_vm2, %v617_v29, %v633_v31  ;;  %1392 = vmatprep.subr.bf16.mxu0 %v4303_v7  ;;  %v4288_v7 = vld [vmem:[#allocation8 + $0x50] ss:$8 sps:$4 sm:$0xff]  }
 0x264   :  { %v3834_v36 = vpop.f32.mrb[25].mxu0 }
 0x265   :  { %v3835_v37 = vadd.f32 %v3834_v36, %v3833_v34  ;;  %v3836_v38 = vpop.f32.mrb[26].mxu0  ;;  %v642_v40 = vsel %vm626_vm3, %v618_v32, %v634_v33 }
 0x266   :  { %v3837_v42 = vpop.f32.mrb[27].mxu0  ;;  %v648_v43 = vpack.c.bf16 %v642_v40, %v641_v39  ;;  %1393 = vmatpush1.bf16.msra.mxu0 %v4301_v8  ;;  %v4289_v8 = vld [vmem:[#allocation8 + $0x64] ss:$8 sps:$4 sm:$0xff]  }
 0x267   :  { %v619_v44 = vadd.f32 %v3835_v37, %v482_v35  ;;  %v3838_v45 = vadd.f32 %v3837_v42, %v3836_v38  ;;  %1394 = vmatprep.subr.bf16.mxu0 %v4309_v9  ;;  %v4310_v9 = vld [vmem:[#allocation6 + $0x248] ss:$16 sps:$4 sm:$0xff]  }
 0x268   :  { %887 = vmatmul.mubr.bf16.gmra.mrb[20].mxu1 %v648_v43  ;;  %960 = vmatmul.mubr.bf16.gmra.mrb[36].mxu0 %v648_v43 }
 0x269   :  { %v635_v46 = vmul.f32 0.01, %v619_v44  ;;  %v620_v47 = vadd.f32 %v3838_v45, %v483_v41  ;;  %896 = vmatprep.mubr.bf16.mxu1 %v4684_v0  ;;  %969 = vmatprep.mubr.bf16.mxu0 %v4684_v0  ;;  %vm627_vm4 = vcmp.ge.f32.partialorder %v619_v44, 0.0 }
 0x26a   :  { %1395 = vmatpush1.bf16.msra.mxu0 %v4307_v10  ;;  %v4318_v10 = vld [vmem:[#allocation6 + $0x26c] ss:$16 sps:$4 sm:$0xff]  }
 0x26b   :  { %vm628_vm5 = vcmp.ge.f32.partialorder %v620_v47, 0.0  ;;  %v636_v48 = vmul.f32 0.01, %v620_v47  ;;  %v3839_v49 = vpop.f32.mrb[28].mxu0  ;;  %v643_v54 = vsel %vm627_vm4, %v619_v44, %v635_v46  ;;  %1396 = vmatprep.subr.bf16.mxu0 %v4315_v11  ;;  %v4316_v11 = vld [vmem:[#allocation6 + $0x268] ss:$16 sps:$4 sm:$0xff]  }
 0x26c   :  { %v3840_v51 = vpop.f32.mrb[29].mxu0 }
 0x26d   :  { %v3841_v52 = vadd.f32 %v3840_v51, %v3839_v49  ;;  %v3842_v53 = vpop.f32.mrb[30].mxu0  ;;  %v644_v55 = vsel %vm628_vm5, %v620_v47, %v636_v48 }
 0x26e   :  { %v3843_v57 = vpop.f32.mrb[31].mxu0  ;;  %v649_v58 = vpack.c.bf16 %v644_v55, %v643_v54  ;;  %1397 = vmatpush1.bf16.msra.mxu0 %v4313_v12  ;;  %v4324_v12 = vld [vmem:[#allocation6 + $0x28c] ss:$16 sps:$4 sm:$0xff]  }
 0x26f   :  { %v621_v59 = vadd.f32 %v3841_v52, %v484_v50  ;;  %v3844_v60 = vadd.f32 %v3843_v57, %v3842_v53  ;;  %1398 = vmatprep.subr.bf16.mxu0 %v4321_v13  ;;  %v4291_v13 = vld [vmem:[#allocation8 + $0x60] ss:$8 sps:$4 sm:$0xff]  }
 0x270   :  { %897 = vmatmul.mubr.bf16.gmra.mrb[24].mxu1 %v649_v58  ;;  %970 = vmatmul.mubr.bf16.gmra.mrb[40].mxu0 %v649_v58 }
 0x271   :  { %v637_v61 = vmul.f32 0.01, %v621_v59  ;;  %v622_v62 = vadd.f32 %v3844_v60, %v485_v56  ;;  %906 = vmatprep.mubr.bf16.mxu1 %v4684_v0  ;;  %979 = vmatprep.mubr.bf16.mxu0 %v4684_v0  ;;  %vm629_vm6 = vcmp.ge.f32.partialorder %v621_v59, 0.0 }
 0x272   :  { %1399 = vmatpush1.bf16.msra.mxu0 %v4319_v14  ;;  %v4292_v14 = vld [vmem:[#allocation8 + $0x74] ss:$8 sps:$4 sm:$0xff]  }
 0x273   :  { %vm630_vm7 = vcmp.ge.f32.partialorder %v622_v62, 0.0  ;;  %v638_v63 = vmul.f32 0.01, %v622_v62  ;;  %v645_v1 = vsel %vm629_vm6, %v621_v59, %v637_v61 }
 0x275   :  { %v646_v2 = vsel %vm630_vm7, %v622_v62, %v638_v63  ;;  %v4300_v63 = vld [vmem:[#allocation6 + $0x20c] ss:$16 sps:$4 sm:$0xff]  }
 0x276   :  { %v650_v3 = vpack.c.bf16 %v646_v2, %v645_v1  ;;  %v4283_v1 = vld [vmem:[#allocation8 + $0x40] ss:$8 sps:$4 sm:$0xff]   ;;  %v4286_v2 = vld [vmem:[#allocation8 + $0x54] ss:$8 sps:$4 sm:$0xff]  }
 0x278   :  { %907 = vmatmul.mubr.bf16.gmra.mrb[28].mxu1 %v650_v3  ;;  %980 = vmatmul.mubr.bf16.gmra.mrb[44].mxu0 %v650_v3  ;;  %v4298_v3 = vld [vmem:[#allocation6 + $0x208] ss:$16 sps:$4 sm:$0xff]  }
 0x279   :  { %1422 = vmatprep.mubr.bf16.mxu0 %v4684_v0  ;;  %1128 = vmatprep.mubr.bf16.mxu1 %v4285_v4  ;;  %v4306_v4 = vld [vmem:[#allocation6 + $0x22c] ss:$16 sps:$4 sm:$0xff]  }
 0x333   :  { %v878_v15 = vpop.f32.mrb[16].mxu1  ;;  %v951_v16 = vpop.f32.mrb[32].mxu0 }
 0x334   :  { %v880_v17 = vpop.f32.mrb[17].mxu1  ;;  %v953_v18 = vpop.f32.mrb[33].mxu0 }
 0x335   :  { %v882_v19 = vpop.f32.mrb[18].mxu1  ;;  %v955_v20 = vpop.f32.mrb[34].mxu0 }
 0x336   :  { %v990_v21 = vpack.c.bf16 %v882_v19, %v878_v15  ;;  %v1006_v22 = vpack.c.bf16 %v955_v20, %v951_v16  ;;  %v884_v23 = vpop.f32.mrb[19].mxu1  ;;  %v957_v24 = vpop.f32.mrb[35].mxu0  ;;  %v4322_v15 = vld [vmem:[#allocation6 + $0x288] ss:$16 sps:$4 sm:$0xff]   ;;  %v4325_v19 = vld [vmem:[#allocation6 + $0x2a0] ss:$16 sps:$4 sm:$0xff]  }
 0x337   :  { %v998_v25 = vpack.c.bf16 %v884_v23, %v880_v17  ;;  %v1014_v26 = vpack.c.bf16 %v957_v24, %v953_v18  ;;  %v4294_v16 = vld [vmem:[#allocation8 + $0x70] ss:$8 sps:$4 sm:$0xff]   ;;  %v4327_v17 = vld [vmem:[#allocation6 + $0x2a4] ss:$16 sps:$4 sm:$0xff]   ;;  %v4330_v18 = vld [vmem:[#allocation6 + $0x2ac] ss:$16 sps:$4 sm:$0xff]  }
 0x338   :  { %3845 = vmatprep.subr.bf16.mxu1 %v1006_v22  ;;  %v4328_v20 = vld [vmem:[#allocation6 + $0x2a8] ss:$16 sps:$4 sm:$0xff]   ;;  %1400 = vmatprep.subr.bf16.mxu0 %v4327_v17  ;;  %v4336_v22 = vld [vmem:[#allocation6 + $0x2cc] ss:$16 sps:$4 sm:$0xff]   ;;  %v4331_v23 = vld [vmem:[#allocation6 + $0x2c0] ss:$16 sps:$4 sm:$0xff]  }
 0x339   :  { %3846 = vmatpush3.bf16.msra.mxu1 %v990_v21  ;;  %1401 = vmatpush1.bf16.msra.mxu0 %v4325_v19  ;;  %v4333_v21 = vld [vmem:[#allocation6 + $0x2c4] ss:$16 sps:$4 sm:$0xff]   ;;  %v4334_v24 = vld [vmem:[#allocation6 + $0x2c8] ss:$16 sps:$4 sm:$0xff]  }
 0x33a   :  { %1402 = vmatprep.subr.bf16.mxu0 %v4333_v21 }
 0x33b   :  { %v888_v27 = vpop.f32.mrb[20].mxu1  ;;  %v961_v28 = vpop.f32.mrb[36].mxu0 }
 0x33c   :  { %v890_v29 = vpop.f32.mrb[21].mxu1  ;;  %v963_v30 = vpop.f32.mrb[37].mxu0 }
 0x33d   :  { %v892_v31 = vpop.f32.mrb[22].mxu1  ;;  %v965_v32 = vpop.f32.mrb[38].mxu0  ;;  %1403 = vmatpush1.bf16.msra.mxu0 %v4331_v23 }
 0x33e   :  { %v991_v33 = vpack.c.bf16 %v892_v31, %v888_v27  ;;  %v1007_v34 = vpack.c.bf16 %v965_v32, %v961_v28  ;;  %v894_v35 = vpop.f32.mrb[23].mxu1  ;;  %v967_v36 = vpop.f32.mrb[39].mxu0  ;;  %v4337_v27 = vld [vmem:[#allocation6 + $0x2e0] ss:$16 sps:$4 sm:$0xff]   ;;  %v4340_v28 = vld [vmem:[#allocation6 + $0x2e8] ss:$16 sps:$4 sm:$0xff]  }
 0x33f   :  { %v999_v37 = vpack.c.bf16 %v894_v35, %v890_v29  ;;  %v1015_v38 = vpack.c.bf16 %v967_v36, %v963_v30  ;;  %v1023_v30 = vld [vmem:[#allocation9 + $0x40] sm:$0xff] }
 0x340   :  { %3847 = vmatprep.subr.bf16.mxu1 %v1007_v34  ;;  %v1024_v34 = vld [vmem:[#allocation9 + $0x48] sm:$0xff] }
 0x341   :  { %3848 = vmatpush3.bf16.msra.mxu1 %v991_v33 }
 0x343   :  { %v898_v39 = vpop.f32.mrb[24].mxu1  ;;  %v971_v40 = vpop.f32.mrb[40].mxu0 }
 0x344   :  { %v900_v41 = vpop.f32.mrb[25].mxu1  ;;  %v973_v42 = vpop.f32.mrb[41].mxu0 }
 0x345   :  { %v902_v43 = vpop.f32.mrb[26].mxu1  ;;  %v975_v44 = vpop.f32.mrb[42].mxu0 }
 0x346   :  { %v992_v45 = vpack.c.bf16 %v902_v43, %v898_v39  ;;  %v1008_v46 = vpack.c.bf16 %v975_v44, %v971_v40  ;;  %v904_v47 = vpop.f32.mrb[27].mxu1  ;;  %v977_v48 = vpop.f32.mrb[43].mxu0 }
 0x347   :  { %v1000_v49 = vpack.c.bf16 %v904_v47, %v900_v41  ;;  %v1016_v50 = vpack.c.bf16 %v977_v48, %v973_v42  ;;  %v1025_v42 = vld [vmem:[#allocation9 + $0x50] sm:$0xff] }
 0x348   :  { %3849 = vmatprep.subr.bf16.mxu1 %v1008_v46 }
 0x349   :  { %3850 = vmatpush3.bf16.msra.mxu1 %v992_v45 }
 0x34b   :  { %v908_v51 = vpop.f32.mrb[28].mxu1  ;;  %v981_v52 = vpop.f32.mrb[44].mxu0 }
 0x34c   :  { %v910_v53 = vpop.f32.mrb[29].mxu1  ;;  %v983_v54 = vpop.f32.mrb[45].mxu0 }
 0x34d   :  { %v912_v55 = vpop.f32.mrb[30].mxu1  ;;  %v985_v56 = vpop.f32.mrb[46].mxu0 }
 0x34e   :  { %v993_v57 = vpack.c.bf16 %v912_v55, %v908_v51  ;;  %v1009_v58 = vpack.c.bf16 %v985_v56, %v981_v52  ;;  %v914_v59 = vpop.f32.mrb[31].mxu1  ;;  %v987_v60 = vpop.f32.mrb[47].mxu0 }
 0x34f   :  { %v1001_v61 = vpack.c.bf16 %v914_v59, %v910_v53  ;;  %v1017_v62 = vpack.c.bf16 %v987_v60, %v983_v54 }
 0x350   :  { %3851 = vmatprep.subr.bf16.mxu1 %v1009_v58 }
 0x351   :  { %3852 = vmatpush3.bf16.msra.mxu1 %v993_v57  ;;  %v1027_v57 = vld [vmem:[#allocation9 + $0x60] sm:$0xff] }
 0x352   :  { %3853 = vmatprep.subr.bf16.mxu1 %v1014_v26  ;;  %v4342_v26 = vld [vmem:[#allocation6 + $0x2ec] ss:$16 sps:$4 sm:$0xff]  }
 0x355   :  { %3854 = vmatpush3.bf16.msra.mxu1 %v998_v25  ;;  %v4339_v25 = vld [vmem:[#allocation6 + $0x2e4] ss:$16 sps:$4 sm:$0xff]  }
 0x356   :  { %3855 = vmatprep.subr.bf16.mxu1 %v1015_v38  ;;  %1404 = vmatprep.subr.bf16.mxu0 %v4339_v25 }
 0x357   :  { %1405 = vmatpush1.bf16.msra.mxu0 %v4337_v27  ;;  %v4355_v27 = vld [vmem:[#allocation6 + $0x300] ss:$16 sps:$4 sm:$0xff]  }
 0x359   :  { %3856 = vmatpush3.bf16.msra.mxu1 %v999_v37 }
 0x35a   :  { %3857 = vmatprep.subr.bf16.mxu1 %v1016_v50 }
 0x35d   :  { %3858 = vmatpush3.bf16.msra.mxu1 %v1000_v49  ;;  %v1026_v49 = vld [vmem:[#allocation9 + $0x58] sm:$0xff] }
 0x35e   :  { %3859 = vmatprep.subr.bf16.mxu1 %v1017_v62 }
 0x361   :  { %3860 = vmatpush3.bf16.msra.mxu1 %v1001_v61 }
 0x362   :  { %1463 = vmatprep.subr.bf16.mxu1 %v4300_v63  ;;  %v1028_v63 = vld [vmem:[#allocation9 + $0x68] sm:$0xff] }
 0x364   :  { %1129 = vmatmul.mubr.bf16.vlgmr.msra.gmra.mrb[32].mxu1 %v4283_v1 }
 0x365   :  { %1136 = vmatprep.mubr.bf16.mxu1 %v4286_v2  ;;  %1464 = vmatpush1.bf16.msra.mxu1 %v4298_v3 }
 0x366   :  { %1465 = vmatprep.subr.bf16.mxu1 %v4306_v4 }
 0x369   :  { %1466 = vmatpush1.bf16.msra.mxu1 %v4304_v5 }
 0x36a   :  { %1467 = vmatprep.subr.bf16.mxu1 %v4312_v6 }
 0x36c   :  { %1137 = vmatmul.mubr.bf16.gmra.mrb[36].mxu1 %v4288_v7 }
 0x36d   :  { %1144 = vmatprep.mubr.bf16.mxu1 %v4289_v8  ;;  %1468 = vmatpush1.bf16.msra.mxu1 %v4310_v9  ;;  %v1029_v9 = vld [vmem:[#allocation9 + $0x70] sm:$0xff] }
 0x36e   :  { %1469 = vmatprep.subr.bf16.mxu1 %v4318_v10 }
 0x371   :  { %1470 = vmatpush1.bf16.msra.mxu1 %v4316_v11 }
 0x372   :  { %1471 = vmatprep.subr.bf16.mxu1 %v4324_v12 }
 0x374   :  { %1145 = vmatmul.mubr.bf16.gmra.mrb[40].mxu1 %v4291_v13 }
 0x375   :  { %1152 = vmatprep.mubr.bf16.mxu1 %v4292_v14  ;;  %1472 = vmatpush1.bf16.msra.mxu1 %v4322_v15  ;;  %v1030_v15 = vld [vmem:[#allocation9 + $0x78] sm:$0xff] }
 0x376   :  { %1473 = vmatprep.subr.bf16.mxu1 %v4330_v18 }
 0x379   :  { %1474 = vmatpush1.bf16.msra.mxu1 %v4328_v20 }
 0x37a   :  { %1475 = vmatprep.subr.bf16.mxu1 %v4336_v22 }
 0x37c   :  { %1153 = vmatmul.mubr.bf16.gmra.mrb[44].mxu1 %v4294_v16 }
 0x37d   :  { %1495 = vmatprep.mubr.bf16.mxu1 %v4684_v0  ;;  %1476 = vmatpush1.bf16.msra.mxu1 %v4334_v24 }
 0x37e   :  { %1477 = vmatprep.subr.bf16.mxu1 %v4342_v26  ;;  %v4345_v26 = vld [vmem:[#allocation8 + $0x84] ss:$8 sps:$4 sm:$0xff]  }
 0x381   :  { %1478 = vmatpush1.bf16.msra.mxu1 %v4340_v28  ;;  %v4357_v28 = vld [vmem:[#allocation6 + $0x304] ss:$16 sps:$4 sm:$0xff]  }
 0x382   :  { %1936 = vmatprep.subr.bf16.mxu1 %v4357_v28  ;;  %v4372_v28 = vld [vmem:[#allocation6 + $0x34c] ss:$16 sps:$4 sm:$0xff]  }
 0x437   :  { %v3861_v29 = vpop.f32.mrb[32].mxu1 }
 0x438   :  { %v3862_v31 = vpop.f32.mrb[33].mxu1 }
 0x439   :  { %v3863_v32 = vadd.f32 %v3862_v31, %v3861_v29  ;;  %v3864_v33 = vpop.f32.mrb[34].mxu1  ;;  %v4363_v29 = vld [vmem:[#allocation6 + $0x324] ss:$16 sps:$4 sm:$0xff]  }
 0x43a   :  { %v3865_v35 = vpop.f32.mrb[35].mxu1  ;;  %v4369_v31 = vld [vmem:[#allocation6 + $0x344] ss:$16 sps:$4 sm:$0xff]  }
 0x43b   :  { %v1161_v36 = vadd.f32 %v3863_v32, %v1023_v30  ;;  %v3866_v37 = vadd.f32 %v3865_v35, %v3864_v33  ;;  %v4361_v30 = vld [vmem:[#allocation6 + $0x320] ss:$16 sps:$4 sm:$0xff]   ;;  %v4375_v33 = vld [vmem:[#allocation6 + $0x364] ss:$16 sps:$4 sm:$0xff]  }
 0x43c   :  { %v4367_v32 = vld [vmem:[#allocation6 + $0x340] ss:$16 sps:$4 sm:$0xff]   ;;  %v4381_v35 = vld [vmem:[#allocation6 + $0x384] ss:$16 sps:$4 sm:$0xff]  }
 0x43d   :  { %v1177_v38 = vmul.f32 0.01, %v1161_v36  ;;  %v1162_v39 = vadd.f32 %v3866_v37, %v1024_v34  ;;  %vm1169_vm8 = vcmp.ge.f32.partialorder %v1161_v36, 0.0  ;;  %v4373_v34 = vld [vmem:[#allocation6 + $0x360] ss:$16 sps:$4 sm:$0xff]  }
 0x43f   :  { %vm1170_vm9 = vcmp.ge.f32.partialorder %v1162_v39, 0.0  ;;  %v1178_v40 = vmul.f32 0.01, %v1162_v39  ;;  %v3867_v41 = vpop.f32.mrb[36].mxu1  ;;  %v1185_v44 = vsel %vm1169_vm8, %v1161_v36, %v1177_v38  ;;  %v4379_v36 = vld [vmem:[#allocation6 + $0x380] ss:$16 sps:$4 sm:$0xff]  }
 0x440   :  { %v3868_v43 = vpop.f32.mrb[37].mxu1 }
 0x441   :  { %v1186_v45 = vsel %vm1170_vm9, %v1162_v39, %v1178_v40  ;;  %v3869_v46 = vadd.f32 %v3868_v43, %v3867_v41  ;;  %v3870_v47 = vpop.f32.mrb[38].mxu1 }
 0x442   :  { %v1193_v48 = vpack.c.bf16 %v1186_v45, %v1185_v44  ;;  %v3871_v50 = vpop.f32.mrb[39].mxu1 }
 0x443   :  { %v1163_v51 = vadd.f32 %v3869_v46, %v1025_v42  ;;  %v3872_v52 = vadd.f32 %v3871_v50, %v3870_v47 }
 0x444   :  { %1423 = vmatmul.mubr.bf16.vlgmr.msra.gmra.mrb[48].mxu0 %v1193_v48  ;;  %1496 = vmatmul.mubr.bf16.vlgmr.msra.gmra.mrb[48].mxu1 %v1193_v48 }
 0x445   :  { %v1179_v53 = vmul.f32 0.01, %v1163_v51  ;;  %v1164_v54 = vadd.f32 %v3872_v52, %v1026_v49  ;;  %1432 = vmatprep.mubr.bf16.mxu0 %v4684_v0  ;;  %1505 = vmatprep.mubr.bf16.mxu1 %v4684_v0  ;;  %vm1171_vm10 = vcmp.ge.f32.partialorder %v1163_v51, 0.0 }
 0x446   :  { %1937 = vmatpush1.bf16.msra.mxu1 %v4355_v27  ;;  %v4364_v27 = vld [vmem:[#allocation6 + $0x328] ss:$16 sps:$4 sm:$0xff]  }
 0x447   :  { %vm1172_vm11 = vcmp.ge.f32.partialorder %v1164_v54, 0.0  ;;  %v1180_v55 = vmul.f32 0.01, %v1164_v54  ;;  %v3873_v56 = vpop.f32.mrb[40].mxu1  ;;  %v1187_v61 = vsel %vm1171_vm10, %v1163_v51, %v1179_v53  ;;  %1938 = vmatprep.subr.bf16.mxu1 %v4363_v29  ;;  %v4348_v29 = vld [vmem:[#allocation8 + $0x90] ss:$8 sps:$4 sm:$0xff]  }
 0x448   :  { %v3874_v58 = vpop.f32.mrb[41].mxu1 }
 0x449   :  { %v3875_v59 = vadd.f32 %v3874_v58, %v3873_v56  ;;  %v3876_v60 = vpop.f32.mrb[42].mxu1  ;;  %v1188_v62 = vsel %vm1172_vm11, %v1164_v54, %v1180_v55 }
 0x44a   :  { %v3877_v1 = vpop.f32.mrb[43].mxu1  ;;  %v1194_v2 = vpack.c.bf16 %v1188_v62, %v1187_v61  ;;  %1939 = vmatpush1.bf16.msra.mxu1 %v4361_v30  ;;  %v4349_v30 = vld [vmem:[#allocation8 + $0xa4] ss:$8 sps:$4 sm:$0xff]  }
 0x44b   :  { %v1165_v3 = vadd.f32 %v3875_v59, %v1027_v57  ;;  %v3878_v4 = vadd.f32 %v3877_v1, %v3876_v60  ;;  %1940 = vmatprep.subr.bf16.mxu1 %v4369_v31  ;;  %v4370_v31 = vld [vmem:[#allocation6 + $0x348] ss:$16 sps:$4 sm:$0xff]  }
 0x44c   :  { %1433 = vmatmul.mubr.bf16.gmra.mrb[52].mxu0 %v1194_v2  ;;  %1506 = vmatmul.mubr.bf16.gmra.mrb[52].mxu1 %v1194_v2 }
 0x44d   :  { %v1181_v5 = vmul.f32 0.01, %v1165_v3  ;;  %v1166_v6 = vadd.f32 %v3878_v4, %v1028_v63  ;;  %1442 = vmatprep.mubr.bf16.mxu0 %v4684_v0  ;;  %1515 = vmatprep.mubr.bf16.mxu1 %v4684_v0  ;;  %vm1173_vm12 = vcmp.ge.f32.partialorder %v1165_v3, 0.0 }
 0x44e   :  { %1941 = vmatpush1.bf16.msra.mxu1 %v4367_v32  ;;  %v4378_v32 = vld [vmem:[#allocation6 + $0x36c] ss:$16 sps:$4 sm:$0xff]  }
 0x44f   :  { %vm1174_vm13 = vcmp.ge.f32.partialorder %v1166_v6, 0.0  ;;  %v1182_v7 = vmul.f32 0.01, %v1166_v6  ;;  %v3879_v8 = vpop.f32.mrb[44].mxu1  ;;  %v1189_v13 = vsel %vm1173_vm12, %v1165_v3, %v1181_v5  ;;  %1942 = vmatprep.subr.bf16.mxu1 %v4375_v33  ;;  %v4376_v33 = vld [vmem:[#allocation6 + $0x368] ss:$16 sps:$4 sm:$0xff]  }
 0x450   :  { %v3880_v10 = vpop.f32.mrb[45].mxu1 }
 0x451   :  { %v3881_v11 = vadd.f32 %v3880_v10, %v3879_v8  ;;  %v3882_v12 = vpop.f32.mrb[46].mxu1  ;;  %v1190_v14 = vsel %vm1174_vm13, %v1166_v6, %v1182_v7 }
 0x452   :  { %v3883_v16 = vpop.f32.mrb[47].mxu1  ;;  %v1195_v17 = vpack.c.bf16 %v1190_v14, %v1189_v13  ;;  %1943 = vmatpush1.bf16.msra.mxu1 %v4373_v34  ;;  %v4384_v34 = vld [vmem:[#allocation6 + $0x38c] ss:$16 sps:$4 sm:$0xff]  }
 0x453   :  { %v1167_v18 = vadd.f32 %v3881_v11, %v1029_v9  ;;  %v3884_v19 = vadd.f32 %v3883_v16, %v3882_v12  ;;  %1944 = vmatprep.subr.bf16.mxu1 %v4381_v35  ;;  %v4351_v35 = vld [vmem:[#allocation8 + $0xa0] ss:$8 sps:$4 sm:$0xff]  }
 0x454   :  { %1443 = vmatmul.mubr.bf16.gmra.mrb[56].mxu0 %v1195_v17  ;;  %1516 = vmatmul.mubr.bf16.gmra.mrb[56].mxu1 %v1195_v17 }
 0x455   :  { %v1183_v20 = vmul.f32 0.01, %v1167_v18  ;;  %v1168_v21 = vadd.f32 %v3884_v19, %v1030_v15  ;;  %1452 = vmatprep.mubr.bf16.mxu0 %v4684_v0  ;;  %1525 = vmatprep.mubr.bf16.mxu1 %v4684_v0  ;;  %vm1175_vm14 = vcmp.ge.f32.partialorder %v1167_v18, 0.0 }
 0x456   :  { %1945 = vmatpush1.bf16.msra.mxu1 %v4379_v36  ;;  %v4352_v36 = vld [vmem:[#allocation8 + $0xb4] ss:$8 sps:$4 sm:$0xff]  }
 0x457   :  { %vm1176_vm15 = vcmp.ge.f32.partialorder %v1168_v21, 0.0  ;;  %v1184_v22 = vmul.f32 0.01, %v1168_v21  ;;  %v1191_v23 = vsel %vm1175_vm14, %v1167_v18, %v1183_v20 }
 0x459   :  { %v1192_v24 = vsel %vm1176_vm15, %v1168_v21, %v1184_v22  ;;  %v4360_v22 = vld [vmem:[#allocation6 + $0x30c] ss:$16 sps:$4 sm:$0xff]  }
 0x45a   :  { %v1196_v25 = vpack.c.bf16 %v1192_v24, %v1191_v23  ;;  %v4343_v23 = vld [vmem:[#allocation8 + $0x80] ss:$8 sps:$4 sm:$0xff]   ;;  %v4346_v24 = vld [vmem:[#allocation8 + $0x94] ss:$8 sps:$4 sm:$0xff]  }
 0x45c   :  { %1453 = vmatmul.mubr.bf16.gmra.mrb[60].mxu0 %v1196_v25  ;;  %1526 = vmatmul.mubr.bf16.gmra.mrb[60].mxu1 %v1196_v25  ;;  %v4358_v25 = vld [vmem:[#allocation6 + $0x308] ss:$16 sps:$4 sm:$0xff]  }
 0x45d   :  { %1968 = vmatprep.mubr.bf16.mxu1 %v4684_v0  ;;  %1674 = vmatprep.mubr.bf16.mxu0 %v4345_v26  ;;  %v4366_v26 = vld [vmem:[#allocation6 + $0x32c] ss:$16 sps:$4 sm:$0xff]  }
 0x517   :  { %v1424_v37 = vpop.f32.mrb[48].mxu0  ;;  %v1497_v38 = vpop.f32.mrb[48].mxu1 }
 0x518   :  { %v1426_v39 = vpop.f32.mrb[49].mxu0  ;;  %v1499_v40 = vpop.f32.mrb[49].mxu1 }
 0x519   :  { %v1428_v41 = vpop.f32.mrb[50].mxu0  ;;  %v1501_v42 = vpop.f32.mrb[50].mxu1 }
 0x51a   :  { %v1536_v43 = vpack.c.bf16 %v1428_v41, %v1424_v37  ;;  %v1552_v44 = vpack.c.bf16 %v1501_v42, %v1497_v38  ;;  %v1430_v45 = vpop.f32.mrb[51].mxu0  ;;  %v1503_v46 = vpop.f32.mrb[51].mxu1  ;;  %v4382_v37 = vld [vmem:[#allocation6 + $0x388] ss:$16 sps:$4 sm:$0xff]   ;;  %v4385_v41 = vld [vmem:[#allocation6 + $0x3a0] ss:$16 sps:$4 sm:$0xff]  }
 0x51b   :  { %v1544_v47 = vpack.c.bf16 %v1430_v45, %v1426_v39  ;;  %v1560_v48 = vpack.c.bf16 %v1503_v46, %v1499_v40  ;;  %v4354_v38 = vld [vmem:[#allocation8 + $0xb0] ss:$8 sps:$4 sm:$0xff]   ;;  %v4387_v39 = vld [vmem:[#allocation6 + $0x3a4] ss:$16 sps:$4 sm:$0xff]   ;;  %v4390_v40 = vld [vmem:[#allocation6 + $0x3ac] ss:$16 sps:$4 sm:$0xff]  }
 0x51c   :  { %3885 = vmatprep.subr.bf16.mxu0 %v1552_v44  ;;  %v4388_v42 = vld [vmem:[#allocation6 + $0x3a8] ss:$16 sps:$4 sm:$0xff]   ;;  %1946 = vmatprep.subr.bf16.mxu1 %v4387_v39  ;;  %v4396_v44 = vld [vmem:[#allocation6 + $0x3cc] ss:$16 sps:$4 sm:$0xff]   ;;  %v4391_v45 = vld [vmem:[#allocation6 + $0x3c0] ss:$16 sps:$4 sm:$0xff]  }
 0x51d   :  { %3886 = vmatpush3.bf16.msra.mxu0 %v1536_v43  ;;  %1947 = vmatpush1.bf16.msra.mxu1 %v4385_v41  ;;  %v4393_v43 = vld [vmem:[#allocation6 + $0x3c4] ss:$16 sps:$4 sm:$0xff]   ;;  %v4394_v46 = vld [vmem:[#allocation6 + $0x3c8] ss:$16 sps:$4 sm:$0xff]  }
 0x51e   :  { %1948 = vmatprep.subr.bf16.mxu1 %v4393_v43 }
 0x51f   :  { %v1434_v49 = vpop.f32.mrb[52].mxu0  ;;  %v1507_v50 = vpop.f32.mrb[52].mxu1 }
 0x520   :  { %v1436_v51 = vpop.f32.mrb[53].mxu0  ;;  %v1509_v52 = vpop.f32.mrb[53].mxu1 }
 0x521   :  { %v1438_v53 = vpop.f32.mrb[54].mxu0  ;;  %v1511_v54 = vpop.f32.mrb[54].mxu1  ;;  %1949 = vmatpush1.bf16.msra.mxu1 %v4391_v45 }
 0x522   :  { %v1537_v55 = vpack.c.bf16 %v1438_v53, %v1434_v49  ;;  %v1553_v56 = vpack.c.bf16 %v1511_v54, %v1507_v50  ;;  %v1440_v57 = vpop.f32.mrb[55].mxu0  ;;  %v1513_v58 = vpop.f32.mrb[55].mxu1  ;;  %v4397_v49 = vld [vmem:[#allocation6 + $0x3e0] ss:$16 sps:$4 sm:$0xff]   ;;  %v4400_v50 = vld [vmem:[#allocation6 + $0x3e8] ss:$16 sps:$4 sm:$0xff]  }
 0x523   :  { %v1545_v59 = vpack.c.bf16 %v1440_v57, %v1436_v51  ;;  %v1561_v60 = vpack.c.bf16 %v1513_v58, %v1509_v52  ;;  %v1569_v52 = vld [vmem:[#allocation9 + $0x80] sm:$0xff] }
 0x524   :  { %3887 = vmatprep.subr.bf16.mxu0 %v1553_v56  ;;  %v1570_v56 = vld [vmem:[#allocation9 + $0x88] sm:$0xff] }
 0x525   :  { %3888 = vmatpush3.bf16.msra.mxu0 %v1537_v55 }
 0x527   :  { %v1444_v61 = vpop.f32.mrb[56].mxu0  ;;  %v1517_v62 = vpop.f32.mrb[56].mxu1 }
 0x528   :  { %v1446_v63 = vpop.f32.mrb[57].mxu0  ;;  %v1519_v1 = vpop.f32.mrb[57].mxu1 }
 0x529   :  { %v1448_v2 = vpop.f32.mrb[58].mxu0  ;;  %v1521_v3 = vpop.f32.mrb[58].mxu1 }
 0x52a   :  { %v1538_v4 = vpack.c.bf16 %v1448_v2, %v1444_v61  ;;  %v1554_v5 = vpack.c.bf16 %v1521_v3, %v1517_v62  ;;  %v1450_v6 = vpop.f32.mrb[59].mxu0  ;;  %v1523_v7 = vpop.f32.mrb[59].mxu1 }
 0x52b   :  { %v1546_v8 = vpack.c.bf16 %v1450_v6, %v1446_v63  ;;  %v1562_v9 = vpack.c.bf16 %v1523_v7, %v1519_v1  ;;  %v1571_v1 = vld [vmem:[#allocation9 + $0x90] sm:$0xff] }
 0x52c   :  { %3889 = vmatprep.subr.bf16.mxu0 %v1554_v5 }
 0x52d   :  { %3890 = vmatpush3.bf16.msra.mxu0 %v1538_v4 }
 0x52f   :  { %v1454_v10 = vpop.f32.mrb[60].mxu0  ;;  %v1527_v11 = vpop.f32.mrb[60].mxu1 }
 0x530   :  { %v1456_v12 = vpop.f32.mrb[61].mxu0  ;;  %v1529_v13 = vpop.f32.mrb[61].mxu1 }
 0x531   :  { %v1458_v14 = vpop.f32.mrb[62].mxu0  ;;  %v1531_v15 = vpop.f32.mrb[62].mxu1 }
 0x532   :  { %v1539_v16 = vpack.c.bf16 %v1458_v14, %v1454_v10  ;;  %v1555_v17 = vpack.c.bf16 %v1531_v15, %v1527_v11  ;;  %v1460_v18 = vpop.f32.mrb[63].mxu0  ;;  %v1533_v19 = vpop.f32.mrb[63].mxu1 }
 0x533   :  { %v1547_v20 = vpack.c.bf16 %v1460_v18, %v1456_v12  ;;  %v1563_v21 = vpack.c.bf16 %v1533_v19, %v1529_v13 }
 0x534   :  { %3891 = vmatprep.subr.bf16.mxu0 %v1555_v17 }
 0x535   :  { %3892 = vmatpush3.bf16.msra.mxu0 %v1539_v16  ;;  %v1573_v16 = vld [vmem:[#allocation9 + $0xa0] sm:$0xff] }
 0x536   :  { %3893 = vmatprep.subr.bf16.mxu0 %v1560_v48  ;;  %v4402_v48 = vld [vmem:[#allocation6 + $0x3ec] ss:$16 sps:$4 sm:$0xff]  }
 0x539   :  { %3894 = vmatpush3.bf16.msra.mxu0 %v1544_v47  ;;  %v4399_v47 = vld [vmem:[#allocation6 + $0x3e4] ss:$16 sps:$4 sm:$0xff]  }
 0x53a   :  { %3895 = vmatprep.subr.bf16.mxu0 %v1561_v60  ;;  %1950 = vmatprep.subr.bf16.mxu1 %v4399_v47 }
 0x53b   :  { %1951 = vmatpush1.bf16.msra.mxu1 %v4397_v49  ;;  %v4415_v49 = vld [vmem:[#allocation6 + $0x400] ss:$16 sps:$4 sm:$0xff]  }
 0x53d   :  { %3896 = vmatpush3.bf16.msra.mxu0 %v1545_v59 }
 0x53e   :  { %3897 = vmatprep.subr.bf16.mxu0 %v1562_v9 }
 0x541   :  { %3898 = vmatpush3.bf16.msra.mxu0 %v1546_v8  ;;  %v1572_v8 = vld [vmem:[#allocation9 + $0x98] sm:$0xff] }
 0x542   :  { %3899 = vmatprep.subr.bf16.mxu0 %v1563_v21 }
 0x545   :  { %3900 = vmatpush3.bf16.msra.mxu0 %v1547_v20 }
 0x546   :  { %2009 = vmatprep.subr.bf16.mxu0 %v4360_v22  ;;  %v1574_v22 = vld [vmem:[#allocation9 + $0xa8] sm:$0xff] }
 0x548   :  { %1675 = vmatmul.mubr.bf16.vlgmr.msra.gmra.mrb[64].mxu0 %v4343_v23 }
 0x549   :  { %1682 = vmatprep.mubr.bf16.mxu0 %v4346_v24  ;;  %2010 = vmatpush1.bf16.msra.mxu0 %v4358_v25 }
 0x54a   :  { %2011 = vmatprep.subr.bf16.mxu0 %v4366_v26 }
 0x54d   :  { %2012 = vmatpush1.bf16.msra.mxu0 %v4364_v27 }
 0x54e   :  { %2013 = vmatprep.subr.bf16.mxu0 %v4372_v28 }
 0x550   :  { %1683 = vmatmul.mubr.bf16.gmra.mrb[68].mxu0 %v4348_v29 }
 0x551   :  { %1690 = vmatprep.mubr.bf16.mxu0 %v4349_v30  ;;  %2014 = vmatpush1.bf16.msra.mxu0 %v4370_v31  ;;  %v1575_v31 = vld [vmem:[#allocation9 + $0xb0] sm:$0xff] }
 0x552   :  { %2015 = vmatprep.subr.bf16.mxu0 %v4378_v32 }
 0x555   :  { %2016 = vmatpush1.bf16.msra.mxu0 %v4376_v33 }
 0x556   :  { %2017 = vmatprep.subr.bf16.mxu0 %v4384_v34 }
 0x558   :  { %1691 = vmatmul.mubr.bf16.gmra.mrb[72].mxu0 %v4351_v35 }
 0x559   :  { %1698 = vmatprep.mubr.bf16.mxu0 %v4352_v36  ;;  %2018 = vmatpush1.bf16.msra.mxu0 %v4382_v37  ;;  %v1576_v37 = vld [vmem:[#allocation9 + $0xb8] sm:$0xff] }
 0x55a   :  { %2019 = vmatprep.subr.bf16.mxu0 %v4390_v40 }
 0x55d   :  { %2020 = vmatpush1.bf16.msra.mxu0 %v4388_v42 }
 0x55e   :  { %2021 = vmatprep.subr.bf16.mxu0 %v4396_v44 }
 0x560   :  { %1699 = vmatmul.mubr.bf16.gmra.mrb[76].mxu0 %v4354_v38 }
 0x561   :  { %2041 = vmatprep.mubr.bf16.mxu0 %v4684_v0  ;;  %2022 = vmatpush1.bf16.msra.mxu0 %v4394_v46 }
 0x562   :  { %2023 = vmatprep.subr.bf16.mxu0 %v4402_v48  ;;  %v4405_v48 = vld [vmem:[#allocation8 + $0xc4] ss:$8 sps:$4 sm:$0xff]  }
 0x565   :  { %2024 = vmatpush1.bf16.msra.mxu0 %v4400_v50  ;;  %v4417_v50 = vld [vmem:[#allocation6 + $0x404] ss:$16 sps:$4 sm:$0xff]  }
 0x566   :  { %2482 = vmatprep.subr.bf16.mxu0 %v4417_v50  ;;  %v4432_v50 = vld [vmem:[#allocation6 + $0x44c] ss:$16 sps:$4 sm:$0xff]  }
 0x61b   :  { %v3901_v51 = vpop.f32.mrb[64].mxu0 }
 0x61c   :  { %v3902_v53 = vpop.f32.mrb[65].mxu0 }
 0x61d   :  { %v3903_v54 = vadd.f32 %v3902_v53, %v3901_v51  ;;  %v3904_v55 = vpop.f32.mrb[66].mxu0  ;;  %v4423_v51 = vld [vmem:[#allocation6 + $0x424] ss:$16 sps:$4 sm:$0xff]  }
 0x61e   :  { %v3905_v57 = vpop.f32.mrb[67].mxu0  ;;  %v4429_v53 = vld [vmem:[#allocation6 + $0x444] ss:$16 sps:$4 sm:$0xff]  }
 0x61f   :  { %v1707_v58 = vadd.f32 %v3903_v54, %v1569_v52  ;;  %v3906_v59 = vadd.f32 %v3905_v57, %v3904_v55  ;;  %v4421_v52 = vld [vmem:[#allocation6 + $0x420] ss:$16 sps:$4 sm:$0xff]   ;;  %v4435_v55 = vld [vmem:[#allocation6 + $0x464] ss:$16 sps:$4 sm:$0xff]  }
 0x620   :  { %v4427_v54 = vld [vmem:[#allocation6 + $0x440] ss:$16 sps:$4 sm:$0xff]   ;;  %v4441_v57 = vld [vmem:[#allocation6 + $0x484] ss:$16 sps:$4 sm:$0xff]  }
 0x621   :  { %v1723_v60 = vmul.f32 0.01, %v1707_v58  ;;  %v1708_v61 = vadd.f32 %v3906_v59, %v1570_v56  ;;  %vm1715_vm0 = vcmp.ge.f32.partialorder %v1707_v58, 0.0  ;;  %v4433_v56 = vld [vmem:[#allocation6 + $0x460] ss:$16 sps:$4 sm:$0xff]  }
 0x623   :  { %vm1716_vm1 = vcmp.ge.f32.partialorder %v1708_v61, 0.0  ;;  %v1724_v62 = vmul.f32 0.01, %v1708_v61  ;;  %v3907_v63 = vpop.f32.mrb[68].mxu0  ;;  %v1731_v3 = vsel %vm1715_vm0, %v1707_v58, %v1723_v60  ;;  %v4439_v58 = vld [vmem:[#allocation6 + $0x480] ss:$16 sps:$4 sm:$0xff]  }
 0x624   :  { %v3908_v2 = vpop.f32.mrb[69].mxu0 }
 0x625   :  { %v1732_v4 = vsel %vm1716_vm1, %v1708_v61, %v1724_v62  ;;  %v3909_v5 = vadd.f32 %v3908_v2, %v3907_v63  ;;  %v3910_v6 = vpop.f32.mrb[70].mxu0 }
 0x626   :  { %v1739_v7 = vpack.c.bf16 %v1732_v4, %v1731_v3  ;;  %v3911_v9 = vpop.f32.mrb[71].mxu0 }
 0x627   :  { %v1709_v10 = vadd.f32 %v3909_v5, %v1571_v1  ;;  %v3912_v11 = vadd.f32 %v3911_v9, %v3910_v6 }
 0x628   :  { %1969 = vmatmul.mubr.bf16.vlgmr.msra.gmra.mrb[64].mxu1 %v1739_v7  ;;  %2042 = vmatmul.mubr.bf16.vlgmr.msra.gmra.mrb[80].mxu0 %v1739_v7 }
 0x629   :  { %v1725_v12 = vmul.f32 0.01, %v1709_v10  ;;  %v1710_v13 = vadd.f32 %v3912_v11, %v1572_v8  ;;  %1978 = vmatprep.mubr.bf16.mxu1 %v4684_v0  ;;  %2051 = vmatprep.mubr.bf16.mxu0 %v4684_v0  ;;  %vm1717_vm2 = vcmp.ge.f32.partialorder %v1709_v10, 0.0 }
 0x62a   :  { %2483 = vmatpush1.bf16.msra.mxu0 %v4415_v49  ;;  %v4424_v49 = vld [vmem:[#allocation6 + $0x428] ss:$16 sps:$4 sm:$0xff]  }
 0x62b   :  { %vm1718_vm3 = vcmp.ge.f32.partialorder %v1710_v13, 0.0  ;;  %v1726_v14 = vmul.f32 0.01, %v1710_v13  ;;  %v3913_v15 = vpop.f32.mrb[72].mxu0  ;;  %v1733_v20 = vsel %vm1717_vm2, %v1709_v10, %v1725_v12  ;;  %2484 = vmatprep.subr.bf16.mxu0 %v4423_v51  ;;  %v4408_v51 = vld [vmem:[#allocation8 + $0xd0] ss:$8 sps:$4 sm:$0xff]  }
 0x62c   :  { %v3914_v17 = vpop.f32.mrb[73].mxu0 }
 0x62d   :  { %v3915_v18 = vadd.f32 %v3914_v17, %v3913_v15  ;;  %v3916_v19 = vpop.f32.mrb[74].mxu0  ;;  %v1734_v21 = vsel %vm1718_vm3, %v1710_v13, %v1726_v14 }
 0x62e   :  { %v3917_v23 = vpop.f32.mrb[75].mxu0  ;;  %v1740_v24 = vpack.c.bf16 %v1734_v21, %v1733_v20  ;;  %2485 = vmatpush1.bf16.msra.mxu0 %v4421_v52  ;;  %v4409_v52 = vld [vmem:[#allocation8 + $0xe4] ss:$8 sps:$4 sm:$0xff]  }
 0x62f   :  { %v1711_v25 = vadd.f32 %v3915_v18, %v1573_v16  ;;  %v3918_v26 = vadd.f32 %v3917_v23, %v3916_v19  ;;  %2486 = vmatprep.subr.bf16.mxu0 %v4429_v53  ;;  %v4430_v53 = vld [vmem:[#allocation6 + $0x448] ss:$16 sps:$4 sm:$0xff]  }
 0x630   :  { %1979 = vmatmul.mubr.bf16.gmra.mrb[68].mxu1 %v1740_v24  ;;  %2052 = vmatmul.mubr.bf16.gmra.mrb[84].mxu0 %v1740_v24 }
 0x631   :  { %v1727_v27 = vmul.f32 0.01, %v1711_v25  ;;  %v1712_v28 = vadd.f32 %v3918_v26, %v1574_v22  ;;  %1988 = vmatprep.mubr.bf16.mxu1 %v4684_v0  ;;  %2061 = vmatprep.mubr.bf16.mxu0 %v4684_v0  ;;  %vm1719_vm4 = vcmp.ge.f32.partialorder %v1711_v25, 0.0 }
 0x632   :  { %2487 = vmatpush1.bf16.msra.mxu0 %v4427_v54  ;;  %v4438_v54 = vld [vmem:[#allocation6 + $0x46c] ss:$16 sps:$4 sm:$0xff]  }
 0x633   :  { %vm1720_vm5 = vcmp.ge.f32.partialorder %v1712_v28, 0.0  ;;  %v1728_v29 = vmul.f32 0.01, %v1712_v28  ;;  %v3919_v30 = vpop.f32.mrb[76].mxu0  ;;  %v1735_v35 = vsel %vm1719_vm4, %v1711_v25, %v1727_v27  ;;  %2488 = vmatprep.subr.bf16.mxu0 %v4435_v55  ;;  %v4436_v55 = vld [vmem:[#allocation6 + $0x468] ss:$16 sps:$4 sm:$0xff]  }
 0x634   :  { %v3920_v32 = vpop.f32.mrb[77].mxu0 }
 0x635   :  { %v3921_v33 = vadd.f32 %v3920_v32, %v3919_v30  ;;  %v3922_v34 = vpop.f32.mrb[78].mxu0  ;;  %v1736_v36 = vsel %vm1720_vm5, %v1712_v28, %v1728_v29 }
 0x636   :  { %v3923_v38 = vpop.f32.mrb[79].mxu0  ;;  %v1741_v39 = vpack.c.bf16 %v1736_v36, %v1735_v35  ;;  %2489 = vmatpush1.bf16.msra.mxu0 %v4433_v56  ;;  %v4444_v56 = vld [vmem:[#allocation6 + $0x48c] ss:$16 sps:$4 sm:$0xff]  }
 0x637   :  { %v1713_v40 = vadd.f32 %v3921_v33, %v1575_v31  ;;  %v3924_v41 = vadd.f32 %v3923_v38, %v3922_v34  ;;  %2490 = vmatprep.subr.bf16.mxu0 %v4441_v57  ;;  %v4411_v57 = vld [vmem:[#allocation8 + $0xe0] ss:$8 sps:$4 sm:$0xff]  }
 0x638   :  { %1989 = vmatmul.mubr.bf16.gmra.mrb[72].mxu1 %v1741_v39  ;;  %2062 = vmatmul.mubr.bf16.gmra.mrb[88].mxu0 %v1741_v39 }
 0x639   :  { %v1729_v42 = vmul.f32 0.01, %v1713_v40  ;;  %v1714_v43 = vadd.f32 %v3924_v41, %v1576_v37  ;;  %1998 = vmatprep.mubr.bf16.mxu1 %v4684_v0  ;;  %2071 = vmatprep.mubr.bf16.mxu0 %v4684_v0  ;;  %vm1721_vm6 = vcmp.ge.f32.partialorder %v1713_v40, 0.0 }
 0x63a   :  { %2491 = vmatpush1.bf16.msra.mxu0 %v4439_v58  ;;  %v4412_v58 = vld [vmem:[#allocation8 + $0xf4] ss:$8 sps:$4 sm:$0xff]  }
 0x63b   :  { %vm1722_vm7 = vcmp.ge.f32.partialorder %v1714_v43, 0.0  ;;  %v1730_v44 = vmul.f32 0.01, %v1714_v43  ;;  %v1737_v45 = vsel %vm1721_vm6, %v1713_v40, %v1729_v42 }
 0x63d   :  { %v1738_v46 = vsel %vm1722_vm7, %v1714_v43, %v1730_v44  ;;  %v4420_v44 = vld [vmem:[#allocation6 + $0x40c] ss:$16 sps:$4 sm:$0xff]  }
 0x63e   :  { %v1742_v47 = vpack.c.bf16 %v1738_v46, %v1737_v45  ;;  %v4403_v45 = vld [vmem:[#allocation8 + $0xc0] ss:$8 sps:$4 sm:$0xff]   ;;  %v4406_v46 = vld [vmem:[#allocation8 + $0xd4] ss:$8 sps:$4 sm:$0xff]  }
 0x640   :  { %1999 = vmatmul.mubr.bf16.gmra.mrb[76].mxu1 %v1742_v47  ;;  %2072 = vmatmul.mubr.bf16.gmra.mrb[92].mxu0 %v1742_v47  ;;  %v4418_v47 = vld [vmem:[#allocation6 + $0x408] ss:$16 sps:$4 sm:$0xff]  }
 0x641   :  { %2514 = vmatprep.mubr.bf16.mxu0 %v4684_v0  ;;  %2220 = vmatprep.mubr.bf16.mxu1 %v4405_v48  ;;  %v4426_v48 = vld [vmem:[#allocation6 + $0x42c] ss:$16 sps:$4 sm:$0xff]  }
 0x6fb   :  { %v1970_v59 = vpop.f32.mrb[64].mxu1  ;;  %v2043_v60 = vpop.f32.mrb[80].mxu0 }
 0x6fc   :  { %v1972_v61 = vpop.f32.mrb[65].mxu1  ;;  %v2045_v62 = vpop.f32.mrb[81].mxu0 }
 0x6fd   :  { %v1974_v63 = vpop.f32.mrb[66].mxu1  ;;  %v2047_v1 = vpop.f32.mrb[82].mxu0 }
 0x6fe   :  { %v2082_v2 = vpack.c.bf16 %v1974_v63, %v1970_v59  ;;  %v2098_v3 = vpack.c.bf16 %v2047_v1, %v2043_v60  ;;  %v1976_v4 = vpop.f32.mrb[67].mxu1  ;;  %v2049_v5 = vpop.f32.mrb[83].mxu0  ;;  %v4442_v59 = vld [vmem:[#allocation6 + $0x488] ss:$16 sps:$4 sm:$0xff]   ;;  %v4445_v63 = vld [vmem:[#allocation6 + $0x4a0] ss:$16 sps:$4 sm:$0xff]  }
 0x6ff   :  { %v2090_v6 = vpack.c.bf16 %v1976_v4, %v1972_v61  ;;  %v2106_v7 = vpack.c.bf16 %v2049_v5, %v2045_v62  ;;  %v4414_v60 = vld [vmem:[#allocation8 + $0xf0] ss:$8 sps:$4 sm:$0xff]   ;;  %v4447_v61 = vld [vmem:[#allocation6 + $0x4a4] ss:$16 sps:$4 sm:$0xff]   ;;  %v4450_v62 = vld [vmem:[#allocation6 + $0x4ac] ss:$16 sps:$4 sm:$0xff]  }
 0x700   :  { %3925 = vmatprep.subr.bf16.mxu1 %v2098_v3  ;;  %v4448_v1 = vld [vmem:[#allocation6 + $0x4a8] ss:$16 sps:$4 sm:$0xff]   ;;  %2492 = vmatprep.subr.bf16.mxu0 %v4447_v61  ;;  %v4456_v3 = vld [vmem:[#allocation6 + $0x4cc] ss:$16 sps:$4 sm:$0xff]   ;;  %v4451_v4 = vld [vmem:[#allocation6 + $0x4c0] ss:$16 sps:$4 sm:$0xff]  }
 0x701   :  { %3926 = vmatpush3.bf16.msra.mxu1 %v2082_v2  ;;  %2493 = vmatpush1.bf16.msra.mxu0 %v4445_v63  ;;  %v4453_v2 = vld [vmem:[#allocation6 + $0x4c4] ss:$16 sps:$4 sm:$0xff]   ;;  %v4454_v5 = vld [vmem:[#allocation6 + $0x4c8] ss:$16 sps:$4 sm:$0xff]  }
 0x702   :  { %2494 = vmatprep.subr.bf16.mxu0 %v4453_v2 }
 0x703   :  { %v1980_v8 = vpop.f32.mrb[68].mxu1  ;;  %v2053_v9 = vpop.f32.mrb[84].mxu0 }
 0x704   :  { %v1982_v10 = vpop.f32.mrb[69].mxu1  ;;  %v2055_v11 = vpop.f32.mrb[85].mxu0 }
 0x705   :  { %v1984_v12 = vpop.f32.mrb[70].mxu1  ;;  %v2057_v13 = vpop.f32.mrb[86].mxu0  ;;  %2495 = vmatpush1.bf16.msra.mxu0 %v4451_v4 }
 0x706   :  { %v2083_v14 = vpack.c.bf16 %v1984_v12, %v1980_v8  ;;  %v2099_v15 = vpack.c.bf16 %v2057_v13, %v2053_v9  ;;  %v1986_v16 = vpop.f32.mrb[71].mxu1  ;;  %v2059_v17 = vpop.f32.mrb[87].mxu0  ;;  %v4457_v8 = vld [vmem:[#allocation6 + $0x4e0] ss:$16 sps:$4 sm:$0xff]   ;;  %v4460_v9 = vld [vmem:[#allocation6 + $0x4e8] ss:$16 sps:$4 sm:$0xff]  }
 0x707   :  { %v2091_v18 = vpack.c.bf16 %v1986_v16, %v1982_v10  ;;  %v2107_v19 = vpack.c.bf16 %v2059_v17, %v2055_v11  ;;  %v2115_v11 = vld [vmem:[#allocation9 + $0xc0] sm:$0xff] }
 0x708   :  { %3927 = vmatprep.subr.bf16.mxu1 %v2099_v15  ;;  %v2116_v15 = vld [vmem:[#allocation9 + $0xc8] sm:$0xff] }
 0x709   :  { %3928 = vmatpush3.bf16.msra.mxu1 %v2083_v14 }
 0x70b   :  { %v1990_v20 = vpop.f32.mrb[72].mxu1  ;;  %v2063_v21 = vpop.f32.mrb[88].mxu0 }
 0x70c   :  { %v1992_v22 = vpop.f32.mrb[73].mxu1  ;;  %v2065_v23 = vpop.f32.mrb[89].mxu0 }
 0x70d   :  { %v1994_v24 = vpop.f32.mrb[74].mxu1  ;;  %v2067_v25 = vpop.f32.mrb[90].mxu0 }
 0x70e   :  { %v2084_v26 = vpack.c.bf16 %v1994_v24, %v1990_v20  ;;  %v2100_v27 = vpack.c.bf16 %v2067_v25, %v2063_v21  ;;  %v1996_v28 = vpop.f32.mrb[75].mxu1  ;;  %v2069_v29 = vpop.f32.mrb[91].mxu0 }
 0x70f   :  { %v2092_v30 = vpack.c.bf16 %v1996_v28, %v1992_v22  ;;  %v2108_v31 = vpack.c.bf16 %v2069_v29, %v2065_v23  ;;  %v2117_v23 = vld [vmem:[#allocation9 + $0xd0] sm:$0xff] }
 0x710   :  { %3929 = vmatprep.subr.bf16.mxu1 %v2100_v27 }
 0x711   :  { %3930 = vmatpush3.bf16.msra.mxu1 %v2084_v26 }
 0x713   :  { %v2000_v32 = vpop.f32.mrb[76].mxu1  ;;  %v2073_v33 = vpop.f32.mrb[92].mxu0 }
 0x714   :  { %v2002_v34 = vpop.f32.mrb[77].mxu1  ;;  %v2075_v35 = vpop.f32.mrb[93].mxu0 }
 0x715   :  { %v2004_v36 = vpop.f32.mrb[78].mxu1  ;;  %v2077_v37 = vpop.f32.mrb[94].mxu0 }
 0x716   :  { %v2085_v38 = vpack.c.bf16 %v2004_v36, %v2000_v32  ;;  %v2101_v39 = vpack.c.bf16 %v2077_v37, %v2073_v33  ;;  %v2006_v40 = vpop.f32.mrb[79].mxu1  ;;  %v2079_v41 = vpop.f32.mrb[95].mxu0 }
 0x717   :  { %v2093_v42 = vpack.c.bf16 %v2006_v40, %v2002_v34  ;;  %v2109_v43 = vpack.c.bf16 %v2079_v41, %v2075_v35 }
 0x718   :  { %3931 = vmatprep.subr.bf16.mxu1 %v2101_v39 }
 0x719   :  { %3932 = vmatpush3.bf16.msra.mxu1 %v2085_v38  ;;  %v2119_v38 = vld [vmem:[#allocation9 + $0xe0] sm:$0xff] }
 0x71a   :  { %3933 = vmatprep.subr.bf16.mxu1 %v2106_v7  ;;  %v4462_v7 = vld [vmem:[#allocation6 + $0x4ec] ss:$16 sps:$4 sm:$0xff]  }
 0x71d   :  { %3934 = vmatpush3.bf16.msra.mxu1 %v2090_v6  ;;  %v4459_v6 = vld [vmem:[#allocation6 + $0x4e4] ss:$16 sps:$4 sm:$0xff]  }
 0x71e   :  { %3935 = vmatprep.subr.bf16.mxu1 %v2107_v19  ;;  %2496 = vmatprep.subr.bf16.mxu0 %v4459_v6 }
 0x71f   :  { %2497 = vmatpush1.bf16.msra.mxu0 %v4457_v8  ;;  %v4475_v8 = vld [vmem:[#allocation6 + $0x500] ss:$16 sps:$4 sm:$0xff]  }
 0x721   :  { %3936 = vmatpush3.bf16.msra.mxu1 %v2091_v18 }
 0x722   :  { %3937 = vmatprep.subr.bf16.mxu1 %v2108_v31 }
 0x725   :  { %3938 = vmatpush3.bf16.msra.mxu1 %v2092_v30  ;;  %v2118_v30 = vld [vmem:[#allocation9 + $0xd8] sm:$0xff] }
 0x726   :  { %3939 = vmatprep.subr.bf16.mxu1 %v2109_v43 }
 0x729   :  { %3940 = vmatpush3.bf16.msra.mxu1 %v2093_v42 }
 0x72a   :  { %2555 = vmatprep.subr.bf16.mxu1 %v4420_v44  ;;  %v2120_v44 = vld [vmem:[#allocation9 + $0xe8] sm:$0xff] }
 0x72c   :  { %2221 = vmatmul.mubr.bf16.vlgmr.msra.gmra.mrb[80].mxu1 %v4403_v45 }
 0x72d   :  { %2228 = vmatprep.mubr.bf16.mxu1 %v4406_v46  ;;  %2556 = vmatpush1.bf16.msra.mxu1 %v4418_v47 }
 0x72e   :  { %2557 = vmatprep.subr.bf16.mxu1 %v4426_v48 }
 0x731   :  { %2558 = vmatpush1.bf16.msra.mxu1 %v4424_v49 }
 0x732   :  { %2559 = vmatprep.subr.bf16.mxu1 %v4432_v50 }
 0x734   :  { %2229 = vmatmul.mubr.bf16.gmra.mrb[84].mxu1 %v4408_v51 }
 0x735   :  { %2236 = vmatprep.mubr.bf16.mxu1 %v4409_v52  ;;  %2560 = vmatpush1.bf16.msra.mxu1 %v4430_v53  ;;  %v2121_v53 = vld [vmem:[#allocation9 + $0xf0] sm:$0xff] }
 0x736   :  { %2561 = vmatprep.subr.bf16.mxu1 %v4438_v54 }
 0x739   :  { %2562 = vmatpush1.bf16.msra.mxu1 %v4436_v55 }
 0x73a   :  { %2563 = vmatprep.subr.bf16.mxu1 %v4444_v56 }
 0x73c   :  { %2237 = vmatmul.mubr.bf16.gmra.mrb[88].mxu1 %v4411_v57 }
 0x73d   :  { %2244 = vmatprep.mubr.bf16.mxu1 %v4412_v58  ;;  %2564 = vmatpush1.bf16.msra.mxu1 %v4442_v59  ;;  %v2122_v59 = vld [vmem:[#allocation9 + $0xf8] sm:$0xff] }
 0x73e   :  { %2565 = vmatprep.subr.bf16.mxu1 %v4450_v62 }
 0x741   :  { %2566 = vmatpush1.bf16.msra.mxu1 %v4448_v1 }
 0x742   :  { %2567 = vmatprep.subr.bf16.mxu1 %v4456_v3 }
 0x744   :  { %2245 = vmatmul.mubr.bf16.gmra.mrb[92].mxu1 %v4414_v60 }
 0x745   :  { %2587 = vmatprep.mubr.bf16.mxu1 %v4684_v0  ;;  %2568 = vmatpush1.bf16.msra.mxu1 %v4454_v5 }
 0x746   :  { %2569 = vmatprep.subr.bf16.mxu1 %v4462_v7  ;;  %v4465_v7 = vld [vmem:[#allocation8 + $0x104] ss:$8 sps:$4 sm:$0xff]  }
 0x749   :  { %2570 = vmatpush1.bf16.msra.mxu1 %v4460_v9  ;;  %v4477_v9 = vld [vmem:[#allocation6 + $0x504] ss:$16 sps:$4 sm:$0xff]  }
 0x74a   :  { %3028 = vmatprep.subr.bf16.mxu1 %v4477_v9  ;;  %v4492_v9 = vld [vmem:[#allocation6 + $0x54c] ss:$16 sps:$4 sm:$0xff]  }
 0x7ff   :  { %v3941_v10 = vpop.f32.mrb[80].mxu1 }
 0x800   :  { %v3942_v12 = vpop.f32.mrb[81].mxu1 }
 0x801   :  { %v3943_v13 = vadd.f32 %v3942_v12, %v3941_v10  ;;  %v3944_v14 = vpop.f32.mrb[82].mxu1  ;;  %v4483_v10 = vld [vmem:[#allocation6 + $0x524] ss:$16 sps:$4 sm:$0xff]  }
 0x802   :  { %v3945_v16 = vpop.f32.mrb[83].mxu1  ;;  %v4489_v12 = vld [vmem:[#allocation6 + $0x544] ss:$16 sps:$4 sm:$0xff]  }
 0x803   :  { %v2253_v17 = vadd.f32 %v3943_v13, %v2115_v11  ;;  %v3946_v18 = vadd.f32 %v3945_v16, %v3944_v14  ;;  %v4481_v11 = vld [vmem:[#allocation6 + $0x520] ss:$16 sps:$4 sm:$0xff]   ;;  %v4495_v14 = vld [vmem:[#allocation6 + $0x564] ss:$16 sps:$4 sm:$0xff]  }
 0x804   :  { %v4487_v13 = vld [vmem:[#allocation6 + $0x540] ss:$16 sps:$4 sm:$0xff]   ;;  %v4501_v16 = vld [vmem:[#allocation6 + $0x584] ss:$16 sps:$4 sm:$0xff]  }
 0x805   :  { %v2269_v19 = vmul.f32 0.01, %v2253_v17  ;;  %v2254_v20 = vadd.f32 %v3946_v18, %v2116_v15  ;;  %vm2261_vm8 = vcmp.ge.f32.partialorder %v2253_v17, 0.0  ;;  %v4493_v15 = vld [vmem:[#allocation6 + $0x560] ss:$16 sps:$4 sm:$0xff]  }
 0x807   :  { %vm2262_vm9 = vcmp.ge.f32.partialorder %v2254_v20, 0.0  ;;  %v2270_v21 = vmul.f32 0.01, %v2254_v20  ;;  %v3947_v22 = vpop.f32.mrb[84].mxu1  ;;  %v2277_v25 = vsel %vm2261_vm8, %v2253_v17, %v2269_v19  ;;  %v4499_v17 = vld [vmem:[#allocation6 + $0x580] ss:$16 sps:$4 sm:$0xff]  }
 0x808   :  { %v3948_v24 = vpop.f32.mrb[85].mxu1  ;;  %vm4686_vm8 = vmmov 0  }
 0x809   :  { %v2278_v26 = vsel %vm2262_vm9, %v2254_v20, %v2270_v21  ;;  %v3949_v27 = vadd.f32 %v3948_v24, %v3947_v22  ;;  %v3950_v28 = vpop.f32.mrb[86].mxu1 }
 0x80a   :  { %v2285_v29 = vpack.c.bf16 %v2278_v26, %v2277_v25  ;;  %v3951_v31 = vpop.f32.mrb[87].mxu1 }
 0x80b   :  { %v2255_v32 = vadd.f32 %v3949_v27, %v2117_v23  ;;  %v3952_v33 = vadd.f32 %v3951_v31, %v3950_v28 }
 0x80c   :  { %2515 = vmatmul.mubr.bf16.vlgmr.msra.gmra.mrb[96].mxu0 %v2285_v29  ;;  %2588 = vmatmul.mubr.bf16.vlgmr.msra.gmra.mrb[96].mxu1 %v2285_v29 }
 0x80d   :  { %v2271_v34 = vmul.f32 0.01, %v2255_v32  ;;  %v2256_v35 = vadd.f32 %v3952_v33, %v2118_v30  ;;  %2524 = vmatprep.mubr.bf16.mxu0 %v4684_v0  ;;  %2597 = vmatprep.mubr.bf16.mxu1 %v4684_v0  ;;  %vm2263_vm10 = vcmp.ge.f32.partialorder %v2255_v32, 0.0 }
 0x80e   :  { %3029 = vmatpush1.bf16.msra.mxu1 %v4475_v8  ;;  %v4484_v8 = vld [vmem:[#allocation6 + $0x528] ss:$16 sps:$4 sm:$0xff]  }
 0x80f   :  { %vm2264_vm11 = vcmp.ge.f32.partialorder %v2256_v35, 0.0  ;;  %v2272_v36 = vmul.f32 0.01, %v2256_v35  ;;  %v3953_v37 = vpop.f32.mrb[88].mxu1  ;;  %v2279_v42 = vsel %vm2263_vm10, %v2255_v32, %v2271_v34  ;;  %3030 = vmatprep.subr.bf16.mxu1 %v4483_v10  ;;  %v4468_v10 = vld [vmem:[#allocation8 + $0x110] ss:$8 sps:$4 sm:$0xff]  }
 0x810   :  { %v3954_v39 = vpop.f32.mrb[89].mxu1 }
 0x811   :  { %v3955_v40 = vadd.f32 %v3954_v39, %v3953_v37  ;;  %v3956_v41 = vpop.f32.mrb[90].mxu1  ;;  %v2280_v43 = vsel %vm2264_vm11, %v2256_v35, %v2272_v36 }
 0x812   :  { %v3957_v45 = vpop.f32.mrb[91].mxu1  ;;  %v2286_v46 = vpack.c.bf16 %v2280_v43, %v2279_v42  ;;  %3031 = vmatpush1.bf16.msra.mxu1 %v4481_v11  ;;  %v4469_v11 = vld [vmem:[#allocation8 + $0x124] ss:$8 sps:$4 sm:$0xff]  }
 0x813   :  { %v2257_v47 = vadd.f32 %v3955_v40, %v2119_v38  ;;  %v3958_v48 = vadd.f32 %v3957_v45, %v3956_v41  ;;  %3032 = vmatprep.subr.bf16.mxu1 %v4489_v12  ;;  %v4490_v12 = vld [vmem:[#allocation6 + $0x548] ss:$16 sps:$4 sm:$0xff]  }
 0x814   :  { %2525 = vmatmul.mubr.bf16.gmra.mrb[100].mxu0 %v2286_v46  ;;  %2598 = vmatmul.mubr.bf16.gmra.mrb[100].mxu1 %v2286_v46 }
 0x815   :  { %v2273_v49 = vmul.f32 0.01, %v2257_v47  ;;  %v2258_v50 = vadd.f32 %v3958_v48, %v2120_v44  ;;  %2534 = vmatprep.mubr.bf16.mxu0 %v4684_v0  ;;  %2607 = vmatprep.mubr.bf16.mxu1 %v4684_v0  ;;  %vm2265_vm12 = vcmp.ge.f32.partialorder %v2257_v47, 0.0 }
 0x816   :  { %3033 = vmatpush1.bf16.msra.mxu1 %v4487_v13  ;;  %v4498_v13 = vld [vmem:[#allocation6 + $0x56c] ss:$16 sps:$4 sm:$0xff]  }
 0x817   :  { %vm2266_vm13 = vcmp.ge.f32.partialorder %v2258_v50, 0.0  ;;  %v2274_v51 = vmul.f32 0.01, %v2258_v50  ;;  %v3959_v52 = vpop.f32.mrb[92].mxu1  ;;  %v2281_v57 = vsel %vm2265_vm12, %v2257_v47, %v2273_v49  ;;  %3034 = vmatprep.subr.bf16.mxu1 %v4495_v14  ;;  %v4496_v14 = vld [vmem:[#allocation6 + $0x568] ss:$16 sps:$4 sm:$0xff]  }
 0x818   :  { %v3960_v54 = vpop.f32.mrb[93].mxu1 }
 0x819   :  { %v3961_v55 = vadd.f32 %v3960_v54, %v3959_v52  ;;  %v3962_v56 = vpop.f32.mrb[94].mxu1  ;;  %v2282_v58 = vsel %vm2266_vm13, %v2258_v50, %v2274_v51 }
 0x81a   :  { %v3963_v60 = vpop.f32.mrb[95].mxu1  ;;  %v2287_v61 = vpack.c.bf16 %v2282_v58, %v2281_v57  ;;  %3035 = vmatpush1.bf16.msra.mxu1 %v4493_v15  ;;  %v4504_v15 = vld [vmem:[#allocation6 + $0x58c] ss:$16 sps:$4 sm:$0xff]  }
 0x81b   :  { %v2259_v62 = vadd.f32 %v3961_v55, %v2121_v53  ;;  %v3964_v63 = vadd.f32 %v3963_v60, %v3962_v56  ;;  %3036 = vmatprep.subr.bf16.mxu1 %v4501_v16  ;;  %v4471_v16 = vld [vmem:[#allocation8 + $0x120] ss:$8 sps:$4 sm:$0xff]  }
 0x81c   :  { %2535 = vmatmul.mubr.bf16.gmra.mrb[104].mxu0 %v2287_v61  ;;  %2608 = vmatmul.mubr.bf16.gmra.mrb[104].mxu1 %v2287_v61 }
 0x81d   :  { %v2275_v1 = vmul.f32 0.01, %v2259_v62  ;;  %v2260_v2 = vadd.f32 %v3964_v63, %v2122_v59  ;;  %2544 = vmatprep.mubr.bf16.mxu0 %v4684_v0  ;;  %2617 = vmatprep.mubr.bf16.mxu1 %v4684_v0  ;;  %vm2267_vm14 = vcmp.ge.f32.partialorder %v2259_v62, 0.0 }
 0x81e   :  { %3037 = vmatpush1.bf16.msra.mxu1 %v4499_v17  ;;  %v4472_v17 = vld [vmem:[#allocation8 + $0x134] ss:$8 sps:$4 sm:$0xff]  }
 0x81f   :  { %vm2268_vm15 = vcmp.ge.f32.partialorder %v2260_v2, 0.0  ;;  %v2276_v3 = vmul.f32 0.01, %v2260_v2  ;;  %v2283_v4 = vsel %vm2267_vm14, %v2259_v62, %v2275_v1 }
 0x821   :  { %v2284_v5 = vsel %vm2268_vm15, %v2260_v2, %v2276_v3  ;;  %v4480_v3 = vld [vmem:[#allocation6 + $0x50c] ss:$16 sps:$4 sm:$0xff]  }
 0x822   :  { %v2288_v6 = vpack.c.bf16 %v2284_v5, %v2283_v4  ;;  %v4463_v4 = vld [vmem:[#allocation8 + $0x100] ss:$8 sps:$4 sm:$0xff]   ;;  %v4466_v5 = vld [vmem:[#allocation8 + $0x114] ss:$8 sps:$4 sm:$0xff]  }
 0x824   :  { %2545 = vmatmul.mubr.bf16.gmra.mrb[108].mxu0 %v2288_v6  ;;  %2618 = vmatmul.mubr.bf16.gmra.mrb[108].mxu1 %v2288_v6  ;;  %v4478_v6 = vld [vmem:[#allocation6 + $0x508] ss:$16 sps:$4 sm:$0xff]  }
 0x825   :  { %3060 = vmatprep.mubr.bf16.mxu1 %v4684_v0  ;;  %2766 = vmatprep.mubr.bf16.mxu0 %v4465_v7  ;;  %v4486_v7 = vld [vmem:[#allocation6 + $0x52c] ss:$16 sps:$4 sm:$0xff]  }
 0x8df   :  { %v2516_v18 = vpop.f32.mrb[96].mxu0  ;;  %v2589_v19 = vpop.f32.mrb[96].mxu1 }
 0x8e0   :  { %v2518_v20 = vpop.f32.mrb[97].mxu0  ;;  %v2591_v21 = vpop.f32.mrb[97].mxu1 }
 0x8e1   :  { %v2520_v22 = vpop.f32.mrb[98].mxu0  ;;  %v2593_v23 = vpop.f32.mrb[98].mxu1 }
 0x8e2   :  { %v2628_v24 = vpack.c.bf16 %v2520_v22, %v2516_v18  ;;  %v2644_v25 = vpack.c.bf16 %v2593_v23, %v2589_v19  ;;  %v2522_v26 = vpop.f32.mrb[99].mxu0  ;;  %v2595_v27 = vpop.f32.mrb[99].mxu1  ;;  %v4502_v18 = vld [vmem:[#allocation6 + $0x588] ss:$16 sps:$4 sm:$0xff]   ;;  %v4505_v22 = vld [vmem:[#allocation6 + $0x5a0] ss:$16 sps:$4 sm:$0xff]  }
 0x8e3   :  { %v2636_v28 = vpack.c.bf16 %v2522_v26, %v2518_v20  ;;  %v2652_v29 = vpack.c.bf16 %v2595_v27, %v2591_v21  ;;  %v4474_v19 = vld [vmem:[#allocation8 + $0x130] ss:$8 sps:$4 sm:$0xff]   ;;  %v4507_v20 = vld [vmem:[#allocation6 + $0x5a4] ss:$16 sps:$4 sm:$0xff]   ;;  %v4510_v21 = vld [vmem:[#allocation6 + $0x5ac] ss:$16 sps:$4 sm:$0xff]  }
 0x8e4   :  { %3965 = vmatprep.subr.bf16.mxu0 %v2644_v25  ;;  %v4508_v23 = vld [vmem:[#allocation6 + $0x5a8] ss:$16 sps:$4 sm:$0xff]   ;;  %3038 = vmatprep.subr.bf16.mxu1 %v4507_v20  ;;  %v4516_v25 = vld [vmem:[#allocation6 + $0x5cc] ss:$16 sps:$4 sm:$0xff]   ;;  %v4511_v26 = vld [vmem:[#allocation6 + $0x5c0] ss:$16 sps:$4 sm:$0xff]  }
 0x8e5   :  { %3966 = vmatpush3.bf16.msra.mxu0 %v2628_v24  ;;  %3039 = vmatpush1.bf16.msra.mxu1 %v4505_v22  ;;  %v4513_v24 = vld [vmem:[#allocation6 + $0x5c4] ss:$16 sps:$4 sm:$0xff]   ;;  %v4514_v27 = vld [vmem:[#allocation6 + $0x5c8] ss:$16 sps:$4 sm:$0xff]  }
 0x8e6   :  { %3040 = vmatprep.subr.bf16.mxu1 %v4513_v24 }
 0x8e7   :  { %v2526_v30 = vpop.f32.mrb[100].mxu0  ;;  %v2599_v31 = vpop.f32.mrb[100].mxu1 }
 0x8e8   :  { %v2528_v32 = vpop.f32.mrb[101].mxu0  ;;  %v2601_v33 = vpop.f32.mrb[101].mxu1 }
 0x8e9   :  { %v2530_v34 = vpop.f32.mrb[102].mxu0  ;;  %v2603_v35 = vpop.f32.mrb[102].mxu1  ;;  %3041 = vmatpush1.bf16.msra.mxu1 %v4511_v26 }
 0x8ea   :  { %v2629_v36 = vpack.c.bf16 %v2530_v34, %v2526_v30  ;;  %v2645_v37 = vpack.c.bf16 %v2603_v35, %v2599_v31  ;;  %v2532_v38 = vpop.f32.mrb[103].mxu0  ;;  %v2605_v39 = vpop.f32.mrb[103].mxu1  ;;  %v4517_v30 = vld [vmem:[#allocation6 + $0x5e0] ss:$16 sps:$4 sm:$0xff]   ;;  %v4520_v31 = vld [vmem:[#allocation6 + $0x5e8] ss:$16 sps:$4 sm:$0xff]  }
 0x8eb   :  { %v2637_v40 = vpack.c.bf16 %v2532_v38, %v2528_v32  ;;  %v2653_v41 = vpack.c.bf16 %v2605_v39, %v2601_v33  ;;  %v2661_v33 = vld [vmem:[#allocation9 + $0x100] sm:$0xff] }
 0x8ec   :  { %3967 = vmatprep.subr.bf16.mxu0 %v2645_v37  ;;  %v2662_v37 = vld [vmem:[#allocation9 + $0x108] sm:$0xff] }
 0x8ed   :  { %3968 = vmatpush3.bf16.msra.mxu0 %v2629_v36 }
 0x8ef   :  { %v2536_v42 = vpop.f32.mrb[104].mxu0  ;;  %v2609_v43 = vpop.f32.mrb[104].mxu1 }
 0x8f0   :  { %v2538_v44 = vpop.f32.mrb[105].mxu0  ;;  %v2611_v45 = vpop.f32.mrb[105].mxu1 }
 0x8f1   :  { %v2540_v46 = vpop.f32.mrb[106].mxu0  ;;  %v2613_v47 = vpop.f32.mrb[106].mxu1 }
 0x8f2   :  { %v2630_v48 = vpack.c.bf16 %v2540_v46, %v2536_v42  ;;  %v2646_v49 = vpack.c.bf16 %v2613_v47, %v2609_v43  ;;  %v2542_v50 = vpop.f32.mrb[107].mxu0  ;;  %v2615_v51 = vpop.f32.mrb[107].mxu1 }
 0x8f3   :  { %v2638_v52 = vpack.c.bf16 %v2542_v50, %v2538_v44  ;;  %v2654_v53 = vpack.c.bf16 %v2615_v51, %v2611_v45  ;;  %v2663_v45 = vld [vmem:[#allocation9 + $0x110] sm:$0xff] }
 0x8f4   :  { %3969 = vmatprep.subr.bf16.mxu0 %v2646_v49 }
 0x8f5   :  { %3970 = vmatpush3.bf16.msra.mxu0 %v2630_v48 }
 0x8f7   :  { %v2546_v54 = vpop.f32.mrb[108].mxu0  ;;  %v2619_v55 = vpop.f32.mrb[108].mxu1 }
 0x8f8   :  { %v2548_v56 = vpop.f32.mrb[109].mxu0  ;;  %v2621_v57 = vpop.f32.mrb[109].mxu1 }
 0x8f9   :  { %v2550_v58 = vpop.f32.mrb[110].mxu0  ;;  %v2623_v59 = vpop.f32.mrb[110].mxu1 }
 0x8fa   :  { %v2631_v60 = vpack.c.bf16 %v2550_v58, %v2546_v54  ;;  %v2647_v61 = vpack.c.bf16 %v2623_v59, %v2619_v55  ;;  %v2552_v62 = vpop.f32.mrb[111].mxu0  ;;  %v2625_v63 = vpop.f32.mrb[111].mxu1 }
 0x8fb   :  { %v2639_v1 = vpack.c.bf16 %v2552_v62, %v2548_v56  ;;  %v2655_v2 = vpack.c.bf16 %v2625_v63, %v2621_v57 }
 0x8fc   :  { %3971 = vmatprep.subr.bf16.mxu0 %v2647_v61 }
 0x8fd   :  { %3972 = vmatpush3.bf16.msra.mxu0 %v2631_v60  ;;  %v2665_v60 = vld [vmem:[#allocation9 + $0x120] sm:$0xff] }
 0x8fe   :  { %3973 = vmatprep.subr.bf16.mxu0 %v2652_v29  ;;  %v4522_v29 = vld [vmem:[#allocation6 + $0x5ec] ss:$16 sps:$4 sm:$0xff]  }
 0x901   :  { %3974 = vmatpush3.bf16.msra.mxu0 %v2636_v28  ;;  %v4519_v28 = vld [vmem:[#allocation6 + $0x5e4] ss:$16 sps:$4 sm:$0xff]  }
 0x902   :  { %3975 = vmatprep.subr.bf16.mxu0 %v2653_v41  ;;  %3042 = vmatprep.subr.bf16.mxu1 %v4519_v28 }
 0x903   :  { %3043 = vmatpush1.bf16.msra.mxu1 %v4517_v30 }
 0x905   :  { %3976 = vmatpush3.bf16.msra.mxu0 %v2637_v40 }
 0x906   :  { %3977 = vmatprep.subr.bf16.mxu0 %v2654_v53 }
 0x909   :  { %3978 = vmatpush3.bf16.msra.mxu0 %v2638_v52  ;;  %v2664_v52 = vld [vmem:[#allocation9 + $0x118] sm:$0xff] }
 0x90a   :  { %3979 = vmatprep.subr.bf16.mxu0 %v2655_v2 }
 0x90d   :  { %3980 = vmatpush3.bf16.msra.mxu0 %v2639_v1 }
 0x90e   :  { %3101 = vmatprep.subr.bf16.mxu0 %v4480_v3  ;;  %v2666_v3 = vld [vmem:[#allocation9 + $0x128] sm:$0xff] }
 0x910   :  { %2767 = vmatmul.mubr.bf16.vlgmr.msra.gmra.mrb[112].mxu0 %v4463_v4 }
 0x911   :  { %2774 = vmatprep.mubr.bf16.mxu0 %v4466_v5  ;;  %3102 = vmatpush1.bf16.msra.mxu0 %v4478_v6 }
 0x912   :  { %3103 = vmatprep.subr.bf16.mxu0 %v4486_v7 }
 0x915   :  { %3104 = vmatpush1.bf16.msra.mxu0 %v4484_v8 }
 0x916   :  { %3105 = vmatprep.subr.bf16.mxu0 %v4492_v9 }
 0x918   :  { %2775 = vmatmul.mubr.bf16.gmra.mrb[116].mxu0 %v4468_v10 }
 0x919   :  { %2782 = vmatprep.mubr.bf16.mxu0 %v4469_v11  ;;  %3106 = vmatpush1.bf16.msra.mxu0 %v4490_v12  ;;  %v2667_v12 = vld [vmem:[#allocation9 + $0x130] sm:$0xff] }
 0x91a   :  { %3107 = vmatprep.subr.bf16.mxu0 %v4498_v13 }
 0x91d   :  { %3108 = vmatpush1.bf16.msra.mxu0 %v4496_v14 }
 0x91e   :  { %3109 = vmatprep.subr.bf16.mxu0 %v4504_v15 }
 0x920   :  { %2783 = vmatmul.mubr.bf16.gmra.mrb[120].mxu0 %v4471_v16 }
 0x921   :  { %2790 = vmatprep.mubr.bf16.mxu0 %v4472_v17  ;;  %3110 = vmatpush1.bf16.msra.mxu0 %v4502_v18  ;;  %v2668_v18 = vld [vmem:[#allocation9 + $0x138] sm:$0xff] }
 0x922   :  { %3111 = vmatprep.subr.bf16.mxu0 %v4510_v21 }
 0x925   :  { %3112 = vmatpush1.bf16.msra.mxu0 %v4508_v23 }
 0x926   :  { %3113 = vmatprep.subr.bf16.mxu0 %v4516_v25 }
 0x928   :  { %2791 = vmatmul.mubr.bf16.gmra.mrb[124].mxu0 %v4474_v19 }
 0x929   :  { %3133 = vmatprep.mubr.bf16.mxu0 %v4684_v0  ;;  %3114 = vmatpush1.bf16.msra.mxu0 %v4514_v27 }
 0x92a   :  { %3115 = vmatprep.subr.bf16.mxu0 %v4522_v29  ;;  %v4525_v29 = vld [vmem:[#allocation8 + $0x144] ss:$8 sps:$4 sm:$0xff]  }
 0x92d   :  { %3116 = vmatpush1.bf16.msra.mxu0 %v4520_v31 }
 0x9e3   :  { %v3981_v32 = vpop.f32.mrb[112].mxu0 }
 0x9e4   :  { %v3982_v34 = vpop.f32.mrb[113].mxu0 }
 0x9e5   :  { %v3983_v35 = vadd.f32 %v3982_v34, %v3981_v32  ;;  %v3984_v36 = vpop.f32.mrb[114].mxu0 }
 0x9e6   :  { %v3985_v38 = vpop.f32.mrb[115].mxu0 }
 0x9e7   :  { %v2799_v39 = vadd.f32 %v3983_v35, %v2661_v33  ;;  %v3986_v40 = vadd.f32 %v3985_v38, %v3984_v36 }
 0x9e9   :  { %v2815_v41 = vmul.f32 0.01, %v2799_v39  ;;  %v2800_v42 = vadd.f32 %v3986_v40, %v2662_v37  ;;  %vm2807_vm0 = vcmp.ge.f32.partialorder %v2799_v39, 0.0 }
 0x9eb   :  { %vm2808_vm1 = vcmp.ge.f32.partialorder %v2800_v42, 0.0  ;;  %v2816_v43 = vmul.f32 0.01, %v2800_v42  ;;  %v3987_v44 = vpop.f32.mrb[116].mxu0  ;;  %v2823_v47 = vsel %vm2807_vm0, %v2799_v39, %v2815_v41 }
 0x9ec   :  { %v3988_v46 = vpop.f32.mrb[117].mxu0 }
 0x9ed   :  { %v2824_v48 = vsel %vm2808_vm1, %v2800_v42, %v2816_v43  ;;  %v3989_v49 = vadd.f32 %v3988_v46, %v3987_v44  ;;  %v3990_v50 = vpop.f32.mrb[118].mxu0  ;;  %vm3378_vm1 = vcmask 523264  }
 0x9ee   :  { %v2831_v51 = vpack.c.bf16 %v2824_v48, %v2823_v47  ;;  %v3991_v53 = vpop.f32.mrb[119].mxu0 }
 0x9ef   :  { %v2801_v54 = vadd.f32 %v3989_v49, %v2663_v45  ;;  %v3992_v55 = vadd.f32 %v3991_v53, %v3990_v50 }
 0x9f0   :  { %3061 = vmatmul.mubr.bf16.vlgmr.msra.gmra.mrb[112].mxu1 %v2831_v51  ;;  %3134 = vmatmul.mubr.bf16.vlgmr.msra.gmra.mrb[128].mxu0 %v2831_v51 }
 0x9f1   :  { %v2817_v56 = vmul.f32 0.01, %v2801_v54  ;;  %v2802_v57 = vadd.f32 %v3992_v55, %v2664_v52  ;;  %3070 = vmatprep.mubr.bf16.mxu1 %v4684_v0  ;;  %3143 = vmatprep.mubr.bf16.mxu0 %v4684_v0  ;;  %vm2809_vm2 = vcmp.ge.f32.partialorder %v2801_v54, 0.0 }
 0x9f3   :  { %vm2810_vm3 = vcmp.ge.f32.partialorder %v2802_v57, 0.0  ;;  %v2818_v58 = vmul.f32 0.01, %v2802_v57  ;;  %v3993_v59 = vpop.f32.mrb[120].mxu0  ;;  %v2825_v1 = vsel %vm2809_vm2, %v2801_v54, %v2817_v56 }
 0x9f4   :  { %v3994_v61 = vpop.f32.mrb[121].mxu0 }
 0x9f5   :  { %v3995_v62 = vadd.f32 %v3994_v61, %v3993_v59  ;;  %v3996_v63 = vpop.f32.mrb[122].mxu0  ;;  %v2826_v2 = vsel %vm2810_vm3, %v2802_v57, %v2818_v58 }
 0x9f6   :  { %v3997_v4 = vpop.f32.mrb[123].mxu0  ;;  %v2832_v5 = vpack.c.bf16 %v2826_v2, %v2825_v1 }
 0x9f7   :  { %v2803_v6 = vadd.f32 %v3995_v62, %v2665_v60  ;;  %v3998_v7 = vadd.f32 %v3997_v4, %v3996_v63 }
 0x9f8   :  { %3071 = vmatmul.mubr.bf16.gmra.mrb[116].mxu1 %v2832_v5  ;;  %3144 = vmatmul.mubr.bf16.gmra.mrb[132].mxu0 %v2832_v5 }
 0x9f9   :  { %v2819_v8 = vmul.f32 0.01, %v2803_v6  ;;  %v2804_v9 = vadd.f32 %v3998_v7, %v2666_v3  ;;  %3080 = vmatprep.mubr.bf16.mxu1 %v4684_v0  ;;  %3153 = vmatprep.mubr.bf16.mxu0 %v4684_v0  ;;  %vm2811_vm4 = vcmp.ge.f32.partialorder %v2803_v6, 0.0 }
 0x9fb   :  { %vm2812_vm5 = vcmp.ge.f32.partialorder %v2804_v9, 0.0  ;;  %v2820_v10 = vmul.f32 0.01, %v2804_v9  ;;  %v3999_v11 = vpop.f32.mrb[124].mxu0  ;;  %v2827_v16 = vsel %vm2811_vm4, %v2803_v6, %v2819_v8 }
 0x9fc   :  { %v4000_v13 = vpop.f32.mrb[125].mxu0 }
 0x9fd   :  { %v4001_v14 = vadd.f32 %v4000_v13, %v3999_v11  ;;  %v4002_v15 = vpop.f32.mrb[126].mxu0  ;;  %v2828_v17 = vsel %vm2812_vm5, %v2804_v9, %v2820_v10 }
 0x9fe   :  { %v4003_v19 = vpop.f32.mrb[127].mxu0  ;;  %v2833_v20 = vpack.c.bf16 %v2828_v17, %v2827_v16  ;;  %v4528_v16 = vld [vmem:[#allocation8 + $0x150] ss:$8 sps:$4 sm:$0xff]   ;;  %v4529_v17 = vld [vmem:[#allocation8 + $0x164] ss:$8 sps:$4 sm:$0xff]  }
 0x9ff   :  { %v2805_v21 = vadd.f32 %v4001_v14, %v2667_v12  ;;  %v4004_v22 = vadd.f32 %v4003_v19, %v4002_v15  ;;  %v4523_v14 = vld [vmem:[#allocation8 + $0x140] ss:$8 sps:$4 sm:$0xff]   ;;  %v4526_v15 = vld [vmem:[#allocation8 + $0x154] ss:$8 sps:$4 sm:$0xff]  }
 0xa00   :  { %3081 = vmatmul.mubr.bf16.gmra.mrb[120].mxu1 %v2833_v20  ;;  %3154 = vmatmul.mubr.bf16.gmra.mrb[136].mxu0 %v2833_v20  ;;  %v4532_v19 = vld [vmem:[#allocation8 + $0x174] ss:$8 sps:$4 sm:$0xff]   ;;  %v4534_v20 = vld [vmem:[#allocation8 + $0x170] ss:$8 sps:$4 sm:$0xff]  }
 0xa01   :  { %v2821_v23 = vmul.f32 0.01, %v2805_v21  ;;  %v2806_v24 = vadd.f32 %v4004_v22, %v2668_v18  ;;  %3090 = vmatprep.mubr.bf16.mxu1 %v4684_v0  ;;  %3163 = vmatprep.mubr.bf16.mxu0 %v4684_v0  ;;  %vm2813_vm6 = vcmp.ge.f32.partialorder %v2805_v21, 0.0  ;;  %v4531_v18 = vld [vmem:[#allocation8 + $0x160] ss:$8 sps:$4 sm:$0xff]   ;;  %v4687_v22 = vmov 0.0  }
 0xa03   :  { %vm2814_vm7 = vcmp.ge.f32.partialorder %v2806_v24, 0.0  ;;  %v2822_v25 = vmul.f32 0.01, %v2806_v24  ;;  %v2829_v26 = vsel %vm2813_vm6, %v2805_v21, %v2821_v23  ;;  %v4685_v21 = vmov 0.0|0.0   ;;  %v3452_v23 = vld [vmem:[#allocation11] sm:$0xff] }
 0xa04   :  { %4125 = vmatprep.subr.bf16.mxu0 %v4685_v21 }
 0xa05   :  { %v2830_v27 = vsel %vm2814_vm7, %v2806_v24, %v2822_v25  ;;  %v3453_v24 = vld [vmem:[#allocation11 + $0x8] sm:$0xff]  ;;  %v3454_v25 = vld [vmem:[#allocation11 + $0x10] sm:$0xff] }
 0xa06   :  { %v2834_v28 = vpack.c.bf16 %v2830_v27, %v2829_v26  ;;  %v4138_v26 = vpack.c.bf16 %v3453_v24, %v3452_v23  ;;  %v3455_v27 = vld [vmem:[#allocation11 + $0x18] sm:$0xff] }
 0xa08   :  { %3091 = vmatmul.mubr.bf16.gmra.mrb[124].mxu1 %v2834_v28  ;;  %3164 = vmatmul.mubr.bf16.gmra.mrb[140].mxu0 %v2834_v28  ;;  %v4141_v28 = vpack.c.bf16 %v3455_v27, %v3454_v25  ;;  %v3213_v27 = vld [vmem:[#allocation9 + $0x170] sm:$0xff] }
 0xa09   :  { %3312 = vmatprep.mubr.bf16.mxu1 %v4525_v29  ;;  %4087 = vmatprep.mubr.msk.f32.mxu0 %vm4686_vm8, %v4687_v22  ;;  %v3456_v29 = vld [vmem:[#allocation11 + $0x20] sm:$0xff] }
 0xac3   :  { %v3062_v30 = vpop.f32.mrb[112].mxu1  ;;  %v3135_v31 = vpop.f32.mrb[128].mxu0 }
 0xac4   :  { %v3064_v32 = vpop.f32.mrb[113].mxu1  ;;  %v3137_v33 = vpop.f32.mrb[129].mxu0 }
 0xac5   :  { %v3066_v34 = vpop.f32.mrb[114].mxu1  ;;  %v3139_v35 = vpop.f32.mrb[130].mxu0 }
 0xac6   :  { %v3174_v36 = vpack.c.bf16 %v3066_v34, %v3062_v30  ;;  %v3190_v37 = vpack.c.bf16 %v3139_v35, %v3135_v31  ;;  %v3068_v38 = vpop.f32.mrb[115].mxu1  ;;  %v3141_v0 = vpop.f32.mrb[131].mxu0  ;;  %v3457_v30 = vld [vmem:[#allocation11 + $0x28] sm:$0xff]  ;;  %v3460_v35 = vld [vmem:[#allocation11 + $0x40] sm:$0xff] }
 0xac7   :  { %v3182_v39 = vpack.c.bf16 %v3068_v38, %v3064_v32  ;;  %v3198_v40 = vpack.c.bf16 %v3141_v0, %v3137_v33  ;;  %v4144_v31 = vpack.c.bf16 %v3457_v30, %v3456_v29  ;;  %v3458_v32 = vld [vmem:[#allocation11 + $0x30] sm:$0xff]  ;;  %v3459_v33 = vld [vmem:[#allocation11 + $0x38] sm:$0xff] }
 0xac8   :  { %4005 = vmatprep.subr.bf16.mxu1 %v3190_v37  ;;  %v4147_v34 = vpack.c.bf16 %v3459_v33, %v3458_v32  ;;  %v3462_v38 = vld [vmem:[#allocation11 + $0x50] sm:$0xff]  ;;  %v3463_v0 = vld [vmem:[#allocation11 + $0x58] sm:$0xff] }
 0xac9   :  { %4006 = vmatpush3.bf16.msra.mxu1 %v3174_v36  ;;  %v3461_v36 = vld [vmem:[#allocation11 + $0x48] sm:$0xff]  ;;  %v3214_v33 = vld [vmem:[#allocation9 + $0x178] sm:$0xff] }
 0xaca   :  { %v4150_v37 = vpack.c.bf16 %v3461_v36, %v3460_v35 }
 0xacb   :  { %v3072_v41 = vpop.f32.mrb[116].mxu1  ;;  %v3145_v42 = vpop.f32.mrb[132].mxu0 }
 0xacc   :  { %v3074_v43 = vpop.f32.mrb[117].mxu1  ;;  %v3147_v44 = vpop.f32.mrb[133].mxu0 }
 0xacd   :  { %v3076_v45 = vpop.f32.mrb[118].mxu1  ;;  %v3149_v46 = vpop.f32.mrb[134].mxu0 }
 0xace   :  { %v3175_v47 = vpack.c.bf16 %v3076_v45, %v3072_v41  ;;  %v3191_v48 = vpack.c.bf16 %v3149_v46, %v3145_v42  ;;  %v3078_v49 = vpop.f32.mrb[119].mxu1  ;;  %v3151_v50 = vpop.f32.mrb[135].mxu0  ;;  %v3465_v41 = vld [vmem:[#allocation11 + $0x68] sm:$0xff] }
 0xacf   :  { %v3183_v51 = vpack.c.bf16 %v3078_v49, %v3074_v43  ;;  %v3199_v52 = vpack.c.bf16 %v3151_v50, %v3147_v44  ;;  %v3466_v43 = vld [vmem:[#allocation11 + $0x70] sm:$0xff]  ;;  %v3467_v44 = vld [vmem:[#allocation11 + $0x78] sm:$0xff] }
 0xad0   :  { %4007 = vmatprep.subr.bf16.mxu1 %v3191_v48  ;;  %v4159_v45 = vpack.c.bf16 %v3467_v44, %v3466_v43  ;;  %v3377_v43 = vld [vmem:[%s4883_s4] sm:$0xff] }
 0xad1   :  { %4008 = vmatpush3.bf16.msra.mxu1 %v3175_v47  ;;  %v3207_v47 = vld [vmem:[#allocation9 + $0x140] sm:$0xff] }
 0xad3   :  { %v3082_v53 = vpop.f32.mrb[120].mxu1  ;;  %v3155_v54 = vpop.f32.mrb[136].mxu0 }
 0xad4   :  { %v3084_v55 = vpop.f32.mrb[121].mxu1  ;;  %v3157_v56 = vpop.f32.mrb[137].mxu0 }
 0xad5   :  { %v3086_v57 = vpop.f32.mrb[122].mxu1  ;;  %v3159_v58 = vpop.f32.mrb[138].mxu0 }
 0xad6   :  { %v3176_v59 = vpack.c.bf16 %v3086_v57, %v3082_v53  ;;  %v3192_v60 = vpack.c.bf16 %v3159_v58, %v3155_v54  ;;  %v3088_v61 = vpop.f32.mrb[123].mxu1  ;;  %v3161_v62 = vpop.f32.mrb[139].mxu0 }
 0xad7   :  { %v3184_v63 = vpack.c.bf16 %v3088_v61, %v3084_v55  ;;  %v3200_v1 = vpack.c.bf16 %v3161_v62, %v3157_v56 }
 0xad8   :  { %4009 = vmatprep.subr.bf16.mxu1 %v3192_v60 }
 0xad9   :  { %4010 = vmatpush3.bf16.msra.mxu1 %v3176_v59  ;;  %v3209_v59 = vld [vmem:[#allocation9 + $0x150] sm:$0xff] }
 0xadb   :  { %v3092_v2 = vpop.f32.mrb[124].mxu1  ;;  %v3165_v3 = vpop.f32.mrb[140].mxu0 }
 0xadc   :  { %v3094_v4 = vpop.f32.mrb[125].mxu1  ;;  %v3167_v5 = vpop.f32.mrb[141].mxu0 }
 0xadd   :  { %v3096_v6 = vpop.f32.mrb[126].mxu1  ;;  %v3169_v7 = vpop.f32.mrb[142].mxu0 }
 0xade   :  { %v3177_v8 = vpack.c.bf16 %v3096_v6, %v3092_v2  ;;  %v3193_v9 = vpack.c.bf16 %v3169_v7, %v3165_v3  ;;  %v3098_v10 = vpop.f32.mrb[127].mxu1  ;;  %v3171_v11 = vpop.f32.mrb[143].mxu0  ;;  %v3210_v2 = vld [vmem:[#allocation9 + $0x158] sm:$0xff] }
 0xadf   :  { %v3185_v12 = vpack.c.bf16 %v3098_v10, %v3094_v4  ;;  %v3201_v13 = vpack.c.bf16 %v3171_v11, %v3167_v5  ;;  %v3211_v11 = vld [vmem:[#allocation9 + $0x160] sm:$0xff] }
 0xae0   :  { %4011 = vmatprep.subr.bf16.mxu1 %v3193_v9 }
 0xae1   :  { %4012 = vmatpush3.bf16.msra.mxu1 %v3177_v8 }
 0xae2   :  { %4013 = vmatprep.subr.bf16.mxu1 %v3198_v40  ;;  %v3464_v40 = vld [vmem:[#allocation11 + $0x60] sm:$0xff] }
 0xae3   :  { %v4156_v42 = vpack.c.bf16 %v3465_v41, %v3464_v40 }
 0xae5   :  { %4014 = vmatpush3.bf16.msra.mxu1 %v3182_v39  ;;  %v4153_v39 = vpack.c.bf16 %v3463_v0, %v3462_v38 }
 0xae6   :  { %4015 = vmatprep.subr.bf16.mxu1 %v3199_v52 }
 0xae9   :  { %4016 = vmatpush3.bf16.msra.mxu1 %v3183_v51  ;;  %v3208_v51 = vld [vmem:[#allocation9 + $0x148] sm:$0xff] }
 0xaea   :  { %4017 = vmatprep.subr.bf16.mxu1 %v3200_v1 }
 0xaed   :  { %4018 = vmatpush3.bf16.msra.mxu1 %v3184_v63 }
 0xaee   :  { %4019 = vmatprep.subr.bf16.mxu1 %v3201_v13 }
 0xaf1   :  { %4020 = vmatpush3.bf16.msra.mxu1 %v3185_v12 }
 0xaf2   :  { %4137 = vmatprep.subr.bf16.mxu1 %v4685_v21 }
 0xaf4   :  { %3313 = vmatmul.mubr.bf16.vlgmr.msra.gmra.mrb[128].mxu1 %v4523_v14 }
 0xaf5   :  { %3320 = vmatprep.mubr.bf16.mxu1 %v4526_v15  ;;  %4139 = vmatpush3.bf16.msra.mxu1 %v4138_v26 }
 0xaf6   :  { %4140 = vmatprep.subr.bf16.mxu1 %v4685_v21 }
 0xaf9   :  { %4142 = vmatpush3.bf16.msra.mxu1 %v4141_v28 }
 0xafa   :  { %4143 = vmatprep.subr.bf16.mxu1 %v4685_v21 }
 0xafc   :  { %3321 = vmatmul.mubr.bf16.gmra.mrb[132].mxu1 %v4528_v16 }
 0xafd   :  { %3328 = vmatprep.mubr.bf16.mxu1 %v4529_v17  ;;  %4145 = vmatpush3.bf16.msra.mxu1 %v4144_v31  ;;  %v3212_v17 = vld [vmem:[#allocation9 + $0x168] sm:$0xff] }
 0xafe   :  { %4146 = vmatprep.subr.bf16.mxu1 %v4685_v21 }
 0xb01   :  { %4148 = vmatpush3.bf16.msra.mxu1 %v4147_v34 }
 0xb02   :  { %4149 = vmatprep.subr.bf16.mxu1 %v4685_v21 }
 0xb04   :  { %3329 = vmatmul.mubr.bf16.gmra.mrb[136].mxu1 %v4531_v18 }
 0xb05   :  { %3336 = vmatprep.mubr.bf16.mxu1 %v4532_v19  ;;  %4151 = vmatpush3.bf16.msra.mxu1 %v4150_v37 }
 0xb06   :  { %4152 = vmatprep.subr.bf16.mxu1 %v4685_v21 }
 0xb09   :  { %4154 = vmatpush3.bf16.msra.mxu1 %v4153_v39 }
 0xb0a   :  { %4155 = vmatprep.subr.bf16.mxu1 %v4685_v21 }
 0xb0c   :  { %3337 = vmatmul.mubr.bf16.gmra.mrb[140].mxu1 %v4534_v20 }
 0xb0d   :  { %4122 = vmatprep.mubr.msk.f32.mxu1 %vm4686_vm8, %v4687_v22  ;;  %4157 = vmatpush3.bf16.msra.mxu1 %v4156_v42 }
 0xb0e   :  { %4158 = vmatprep.subr.bf16.mxu1 %v4685_v21 }
 0xb11   :  { %4160 = vmatpush3.bf16.msra.mxu1 %v4159_v45 }
 0xbc7   :  { %v4021_v46 = vpop.f32.mrb[128].mxu1 }
 0xbc8   :  { %v4022_v48 = vpop.f32.mrb[129].mxu1 }
 0xbc9   :  { %v4023_v49 = vadd.f32 %v4022_v48, %v4021_v46  ;;  %v4024_v50 = vpop.f32.mrb[130].mxu1 }
 0xbca   :  { %v4025_v52 = vpop.f32.mrb[131].mxu1 }
 0xbcb   :  { %v3345_v53 = vadd.f32 %v4023_v49, %v3207_v47  ;;  %v4026_v54 = vadd.f32 %v4025_v52, %v4024_v50 }
 0xbcd   :  { %v3361_v55 = vmul.f32 0.01, %v3345_v53  ;;  %v3346_v56 = vadd.f32 %v4026_v54, %v3208_v51  ;;  %vm3353_vm9 = vcmp.ge.f32.partialorder %v3345_v53, 0.0 }
 0xbcf   :  { %vm3354_vm10 = vcmp.ge.f32.partialorder %v3346_v56, 0.0  ;;  %v3362_v57 = vmul.f32 0.01, %v3346_v56  ;;  %v4027_v58 = vpop.f32.mrb[132].mxu1  ;;  %v3369_v61 = vsel %vm3353_vm9, %v3345_v53, %v3361_v55 }
 0xbd0   :  { %v4028_v60 = vpop.f32.mrb[133].mxu1 }
 0xbd1   :  { %v3370_v62 = vsel %vm3354_vm10, %v3346_v56, %v3362_v57  ;;  %v4029_v63 = vadd.f32 %v4028_v60, %v4027_v58  ;;  %v4030_v1 = vpop.f32.mrb[134].mxu1 }
 0xbd2   :  { %v4031_v3 = vpop.f32.mrb[135].mxu1  ;;  %v4126_v4 = vpack.c.bf16 %v3370_v62, %v3369_v61 }
 0xbd3   :  { %v3347_v5 = vadd.f32 %v4029_v63, %v3209_v59  ;;  %v4032_v6 = vadd.f32 %v4031_v3, %v4030_v1 }
 0xbd4   :  { %4127 = vmatpush3.bf16.msra.mxu0 %v4126_v4 }
 0xbd5   :  { %v3363_v7 = vmul.f32 0.01, %v3347_v5  ;;  %v3348_v8 = vadd.f32 %v4032_v6, %v3210_v2  ;;  %4128 = vmatprep.subr.bf16.mxu0 %v4685_v21  ;;  %vm3355_vm11 = vcmp.ge.f32.partialorder %v3347_v5, 0.0 }
 0xbd7   :  { %vm3356_vm12 = vcmp.ge.f32.partialorder %v3348_v8, 0.0  ;;  %v3364_v9 = vmul.f32 0.01, %v3348_v8  ;;  %v4033_v10 = vpop.f32.mrb[136].mxu1  ;;  %v3371_v13 = vsel %vm3355_vm11, %v3347_v5, %v3363_v7 }
 0xbd8   :  { %v4034_v12 = vpop.f32.mrb[137].mxu1 }
 0xbd9   :  { %v3372_v14 = vsel %vm3356_vm12, %v3348_v8, %v3364_v9  ;;  %v4035_v15 = vadd.f32 %v4034_v12, %v4033_v10  ;;  %v4036_v16 = vpop.f32.mrb[138].mxu1 }
 0xbda   :  { %v4037_v18 = vpop.f32.mrb[139].mxu1  ;;  %v4129_v19 = vpack.c.bf16 %v3372_v14, %v3371_v13 }
 0xbdb   :  { %v3349_v20 = vadd.f32 %v4035_v15, %v3211_v11  ;;  %v4038_v22 = vadd.f32 %v4037_v18, %v4036_v16 }
 0xbdc   :  { %4130 = vmatpush3.bf16.msra.mxu0 %v4129_v19 }
 0xbdd   :  { %v3365_v23 = vmul.f32 0.01, %v3349_v20  ;;  %v3350_v24 = vadd.f32 %v4038_v22, %v3212_v17  ;;  %4131 = vmatprep.subr.bf16.mxu0 %v4685_v21  ;;  %vm3357_vm13 = vcmp.ge.f32.partialorder %v3349_v20, 0.0 }
 0xbdf   :  { %vm3358_vm14 = vcmp.ge.f32.partialorder %v3350_v24, 0.0  ;;  %v3366_v25 = vmul.f32 0.01, %v3350_v24  ;;  %v4039_v26 = vpop.f32.mrb[140].mxu1  ;;  %v3373_v29 = vsel %vm3357_vm13, %v3349_v20, %v3365_v23 }
 0xbe0   :  { %v4040_v28 = vpop.f32.mrb[141].mxu1 }
 0xbe1   :  { %v3374_v30 = vsel %vm3358_vm14, %v3350_v24, %v3366_v25  ;;  %v4041_v31 = vadd.f32 %v4040_v28, %v4039_v26  ;;  %v4042_v32 = vpop.f32.mrb[142].mxu1 }
 0xbe2   :  { %v4043_v34 = vpop.f32.mrb[143].mxu1  ;;  %v4132_v35 = vpack.c.bf16 %v3374_v30, %v3373_v29 }
 0xbe3   :  { %v3351_v36 = vadd.f32 %v4041_v31, %v3213_v27  ;;  %v4044_v37 = vadd.f32 %v4043_v34, %v4042_v32 }
 0xbe4   :  { %4133 = vmatpush3.bf16.msra.mxu0 %v4132_v35 }
 0xbe5   :  { %v3367_v38 = vmul.f32 0.01, %v3351_v36  ;;  %v3352_v0 = vadd.f32 %v4044_v37, %v3214_v33  ;;  %4134 = vmatprep.subr.bf16.mxu0 %v4685_v21  ;;  %vm3359_vm15 = vcmp.ge.f32.partialorder %v3351_v36, 0.0  ;;  %v3804_v21 = vld [vmem:[%s4885_s6] ss:$0 sm:$0xff] }
 0xbe7   :  { %vm3360_vm0 = vcmp.ge.f32.partialorder %v3352_v0, 0.0  ;;  %v3368_v39 = vmul.f32 0.01, %v3352_v0  ;;  %v3375_v40 = vsel %vm3359_vm15, %v3351_v36, %v3367_v38 }
 0xbe9   :  { %v3376_v41 = vsel %vm3360_vm0, %v3352_v0, %v3368_v39 }
 0xbea   :  { %v4135_v42 = vpack.c.bf16 %v3376_v41, %v3375_v40 }
 0xbec   :  { %4136 = vmatpush3.bf16.msra.mxu0 %v4135_v42 }
 0xbef   :  { %4088 = vmatmul.mubr.msk.f32.vlgmr.msra.gmra.mrb[144].mxu0 %vm3378_vm1, %v3377_v43 }
 0xcc2   :  { %v3448_v44 = vpop.f32.mrb[144].mxu0 }
 0xcc3   :  { %v4089_v45 = vpop.f32.mrb[145].mxu0  ;;  %4123 = vmatmul.mubr.f32.vlgmr.msra.gmra.mrb[144].mxu1 %v3448_v44 }
 0xd96   :  { %v3541_v46 = vpop.f32.mrb[144].mxu1 }
 0xd97   :  { %v3542_v47 = vadd.f32 %v3804_v21, %v3541_v46  ;;  %v4124_v48 = vpop.f32.mrb[145].mxu1 }
 0xd99   :  { %3545 = vst [vmem:[#allocation12] sm:$0xff] %v3542_v47 }
 0xd9a   :  { %4656 = shalt.err (!%p4653_p2)
}
 0xd9b   :  { %s4657_s21 = scalar_lea.hbm %s4886_s7, 128 }
 0xd9c   :  { %p4658_p3 = scmp.ne.s32.totalorder %s4886_s7, %s4657_s21  ;;  %p4661_p4 = scmp.lt.u32.totalorder %s4657_s21, %s4886_s7 }
 0xd9e   :  { %p4663_p5 = pnand %p4661_p4, %p4658_p3 }
 0xda0   :  { %4666 = shalt.err (!%p4663_p5)
}
 0xda1   :  { %3555 = dma.vmem_to_hbm [thread:$0]  %s3553_s17, 128, %s4886_s7, [#allocation5]  }
 0xda2   :  { %4673 = dma.done.wait [#allocation5], 128  }
 0xda3   :  { %4674 = vsyncadd [#allocation5], 4294967168 }
 0xda4   :  { %3559 = vsyncpa [#allocation4], 1 }
 0xda5   :  { %3560 = vsyncpa [#allocation7], 1 }
 0xda6   :  { %3561 = vsyncpa [#allocation10], 1 }
 0xda7   :  { %3562 = vsyncpa [#allocation5], 1 }

</bundles_post_ra>
